<compile_context>
chip_gen: v5e
topology: v5e:2x2
jax: 0.10.0
libtpu: 0.0.40
codegen_flags: <defaults>
</compile_context>

<pallas_src>
import functools

import jax
import jax.numpy as jnp
from jax.experimental import pallas as pl
from jax.experimental.pallas import tpu as pltpu

EPS = 1e-5
VMEM_LIMIT = 32 * 1024 * 1024   # safe on v5e / v6e / v7x


# --------------------------- pass 1: conv + stats --------------------------- #

def _conv_stats_kernel(x_ref, w_ref, y_ref, stats_ref, *, ho, wo, cout):
    """Per-frame 3x3 conv (3 shifted matmuls per pool phase) + BN partial stats.

    x_ref:     (1, 4*(Ho+1)*Wo, 3*Cin) bf16, width-im2col'ed padded frame with
               rows ordered (h-parity v, w-parity s, half-row u, half-col j).
    w_ref:     (3, 3*Cin, Cout) bf16 conv weight, resident (constant index_map).
    y_ref:     (1, 4, Ho*Wo, Cout) f32 pre-BN conv output, phase-major.
    stats_ref: (2, Cout) f32 accumulator: row 0 = sum, row 1 = sum of squares.
    """
    hw_q = ho * wo
    b = pl.program_id(0)

    @pl.when(b == 0)
    def _init():
        stats_ref[...] = jnp.zeros_like(stats_ref)

    ssum = jnp.zeros((1, cout), jnp.float32)
    ssq = jnp.zeros((1, cout), jnp.float32)

    for q in range(4):                       # pool phase q = (r, s)
        r, s = q // 2, q % 2
        acc = jnp.zeros((hw_q, cout), jnp.float32)
        for dh in range(3):                  # height taps, in-kernel halo
            a = r + dh                       # padded-row offset = 2*i + a
            v, u0 = a % 2, a // 2            # parity / half-row start (static)
            start = ((v * 2 + s) * (ho + 1) + u0) * wo
            xs = x_ref[0, pl.ds(start, hw_q), :]          # (Ho*Wo, 3*Cin) bf16
            acc = acc + jnp.dot(xs, w_ref[dh],
                                preferred_element_type=jnp.float32)
        y_ref[0, q] = acc
        ssum = ssum + jnp.sum(acc, axis=0, keepdims=True)
        ssq = ssq + jnp.sum(acc * acc, axis=0, keepdims=True)

    stats_ref[0:1, :] += ssum
    stats_ref[1:2, :] += ssq


# ---------------------- pass 2: normalize + ReLU + pool ---------------------- #

def _norm_relu_pool_kernel(y_ref, sc_ref, sh_ref, o_ref):
    """y_ref: (1, 4, Ho, Wo*Cout) f32;  sc/sh: (1, Wo*Cout) tiled scale/shift.

    2x2 avg pool = mean over the 4 phase slabs (whole-tile VPU adds); output is
    stored lane-dense as (Ho, Wo*Cout).
    """
    sc = sc_ref[...]
    sh = sh_ref[...]
    acc = jnp.maximum(y_ref[0, 0] * sc + sh, 0.0)
    for q in range(1, 4):
        acc = acc + jnp.maximum(y_ref[0, q] * sc + sh, 0.0)
    o_ref[0] = acc * 0.25


# ------------------------------ glue / wrapper ------------------------------ #

def down_block(x_bhwc, weight, bias, gamma, beta):
    """One DownBlock3D on flattened frames: (B, H, W, Cin) -> (B, H//2, W//2, Cout)."""
    B, H, W, Cin = x_bhwc.shape
    assert H % 2 == 0 and W % 2 == 0, "AvgPool3d((1,2,2)) path assumes even H, W"
    Cout = weight.shape[0]
    Ho, Wo = H // 2, W // 2
    K3 = 3 * Cin

    # Conv bias cancels exactly under training-mode BatchNorm (removed by the
    # batch-mean subtraction), so it is not passed to the kernels.
    del bias

    # --- light XLA glue: bf16-early cast, pad, width-only (3x) im2col,
    #     pool-phase-major row reorder.  No 9x f32 inflation. ---
    xb = x_bhwc.astype(jnp.bfloat16)
    xp = jnp.pad(xb, ((0, 0), (1, 1), (1, 1), (0, 0)))          # (B, H+2, W+2, Cin)
    xw = jnp.concatenate([xp[:, :, dw:dw + W, :] for dw in range(3)], axis=-1)
    # (B, H+2, W, 3Cin) -> (B, v, s, u, j, 3Cin) -> (B, 4*(Ho+1)*Wo, 3Cin)
    xw = xw.reshape(B, Ho + 1, 2, Wo, 2, K3)
    xq = jnp.transpose(xw, (0, 2, 4, 1, 3, 5)).reshape(B, 4 * (Ho + 1) * Wo, K3)

    # torch Conv3d weight (Cout, Cin, 1, 3, 3) -> (3(dh), 3*Cin(dw-major), Cout)
    wmat = jnp.transpose(weight[:, :, 0], (2, 3, 1, 0)).reshape(3, K3, Cout)
    wmat = wmat.astype(jnp.bfloat16)

    # ----------------- pass 1: conv + per-channel sum / sum-sq ----------------- #
    flops1 = 2 * B * H * W * 9 * Cin * Cout + 4 * B * H * W * Cout
    bytes1 = xq.size * 2 + wmat.size * 2 + B * H * W * Cout * 4 + 2 * Cout * 4
    y, stats = pl.pallas_call(
        functools.partial(_conv_stats_kernel, ho=Ho, wo=Wo, cout=Cout),
        grid=(B,),
        in_specs=[
            pl.BlockSpec((1, 4 * (Ho + 1) * Wo, K3), lambda b: (b, 0, 0)),
            pl.BlockSpec((3, K3, Cout), lambda b: (0, 0, 0)),    # resident weight
        ],
        out_specs=[
            pl.BlockSpec((1, 4, Ho * Wo, Cout), lambda b: (b, 0, 0, 0)),
            pl.BlockSpec((2, Cout), lambda b: (0, 0)),           # stats accumulator
        ],
        out_shape=[
            jax.ShapeDtypeStruct((B, 4, Ho * Wo, Cout), jnp.float32),
            jax.ShapeDtypeStruct((2, Cout), jnp.float32),
        ],
        compiler_params=pltpu.CompilerParams(
            dimension_semantics=("arbitrary",),      # stats accumulate over frames
            vmem_limit_bytes=VMEM_LIMIT),
        cost_estimate=pl.CostEstimate(flops=int(flops1), transcendentals=0,
                                      bytes_accessed=int(bytes1)),
    )(xq, wmat)

    # --- BN scale/shift from batch stats: computed ONCE, outside the grid ---
    m_total = float(B * H * W)
    mean = stats[0] / m_total
    var = jnp.maximum(stats[1] / m_total - mean * mean, 0.0)     # biased variance
    scale = gamma.astype(jnp.float32) * jax.lax.rsqrt(var + EPS)
    shift = beta.astype(jnp.float32) - mean * scale
    scale_t = jnp.tile(scale, Wo)[None, :]                        # (1, Wo*Cout)
    shift_t = jnp.tile(shift, Wo)[None, :]

    # --------------- pass 2: normalize + ReLU + 2x2 avg pool ---------------- #
    y4 = y.reshape(B, 4, Ho, Wo * Cout)        # same HBM layout: free reshape
    flops2 = 4 * B * H * W * Cout
    bytes2 = y4.size * 4 + 2 * Wo * Cout * 4 + B * Ho * Wo * Cout * 4
    out = pl.pallas_call(
        _norm_relu_pool_kernel,
        grid=(B,),
        in_specs=[
            pl.BlockSpec((1, 4, Ho, Wo * Cout), lambda b: (b, 0, 0, 0)),
            pl.BlockSpec((1, Wo * Cout), lambda b: (0, 0)),
            pl.BlockSpec((1, Wo * Cout), lambda b: (0, 0)),
        ],
        out_specs=pl.BlockSpec((1, Ho, Wo * Cout), lambda b: (b, 0, 0)),
        out_shape=jax.ShapeDtypeStruct((B, Ho, Wo * Cout), jnp.float32),
        compiler_params=pltpu.CompilerParams(
            dimension_semantics=("parallel",),       # independent frames (v7x 2 TC)
            vmem_limit_bytes=VMEM_LIMIT),
        cost_estimate=pl.CostEstimate(flops=int(flops2), transcendentals=0,
                                      bytes_accessed=int(bytes2)),
    )(y4, scale_t, shift_t)

    return out.reshape(B, Ho, Wo, Cout)


def init_params(key, block_expansion, in_features, num_blocks, max_features):
    params = []
    for i in range(num_blocks):
        cin = in_features if i == 0 else min(max_features, block_expansion * 2 ** i)
        cout = min(max_features, block_expansion * 2 ** (i + 1))
        k1, k2, key = jax.random.split(key, 3)
        params.append(dict(
            w=jax.random.normal(k1, (cout, cin, 1, 3, 3), jnp.float32) * 0.1,
            b=jax.random.normal(k2, (cout,), jnp.float32) * 0.1,
            gamma=jnp.ones((cout,), jnp.float32),   # BatchNorm affine init
            beta=jnp.zeros((cout,), jnp.float32),
        ))
    return params


def encoder_forward(x_ncdhw, params):
    """Matches Encoder.forward: returns [x, out1, out2, ...] in NCDHW."""
    N, C, D, H, W = x_ncdhw.shape
    outs = [x_ncdhw]
    cur = jnp.transpose(x_ncdhw, (0, 2, 3, 4, 1)).reshape(N * D, H, W, C)
    for p in params:
        cur = down_block(cur, p["w"], p["b"], p["gamma"], p["beta"])
        Bc, Hc, Wc, Cc = cur.shape
        outs.append(jnp.transpose(cur.reshape(N, D, Hc, Wc, Cc), (0, 4, 1, 2, 3)))
    return outs


# ------------------------- pure-JAX reference check ------------------------- #

def encoder_forward_ref(x_ncdhw, params):
    outs = [x_ncdhw]
    cur = x_ncdhw
    for p in params:
        N, C, D, H, W = cur.shape
        xin = jnp.transpose(cur, (0, 2, 1, 3, 4)).reshape(N * D, C, H, W)
        w2 = p["w"][:, :, 0]                                     # (Cout, Cin, 3, 3)
        y = jax.lax.conv_general_dilated(
            xin, w2, window_strides=(1, 1), padding=((1, 1), (1, 1)),
            dimension_numbers=("NCHW", "OIHW", "NCHW"),
            precision=jax.lax.Precision.HIGHEST)
        y = y + p["b"][None, :, None, None]
        mean = jnp.mean(y, axis=(0, 2, 3), keepdims=True)
        var = jnp.mean((y - mean) ** 2, axis=(0, 2, 3), keepdims=True)  # biased
        y = (y - mean) * jax.lax.rsqrt(var + EPS)
        y = y * p["gamma"][None, :, None, None] + p["beta"][None, :, None, None]
        y = jnp.maximum(y, 0.0)
        B2, C2, H2, W2 = y.shape
        y = y.reshape(B2, C2, H2 // 2, 2, W2 // 2, 2).mean(axis=(3, 5))
        cur = jnp.transpose(y.reshape(N, D, C2, H2 // 2, W2 // 2), (0, 2, 1, 3, 4))
        outs.append(cur)
    return outs


if __name__ == "__main__":
    key = jax.random.PRNGKey(0)
    kx, kp = jax.random.split(key)

    # Small shapes consistent with the module: NCDHW video input.
    N, Cin, D, H, W = 2, 4, 2, 16, 16
    x = jax.random.normal(kx, (N, Cin, D, H, W), jnp.float32)

    params = init_params(kp, block_expansion=8, in_features=Cin,
                         num_blocks=3, max_features=32)

    outs = jax.jit(encoder_forward)(x, params)
    for o in outs:
        jax.block_until_ready(o)

    # Expected shapes: (2,4,2,16,16) -> (2,16,2,8,8) -> (2,32,2,4,4) -> (2,32,2,2,2)
    assert outs[0].shape == (2, 4, 2, 16, 16)
    assert outs[1].shape == (2, 16, 2, 8, 8)
    assert outs[2].shape == (2, 32, 2, 4, 4)
    assert outs[3].shape == (2, 32, 2, 2, 2)

    # Numerical sanity vs pure-JAX reference (loose tolerance: bf16 MXU operands).
    ref_outs = encoder_forward_ref(x, params)
    for o, r in zip(outs, ref_outs):
        assert o.shape == r.shape
        err = float(jnp.max(jnp.abs(o - r)))
        assert err < 0.15, f"max abs err too large: {err}"

    print("KERNEL_OK")
</pallas_src>

<mosaic_0001>
module attributes {stable_mosaic.version = 11 : i64} {
  func.func @_norm_relu_pool_kernel(%arg0: i32, %arg1: memref<1x4x8x128xf32, #tpu.memory_space<vmem>>, %arg2: memref<1x128xf32, #tpu.memory_space<vmem>>, %arg3: memref<1x128xf32, #tpu.memory_space<vmem>>, %arg4: memref<1x8x128xf32, #tpu.memory_space<vmem>>) attributes {dimension_semantics = [#tpu.dimension_semantics<parallel>], iteration_bounds = array<i64: 4>, scalar_prefetch = 0 : i64, scratch_operands = 0 : i64, tpu.core_type = #tpu.core_type<tc>, window_params = [{transform_indices = @transform_0, window_bounds = array<i64: 1, 4, 8, 128>}, {pipeline_mode = #tpu.pipeline_mode<synchronous>, transform_indices = @transform_1, window_bounds = array<i64: 1, 128>}, {pipeline_mode = #tpu.pipeline_mode<synchronous>, transform_indices = @transform_2, window_bounds = array<i64: 1, 128>}, {transform_indices = @transform_3, window_bounds = array<i64: 1, 8, 128>}]} {
    %c0 = arith.constant 0 : index
    %c0_0 = arith.constant 0 : index
    %0 = vector.load %arg2[%c0, %c0_0] : memref<1x128xf32, #tpu.memory_space<vmem>>, vector<1x128xf32>
    %c0_1 = arith.constant 0 : index
    %c0_2 = arith.constant 0 : index
    %1 = vector.load %arg3[%c0_1, %c0_2] : memref<1x128xf32, #tpu.memory_space<vmem>>, vector<1x128xf32>
    %c0_3 = arith.constant 0 : index
    %c0_4 = arith.constant 0 : index
    %c0_5 = arith.constant 0 : index
    %c0_6 = arith.constant 0 : index
    %2 = vector.load %arg1[%c0_3, %c0_4, %c0_5, %c0_6] : memref<1x4x8x128xf32, #tpu.memory_space<vmem>>, vector<1x1x8x128xf32>
    %3 = vector.shape_cast %2 : vector<1x1x8x128xf32> to vector<8x128xf32>
    %4 = vector.broadcast %0 : vector<1x128xf32> to vector<8x128xf32>
    %5 = arith.mulf %3, %4 : vector<8x128xf32>
    %6 = vector.broadcast %1 : vector<1x128xf32> to vector<8x128xf32>
    %7 = arith.addf %5, %6 : vector<8x128xf32>
    %cst = arith.constant 0.000000e+00 : f32
    %8 = vector.broadcast %cst : f32 to vector<8x128xf32>
    %9 = arith.maximumf %7, %8 : vector<8x128xf32>
    %c0_7 = arith.constant 0 : index
    %c1 = arith.constant 1 : index
    %c0_8 = arith.constant 0 : index
    %c0_9 = arith.constant 0 : index
    %10 = vector.load %arg1[%c0_7, %c1, %c0_8, %c0_9] : memref<1x4x8x128xf32, #tpu.memory_space<vmem>>, vector<1x1x8x128xf32>
    %11 = vector.shape_cast %10 : vector<1x1x8x128xf32> to vector<8x128xf32>
    %12 = vector.broadcast %0 : vector<1x128xf32> to vector<8x128xf32>
    %13 = arith.mulf %11, %12 : vector<8x128xf32>
    %14 = vector.broadcast %1 : vector<1x128xf32> to vector<8x128xf32>
    %15 = arith.addf %13, %14 : vector<8x128xf32>
    %cst_10 = arith.constant 0.000000e+00 : f32
    %16 = vector.broadcast %cst_10 : f32 to vector<8x128xf32>
    %17 = arith.maximumf %15, %16 : vector<8x128xf32>
    %18 = arith.addf %9, %17 : vector<8x128xf32>
    %c0_11 = arith.constant 0 : index
    %c2 = arith.constant 2 : index
    %c0_12 = arith.constant 0 : index
    %c0_13 = arith.constant 0 : index
    %19 = vector.load %arg1[%c0_11, %c2, %c0_12, %c0_13] : memref<1x4x8x128xf32, #tpu.memory_space<vmem>>, vector<1x1x8x128xf32>
    %20 = vector.shape_cast %19 : vector<1x1x8x128xf32> to vector<8x128xf32>
    %21 = vector.broadcast %0 : vector<1x128xf32> to vector<8x128xf32>
    %22 = arith.mulf %20, %21 : vector<8x128xf32>
    %23 = vector.broadcast %1 : vector<1x128xf32> to vector<8x128xf32>
    %24 = arith.addf %22, %23 : vector<8x128xf32>
    %cst_14 = arith.constant 0.000000e+00 : f32
    %25 = vector.broadcast %cst_14 : f32 to vector<8x128xf32>
    %26 = arith.maximumf %24, %25 : vector<8x128xf32>
    %27 = arith.addf %18, %26 : vector<8x128xf32>
    %c0_15 = arith.constant 0 : index
    %c3 = arith.constant 3 : index
    %c0_16 = arith.constant 0 : index
    %c0_17 = arith.constant 0 : index
    %28 = vector.load %arg1[%c0_15, %c3, %c0_16, %c0_17] : memref<1x4x8x128xf32, #tpu.memory_space<vmem>>, vector<1x1x8x128xf32>
    %29 = vector.shape_cast %28 : vector<1x1x8x128xf32> to vector<8x128xf32>
    %30 = vector.broadcast %0 : vector<1x128xf32> to vector<8x128xf32>
    %31 = arith.mulf %29, %30 : vector<8x128xf32>
    %32 = vector.broadcast %1 : vector<1x128xf32> to vector<8x128xf32>
    %33 = arith.addf %31, %32 : vector<8x128xf32>
    %cst_18 = arith.constant 0.000000e+00 : f32
    %34 = vector.broadcast %cst_18 : f32 to vector<8x128xf32>
    %35 = arith.maximumf %33, %34 : vector<8x128xf32>
    %36 = arith.addf %27, %35 : vector<8x128xf32>
    %cst_19 = arith.constant 2.500000e-01 : f32
    %37 = vector.broadcast %cst_19 : f32 to vector<8x128xf32>
    %38 = arith.mulf %36, %37 : vector<8x128xf32>
    %c0_20 = arith.constant 0 : index
    %c0_21 = arith.constant 0 : index
    %c0_22 = arith.constant 0 : index
    %39 = vector.load %arg4[%c0_20, %c0_21, %c0_22] : memref<1x8x128xf32, #tpu.memory_space<vmem>>, vector<1x8x128xf32>
    %40 = vector.shape_cast %39 : vector<1x8x128xf32> to vector<8x128xf32>
    %41 = vector.shape_cast %38 : vector<8x128xf32> to vector<1x8x128xf32>
    tpu.vector_store %arg4[%c0_20, %c0_21, %c0_22], %41 {strides = array<i32>} : memref<1x8x128xf32, #tpu.memory_space<vmem>>, vector<1x8x128xf32>,
    return
  }
  func.func @transform_0(%arg0: i32) -> (i32, i32, i32, i32) {
    %c0_i32 = arith.constant 0 : i32
    %c0_i32_0 = arith.constant 0 : i32
    %c0_i32_1 = arith.constant 0 : i32
    %c0_i32_2 = arith.constant 0 : i32
    return %arg0, %c0_i32, %c0_i32_0, %c0_i32_1 : i32, i32, i32, i32
  }
  func.func @transform_1(%arg0: i32) -> (i32, i32) {
    %c0_i32 = arith.constant 0 : i32
    %c0_i32_0 = arith.constant 0 : i32
    %c0_i32_1 = arith.constant 0 : i32
    return %c0_i32, %c0_i32_0 : i32, i32
  }
  func.func @transform_2(%arg0: i32) -> (i32, i32) {
    %c0_i32 = arith.constant 0 : i32
    %c0_i32_0 = arith.constant 0 : i32
    %c0_i32_1 = arith.constant 0 : i32
    return %c0_i32, %c0_i32_0 : i32, i32
  }
  func.func @transform_3(%arg0: i32) -> (i32, i32, i32) {
    %c0_i32 = arith.constant 0 : i32
    %c0_i32_0 = arith.constant 0 : i32
    %c0_i32_1 = arith.constant 0 : i32
    return %arg0, %c0_i32, %c0_i32_0 : i32, i32, i32
  }
}

module attributes {stable_mosaic.version = 11 : i64} {
  func.func @_conv_stats_kernel(%arg0: i32, %arg1: memref<1x288x12xbf16, #tpu.memory_space<vmem>>, %arg2: memref<3x12x16xbf16, #tpu.memory_space<vmem>>, %arg3: memref<1x4x64x16xf32, #tpu.memory_space<vmem>>, %arg4: memref<2x16xf32, #tpu.memory_space<vmem>>) attributes {dimension_semantics = [#tpu.dimension_semantics<arbitrary>], iteration_bounds = array<i64: 4>, scalar_prefetch = 0 : i64, scratch_operands = 0 : i64, tpu.core_type = #tpu.core_type<tc>, window_params = [{transform_indices = @transform_0, window_bounds = array<i64: 1, 288, 12>}, {pipeline_mode = #tpu.pipeline_mode<synchronous>, transform_indices = @transform_1, window_bounds = array<i64: 3, 12, 16>}, {transform_indices = @transform_2, window_bounds = array<i64: 1, 4, 64, 16>}, {pipeline_mode = #tpu.pipeline_mode<synchronous>, transform_indices = @transform_3, window_bounds = array<i64: 2, 16>}]} {
    %c0_i32 = arith.constant 0 : i32
    %0 = arith.cmpi eq, %arg0, %c0_i32 : i32
    %1 = arith.extui %0 : i1 to i32
    %c0_i32_0 = arith.constant 0 : i32
    %2 = arith.cmpi ne, %1, %c0_i32_0 : i32
    scf.if %2 {
      %cst_111 = arith.constant 0.000000e+00 : f32
      %127 = vector.broadcast %cst_111 : f32 to vector<2x16xf32>
      %c0_112 = arith.constant 0 : index
      %c0_113 = arith.constant 0 : index
      %128 = vector.load %arg4[%c0_112, %c0_113] : memref<2x16xf32, #tpu.memory_space<vmem>>, vector<2x16xf32>
      tpu.vector_store %arg4[%c0_112, %c0_113], %127 {strides = array<i32>} : memref<2x16xf32, #tpu.memory_space<vmem>>, vector<2x16xf32>,
    } else {
    }
    %cst = arith.constant 0.000000e+00 : f32
    %3 = vector.broadcast %cst : f32 to vector<1x16xf32>
    %cst_1 = arith.constant 0.000000e+00 : f32
    %4 = vector.broadcast %cst_1 : f32 to vector<1x16xf32>
    %cst_2 = arith.constant 0.000000e+00 : f32
    %5 = vector.broadcast %cst_2 : f32 to vector<64x16xf32>
    %c0 = arith.constant 0 : index
    %c0_3 = arith.constant 0 : index
    %c0_4 = arith.constant 0 : index
    %6 = vector.load %arg1[%c0, %c0_3, %c0_4] : memref<1x288x12xbf16, #tpu.memory_space<vmem>>, vector<1x64x12xbf16>
    %7 = vector.shape_cast %6 : vector<1x64x12xbf16> to vector<64x12xbf16>
    %c0_5 = arith.constant 0 : index
    %c0_6 = arith.constant 0 : index
    %c0_7 = arith.constant 0 : index
    %8 = vector.load %arg2[%c0_5, %c0_6, %c0_7] : memref<3x12x16xbf16, #tpu.memory_space<vmem>>, vector<1x12x16xbf16>
    %9 = vector.shape_cast %8 : vector<1x12x16xbf16> to vector<12x16xbf16>
    %cst_8 = arith.constant dense<0.000000e+00> : vector<64x16xf32>
    %10 = tpu.matmul %7, %9, %cst_8 {dimension_numbers = #tpu.dot_dimension_numbers<[1], [0], [0], [1], [0, 0, 1, 1], [], []>} : vector<64x12xbf16>, vector<12x16xbf16>, vector<64x16xf32> -> vector<64x16xf32>
    %11 = arith.addf %5, %10 : vector<64x16xf32>
    %c0_9 = arith.constant 0 : index
    %c144 = arith.constant 144 : index
    %c0_10 = arith.constant 0 : index
    %12 = vector.load %arg1[%c0_9, %c144, %c0_10] : memref<1x288x12xbf16, #tpu.memory_space<vmem>>, vector<1x64x12xbf16>
    %13 = vector.shape_cast %12 : vector<1x64x12xbf16> to vector<64x12xbf16>
    %c1 = arith.constant 1 : index
    %c0_11 = arith.constant 0 : index
    %c0_12 = arith.constant 0 : index
    %14 = vector.load %arg2[%c1, %c0_11, %c0_12] : memref<3x12x16xbf16, #tpu.memory_space<vmem>>, vector<1x12x16xbf16>
    %15 = vector.shape_cast %14 : vector<1x12x16xbf16> to vector<12x16xbf16>
    %cst_13 = arith.constant dense<0.000000e+00> : vector<64x16xf32>
    %16 = tpu.matmul %13, %15, %cst_13 {dimension_numbers = #tpu.dot_dimension_numbers<[1], [0], [0], [1], [0, 0, 1, 1], [], []>} : vector<64x12xbf16>, vector<12x16xbf16>, vector<64x16xf32> -> vector<64x16xf32>
    %17 = arith.addf %11, %16 : vector<64x16xf32>
    %c0_14 = arith.constant 0 : index
    %c8 = arith.constant 8 : index
    %c0_15 = arith.constant 0 : index
    %18 = vector.load %arg1[%c0_14, %c8, %c0_15] : memref<1x288x12xbf16, #tpu.memory_space<vmem>>, vector<1x64x12xbf16>
    %19 = vector.shape_cast %18 : vector<1x64x12xbf16> to vector<64x12xbf16>
    %c2 = arith.constant 2 : index
    %c0_16 = arith.constant 0 : index
    %c0_17 = arith.constant 0 : index
    %20 = vector.load %arg2[%c2, %c0_16, %c0_17] : memref<3x12x16xbf16, #tpu.memory_space<vmem>>, vector<1x12x16xbf16>
    %21 = vector.shape_cast %20 : vector<1x12x16xbf16> to vector<12x16xbf16>
    %cst_18 = arith.constant dense<0.000000e+00> : vector<64x16xf32>
    %22 = tpu.matmul %19, %21, %cst_18 {dimension_numbers = #tpu.dot_dimension_numbers<[1], [0], [0], [1], [0, 0, 1, 1], [], []>} : vector<64x12xbf16>, vector<12x16xbf16>, vector<64x16xf32> -> vector<64x16xf32>
    %23 = arith.addf %17, %22 : vector<64x16xf32>
    %c0_19 = arith.constant 0 : index
    %c0_20 = arith.constant 0 : index
    %c0_21 = arith.constant 0 : index
    %c0_22 = arith.constant 0 : index
    %24 = vector.load %arg3[%c0_19, %c0_20, %c0_21, %c0_22] : memref<1x4x64x16xf32, #tpu.memory_space<vmem>>, vector<1x1x64x16xf32>
    %25 = vector.shape_cast %24 : vector<1x1x64x16xf32> to vector<64x16xf32>
    %26 = vector.shape_cast %23 : vector<64x16xf32> to vector<1x1x64x16xf32>
    tpu.vector_store %arg3[%c0_19, %c0_20, %c0_21, %c0_22], %26 {strides = array<i32>} : memref<1x4x64x16xf32, #tpu.memory_space<vmem>>, vector<1x1x64x16xf32>,
    %cst_23 = arith.constant dense<0.000000e+00> : vector<16xf32>
    %27 = vector.multi_reduction <add>, %23, %cst_23 [0] : vector<64x16xf32> to vector<16xf32>
    %28 = vector.shape_cast %27 : vector<16xf32> to vector<1x16xf32>
    %29 = arith.addf %3, %28 : vector<1x16xf32>
    %30 = arith.mulf %23, %23 : vector<64x16xf32>
    %cst_24 = arith.constant dense<0.000000e+00> : vector<16xf32>
    %31 = vector.multi_reduction <add>, %30, %cst_24 [0] : vector<64x16xf32> to vector<16xf32>
    %32 = vector.shape_cast %31 : vector<16xf32> to vector<1x16xf32>
    %33 = arith.addf %4, %32 : vector<1x16xf32>
    %cst_25 = arith.constant 0.000000e+00 : f32
    %34 = vector.broadcast %cst_25 : f32 to vector<64x16xf32>
    %c0_26 = arith.constant 0 : index
    %c72 = arith.constant 72 : index
    %c0_27 = arith.constant 0 : index
    %35 = vector.load %arg1[%c0_26, %c72, %c0_27] : memref<1x288x12xbf16, #tpu.memory_space<vmem>>, vector<1x64x12xbf16>
    %36 = vector.shape_cast %35 : vector<1x64x12xbf16> to vector<64x12xbf16>
    %c0_28 = arith.constant 0 : index
    %c0_29 = arith.constant 0 : index
    %c0_30 = arith.constant 0 : index
    %37 = vector.load %arg2[%c0_28, %c0_29, %c0_30] : memref<3x12x16xbf16, #tpu.memory_space<vmem>>, vector<1x12x16xbf16>
    %38 = vector.shape_cast %37 : vector<1x12x16xbf16> to vector<12x16xbf16>
    %cst_31 = arith.constant dense<0.000000e+00> : vector<64x16xf32>
    %39 = tpu.matmul %36, %38, %cst_31 {dimension_numbers = #tpu.dot_dimension_numbers<[1], [0], [0], [1], [0, 0, 1, 1], [], []>} : vector<64x12xbf16>, vector<12x16xbf16>, vector<64x16xf32> -> vector<64x16xf32>
    %40 = arith.addf %34, %39 : vector<64x16xf32>
    %c0_32 = arith.constant 0 : index
    %c216 = arith.constant 216 : index
    %c0_33 = arith.constant 0 : index
    %41 = vector.load %arg1[%c0_32, %c216, %c0_33] : memref<1x288x12xbf16, #tpu.memory_space<vmem>>, vector<1x64x12xbf16>
    %42 = vector.shape_cast %41 : vector<1x64x12xbf16> to vector<64x12xbf16>
    %c1_34 = arith.constant 1 : index
    %c0_35 = arith.constant 0 : index
    %c0_36 = arith.constant 0 : index
    %43 = vector.load %arg2[%c1_34, %c0_35, %c0_36] : memref<3x12x16xbf16, #tpu.memory_space<vmem>>, vector<1x12x16xbf16>
    %44 = vector.shape_cast %43 : vector<1x12x16xbf16> to vector<12x16xbf16>
    %cst_37 = arith.constant dense<0.000000e+00> : vector<64x16xf32>
    %45 = tpu.matmul %42, %44, %cst_37 {dimension_numbers = #tpu.dot_dimension_numbers<[1], [0], [0], [1], [0, 0, 1, 1], [], []>} : vector<64x12xbf16>, vector<12x16xbf16>, vector<64x16xf32> -> vector<64x16xf32>
    %46 = arith.addf %40, %45 : vector<64x16xf32>
    %c0_38 = arith.constant 0 : index
    %c80 = arith.constant 80 : index
    %c0_39 = arith.constant 0 : index
    %47 = vector.load %arg1[%c0_38, %c80, %c0_39] : memref<1x288x12xbf16, #tpu.memory_space<vmem>>, vector<1x64x12xbf16>
    %48 = vector.shape_cast %47 : vector<1x64x12xbf16> to vector<64x12xbf16>
    %c2_40 = arith.constant 2 : index
    %c0_41 = arith.constant 0 : index
    %c0_42 = arith.constant 0 : index
    %49 = vector.load %arg2[%c2_40, %c0_41, %c0_42] : memref<3x12x16xbf16, #tpu.memory_space<vmem>>, vector<1x12x16xbf16>
    %50 = vector.shape_cast %49 : vector<1x12x16xbf16> to vector<12x16xbf16>
    %cst_43 = arith.constant dense<0.000000e+00> : vector<64x16xf32>
    %51 = tpu.matmul %48, %50, %cst_43 {dimension_numbers = #tpu.dot_dimension_numbers<[1], [0], [0], [1], [0, 0, 1, 1], [], []>} : vector<64x12xbf16>, vector<12x16xbf16>, vector<64x16xf32> -> vector<64x16xf32>
    %52 = arith.addf %46, %51 : vector<64x16xf32>
    %c0_44 = arith.constant 0 : index
    %c1_45 = arith.constant 1 : index
    %c0_46 = arith.constant 0 : index
    %c0_47 = arith.constant 0 : index
    %53 = vector.load %arg3[%c0_44, %c1_45, %c0_46, %c0_47] : memref<1x4x64x16xf32, #tpu.memory_space<vmem>>, vector<1x1x64x16xf32>
    %54 = vector.shape_cast %53 : vector<1x1x64x16xf32> to vector<64x16xf32>
    %55 = vector.shape_cast %52 : vector<64x16xf32> to vector<1x1x64x16xf32>
    tpu.vector_store %arg3[%c0_44, %c1_45, %c0_46, %c0_47], %55 {strides = array<i32>} : memref<1x4x64x16xf32, #tpu.memory_space<vmem>>, vector<1x1x64x16xf32>,
    %cst_48 = arith.constant dense<0.000000e+00> : vector<16xf32>
    %56 = vector.multi_reduction <add>, %52, %cst_48 [0] : vector<64x16xf32> to vector<16xf32>
    %57 = vector.shape_cast %56 : vector<16xf32> to vector<1x16xf32>
    %58 = arith.addf %29, %57 : vector<1x16xf32>
    %59 = arith.mulf %52, %52 : vector<64x16xf32>
    %cst_49 = arith.constant dense<0.000000e+00> : vector<16xf32>
    %60 = vector.multi_reduction <add>, %59, %cst_49 [0] : vector<64x16xf32> to vector<16xf32>
    %61 = vector.shape_cast %60 : vector<16xf32> to vector<1x16xf32>
    %62 = arith.addf %33, %61 : vector<1x16xf32>
    %cst_50 = arith.constant 0.000000e+00 : f32
    %63 = vector.broadcast %cst_50 : f32 to vector<64x16xf32>
    %c0_51 = arith.constant 0 : index
    %c144_52 = arith.constant 144 : index
    %c0_53 = arith.constant 0 : index
    %64 = vector.load %arg1[%c0_51, %c144_52, %c0_53] : memref<1x288x12xbf16, #tpu.memory_space<vmem>>, vector<1x64x12xbf16>
    %65 = vector.shape_cast %64 : vector<1x64x12xbf16> to vector<64x12xbf16>
    %c0_54 = arith.constant 0 : index
    %c0_55 = arith.constant 0 : index
    %c0_56 = arith.constant 0 : index
    %66 = vector.load %arg2[%c0_54, %c0_55, %c0_56] : memref<3x12x16xbf16, #tpu.memory_space<vmem>>, vector<1x12x16xbf16>
    %67 = vector.shape_cast %66 : vector<1x12x16xbf16> to vector<12x16xbf16>
    %cst_57 = arith.constant dense<0.000000e+00> : vector<64x16xf32>
    %68 = tpu.matmul %65, %67, %cst_57 {dimension_numbers = #tpu.dot_dimension_numbers<[1], [0], [0], [1], [0, 0, 1, 1], [], []>} : vector<64x12xbf16>, vector<12x16xbf16>, vector<64x16xf32> -> vector<64x16xf32>
    %69 = arith.addf %63, %68 : vector<64x16xf32>
    %c0_58 = arith.constant 0 : index
    %c8_59 = arith.constant 8 : index
    %c0_60 = arith.constant 0 : index
    %70 = vector.load %arg1[%c0_58, %c8_59, %c0_60] : memref<1x288x12xbf16, #tpu.memory_space<vmem>>, vector<1x64x12xbf16>
    %71 = vector.shape_cast %70 : vector<1x64x12xbf16> to vector<64x12xbf16>
    %c1_61 = arith.constant 1 : index
    %c0_62 = arith.constant 0 : index
    %c0_63 = arith.constant 0 : index
    %72 = vector.load %arg2[%c1_61, %c0_62, %c0_63] : memref<3x12x16xbf16, #tpu.memory_space<vmem>>, vector<1x12x16xbf16>
    %73 = vector.shape_cast %72 : vector<1x12x16xbf16> to vector<12x16xbf16>
    %cst_64 = arith.constant dense<0.000000e+00> : vector<64x16xf32>
    %74 = tpu.matmul %71, %73, %cst_64 {dimension_numbers = #tpu.dot_dimension_numbers<[1], [0], [0], [1], [0, 0, 1, 1], [], []>} : vector<64x12xbf16>, vector<12x16xbf16>, vector<64x16xf32> -> vector<64x16xf32>
    %75 = arith.addf %69, %74 : vector<64x16xf32>
    %c0_65 = arith.constant 0 : index
    %c152 = arith.constant 152 : index
    %c0_66 = arith.constant 0 : index
    %76 = vector.load %arg1[%c0_65, %c152, %c0_66] : memref<1x288x12xbf16, #tpu.memory_space<vmem>>, vector<1x64x12xbf16>
    %77 = vector.shape_cast %76 : vector<1x64x12xbf16> to vector<64x12xbf16>
    %c2_67 = arith.constant 2 : index
    %c0_68 = arith.constant 0 : index
    %c0_69 = arith.constant 0 : index
    %78 = vector.load %arg2[%c2_67, %c0_68, %c0_69] : memref<3x12x16xbf16, #tpu.memory_space<vmem>>, vector<1x12x16xbf16>
    %79 = vector.shape_cast %78 : vector<1x12x16xbf16> to vector<12x16xbf16>
    %cst_70 = arith.constant dense<0.000000e+00> : vector<64x16xf32>
    %80 = tpu.matmul %77, %79, %cst_70 {dimension_numbers = #tpu.dot_dimension_numbers<[1], [0], [0], [1], [0, 0, 1, 1], [], []>} : vector<64x12xbf16>, vector<12x16xbf16>, vector<64x16xf32> -> vector<64x16xf32>
    %81 = arith.addf %75, %80 : vector<64x16xf32>
    %c0_71 = arith.constant 0 : index
    %c2_72 = arith.constant 2 : index
    %c0_73 = arith.constant 0 : index
    %c0_74 = arith.constant 0 : index
    %82 = vector.load %arg3[%c0_71, %c2_72, %c0_73, %c0_74] : memref<1x4x64x16xf32, #tpu.memory_space<vmem>>, vector<1x1x64x16xf32>
    %83 = vector.shape_cast %82 : vector<1x1x64x16xf32> to vector<64x16xf32>
    %84 = vector.shape_cast %81 : vector<64x16xf32> to vector<1x1x64x16xf32>
    tpu.vector_store %arg3[%c0_71, %c2_72, %c0_73, %c0_74], %84 {strides = array<i32>} : memref<1x4x64x16xf32, #tpu.memory_space<vmem>>, vector<1x1x64x16xf32>,
    %cst_75 = arith.constant dense<0.000000e+00> : vector<16xf32>
    %85 = vector.multi_reduction <add>, %81, %cst_75 [0] : vector<64x16xf32> to vector<16xf32>
    %86 = vector.shape_cast %85 : vector<16xf32> to vector<1x16xf32>
    %87 = arith.addf %58, %86 : vector<1x16xf32>
    %88 = arith.mulf %81, %81 : vector<64x16xf32>
    %cst_76 = arith.constant dense<0.000000e+00> : vector<16xf32>
    %89 = vector.multi_reduction <add>, %88, %cst_76 [0] : vector<64x16xf32> to vector<16xf32>
    %90 = vector.shape_cast %89 : vector<16xf32> to vector<1x16xf32>
    %91 = arith.addf %62, %90 : vector<1x16xf32>
    %cst_77 = arith.constant 0.000000e+00 : f32
    %92 = vector.broadcast %cst_77 : f32 to vector<64x16xf32>
    %c0_78 = arith.constant 0 : index
    %c216_79 = arith.constant 216 : index
    %c0_80 = arith.constant 0 : index
    %93 = vector.load %arg1[%c0_78, %c216_79, %c0_80] : memref<1x288x12xbf16, #tpu.memory_space<vmem>>, vector<1x64x12xbf16>
    %94 = vector.shape_cast %93 : vector<1x64x12xbf16> to vector<64x12xbf16>
    %c0_81 = arith.constant 0 : index
    %c0_82 = arith.constant 0 : index
    %c0_83 = arith.constant 0 : index
    %95 = vector.load %arg2[%c0_81, %c0_82, %c0_83] : memref<3x12x16xbf16, #tpu.memory_space<vmem>>, vector<1x12x16xbf16>
    %96 = vector.shape_cast %95 : vector<1x12x16xbf16> to vector<12x16xbf16>
    %cst_84 = arith.constant dense<0.000000e+00> : vector<64x16xf32>
    %97 = tpu.matmul %94, %96, %cst_84 {dimension_numbers = #tpu.dot_dimension_numbers<[1], [0], [0], [1], [0, 0, 1, 1], [], []>} : vector<64x12xbf16>, vector<12x16xbf16>, vector<64x16xf32> -> vector<64x16xf32>
    %98 = arith.addf %92, %97 : vector<64x16xf32>
    %c0_85 = arith.constant 0 : index
    %c80_86 = arith.constant 80 : index
    %c0_87 = arith.constant 0 : index
    %99 = vector.load %arg1[%c0_85, %c80_86, %c0_87] : memref<1x288x12xbf16, #tpu.memory_space<vmem>>, vector<1x64x12xbf16>
    %100 = vector.shape_cast %99 : vector<1x64x12xbf16> to vector<64x12xbf16>
    %c1_88 = arith.constant 1 : index
    %c0_89 = arith.constant 0 : index
    %c0_90 = arith.constant 0 : index
    %101 = vector.load %arg2[%c1_88, %c0_89, %c0_90] : memref<3x12x16xbf16, #tpu.memory_space<vmem>>, vector<1x12x16xbf16>
    %102 = vector.shape_cast %101 : vector<1x12x16xbf16> to vector<12x16xbf16>
    %cst_91 = arith.constant dense<0.000000e+00> : vector<64x16xf32>
    %103 = tpu.matmul %100, %102, %cst_91 {dimension_numbers = #tpu.dot_dimension_numbers<[1], [0], [0], [1], [0, 0, 1, 1], [], []>} : vector<64x12xbf16>, vector<12x16xbf16>, vector<64x16xf32> -> vector<64x16xf32>
    %104 = arith.addf %98, %103 : vector<64x16xf32>
    %c0_92 = arith.constant 0 : index
    %c224 = arith.constant 224 : index
    %c0_93 = arith.constant 0 : index
    %105 = vector.load %arg1[%c0_92, %c224, %c0_93] : memref<1x288x12xbf16, #tpu.memory_space<vmem>>, vector<1x64x12xbf16>
    %106 = vector.shape_cast %105 : vector<1x64x12xbf16> to vector<64x12xbf16>
    %c2_94 = arith.constant 2 : index
    %c0_95 = arith.constant 0 : index
    %c0_96 = arith.constant 0 : index
    %107 = vector.load %arg2[%c2_94, %c0_95, %c0_96] : memref<3x12x16xbf16, #tpu.memory_space<vmem>>, vector<1x12x16xbf16>
    %108 = vector.shape_cast %107 : vector<1x12x16xbf16> to vector<12x16xbf16>
    %cst_97 = arith.constant dense<0.000000e+00> : vector<64x16xf32>
    %109 = tpu.matmul %106, %108, %cst_97 {dimension_numbers = #tpu.dot_dimension_numbers<[1], [0], [0], [1], [0, 0, 1, 1], [], []>} : vector<64x12xbf16>, vector<12x16xbf16>, vector<64x16xf32> -> vector<64x16xf32>
    %110 = arith.addf %104, %109 : vector<64x16xf32>
    %c0_98 = arith.constant 0 : index
    %c3 = arith.constant 3 : index
    %c0_99 = arith.constant 0 : index
    %c0_100 = arith.constant 0 : index
    %111 = vector.load %arg3[%c0_98, %c3, %c0_99, %c0_100] : memref<1x4x64x16xf32, #tpu.memory_space<vmem>>, vector<1x1x64x16xf32>
    %112 = vector.shape_cast %111 : vector<1x1x64x16xf32> to vector<64x16xf32>
    %113 = vector.shape_cast %110 : vector<64x16xf32> to vector<1x1x64x16xf32>
    tpu.vector_store %arg3[%c0_98, %c3, %c0_99, %c0_100], %113 {strides = array<i32>} : memref<1x4x64x16xf32, #tpu.memory_space<vmem>>, vector<1x1x64x16xf32>,
    %cst_101 = arith.constant dense<0.000000e+00> : vector<16xf32>
    %114 = vector.multi_reduction <add>, %110, %cst_101 [0] : vector<64x16xf32> to vector<16xf32>
    %115 = vector.shape_cast %114 : vector<16xf32> to vector<1x16xf32>
    %116 = arith.addf %87, %115 : vector<1x16xf32>
    %117 = arith.mulf %110, %110 : vector<64x16xf32>
    %cst_102 = arith.constant dense<0.000000e+00> : vector<16xf32>
    %118 = vector.multi_reduction <add>, %117, %cst_102 [0] : vector<64x16xf32> to vector<16xf32>
    %119 = vector.shape_cast %118 : vector<16xf32> to vector<1x16xf32>
    %120 = arith.addf %91, %119 : vector<1x16xf32>
    %c0_103 = arith.constant 0 : index
    %c0_104 = arith.constant 0 : index
    %121 = vector.load %arg4[%c0_103, %c0_104] : memref<2x16xf32, #tpu.memory_space<vmem>>, vector<1x16xf32>
    %122 = arith.addf %121, %116 : vector<1x16xf32>
    %c0_105 = arith.constant 0 : index
    %c0_106 = arith.constant 0 : index
    %123 = vector.load %arg4[%c0_105, %c0_106] : memref<2x16xf32, #tpu.memory_space<vmem>>, vector<1x16xf32>
    tpu.vector_store %arg4[%c0_105, %c0_106], %122 {strides = array<i32>} : memref<2x16xf32, #tpu.memory_space<vmem>>, vector<1x16xf32>,
    %c1_107 = arith.constant 1 : index
    %c0_108 = arith.constant 0 : index
    %124 = vector.load %arg4[%c1_107, %c0_108] : memref<2x16xf32, #tpu.memory_space<vmem>>, vector<1x16xf32>
    %125 = arith.addf %124, %120 : vector<1x16xf32>
    %c1_109 = arith.constant 1 : index
    %c0_110 = arith.constant 0 : index
    %126 = vector.load %arg4[%c1_109, %c0_110] : memref<2x16xf32, #tpu.memory_space<vmem>>, vector<1x16xf32>
    tpu.vector_store %arg4[%c1_109, %c0_110], %125 {strides = array<i32>} : memref<2x16xf32, #tpu.memory_space<vmem>>, vector<1x16xf32>,
    return
  }
  func.func @transform_0(%arg0: i32) -> (i32, i32, i32) {
    %c0_i32 = arith.constant 0 : i32
    %c0_i32_0 = arith.constant 0 : i32
    %c0_i32_1 = arith.constant 0 : i32
    return %arg0, %c0_i32, %c0_i32_0 : i32, i32, i32
  }
  func.func @transform_1(%arg0: i32) -> (i32, i32, i32) {
    %c0_i32 = arith.constant 0 : i32
    %c0_i32_0 = arith.constant 0 : i32
    %c0_i32_1 = arith.constant 0 : i32
    %c0_i32_2 = arith.constant 0 : i32
    return %c0_i32, %c0_i32_0, %c0_i32_1 : i32, i32, i32
  }
  func.func @transform_2(%arg0: i32) -> (i32, i32, i32, i32) {
    %c0_i32 = arith.constant 0 : i32
    %c0_i32_0 = arith.constant 0 : i32
    %c0_i32_1 = arith.constant 0 : i32
    %c0_i32_2 = arith.constant 0 : i32
    return %arg0, %c0_i32, %c0_i32_0, %c0_i32_1 : i32, i32, i32, i32
  }
  func.func @transform_3(%arg0: i32) -> (i32, i32) {
    %c0_i32 = arith.constant 0 : i32
    %c0_i32_0 = arith.constant 0 : i32
    %c0_i32_1 = arith.constant 0 : i32
    return %c0_i32, %c0_i32_0 : i32, i32
  }
}

module attributes {stable_mosaic.version = 11 : i64} {
  func.func @_conv_stats_kernel(%arg0: i32, %arg1: memref<1x80x48xbf16, #tpu.memory_space<vmem>>, %arg2: memref<3x48x32xbf16, #tpu.memory_space<vmem>>, %arg3: memref<1x4x16x32xf32, #tpu.memory_space<vmem>>, %arg4: memref<2x32xf32, #tpu.memory_space<vmem>>) attributes {dimension_semantics = [#tpu.dimension_semantics<arbitrary>], iteration_bounds = array<i64: 4>, scalar_prefetch = 0 : i64, scratch_operands = 0 : i64, tpu.core_type = #tpu.core_type<tc>, window_params = [{transform_indices = @transform_0, window_bounds = array<i64: 1, 80, 48>}, {pipeline_mode = #tpu.pipeline_mode<synchronous>, transform_indices = @transform_1, window_bounds = array<i64: 3, 48, 32>}, {transform_indices = @transform_2, window_bounds = array<i64: 1, 4, 16, 32>}, {pipeline_mode = #tpu.pipeline_mode<synchronous>, transform_indices = @transform_3, window_bounds = array<i64: 2, 32>}]} {
    %c0_i32 = arith.constant 0 : i32
    %0 = arith.cmpi eq, %arg0, %c0_i32 : i32
    %1 = arith.extui %0 : i1 to i32
    %c0_i32_0 = arith.constant 0 : i32
    %2 = arith.cmpi ne, %1, %c0_i32_0 : i32
    scf.if %2 {
      %cst_111 = arith.constant 0.000000e+00 : f32
      %127 = vector.broadcast %cst_111 : f32 to vector<2x32xf32>
      %c0_112 = arith.constant 0 : index
      %c0_113 = arith.constant 0 : index
      %128 = vector.load %arg4[%c0_112, %c0_113] : memref<2x32xf32, #tpu.memory_space<vmem>>, vector<2x32xf32>
      tpu.vector_store %arg4[%c0_112, %c0_113], %127 {strides = array<i32>} : memref<2x32xf32, #tpu.memory_space<vmem>>, vector<2x32xf32>,
    } else {
    }
    %cst = arith.constant 0.000000e+00 : f32
    %3 = vector.broadcast %cst : f32 to vector<1x32xf32>
    %cst_1 = arith.constant 0.000000e+00 : f32
    %4 = vector.broadcast %cst_1 : f32 to vector<1x32xf32>
    %cst_2 = arith.constant 0.000000e+00 : f32
    %5 = vector.broadcast %cst_2 : f32 to vector<16x32xf32>
    %c0 = arith.constant 0 : index
    %c0_3 = arith.constant 0 : index
    %c0_4 = arith.constant 0 : index
    %6 = vector.load %arg1[%c0, %c0_3, %c0_4] : memref<1x80x48xbf16, #tpu.memory_space<vmem>>, vector<1x16x48xbf16>
    %7 = vector.shape_cast %6 : vector<1x16x48xbf16> to vector<16x48xbf16>
    %c0_5 = arith.constant 0 : index
    %c0_6 = arith.constant 0 : index
    %c0_7 = arith.constant 0 : index
    %8 = vector.load %arg2[%c0_5, %c0_6, %c0_7] : memref<3x48x32xbf16, #tpu.memory_space<vmem>>, vector<1x48x32xbf16>
    %9 = vector.shape_cast %8 : vector<1x48x32xbf16> to vector<48x32xbf16>
    %cst_8 = arith.constant dense<0.000000e+00> : vector<16x32xf32>
    %10 = tpu.matmul %7, %9, %cst_8 {dimension_numbers = #tpu.dot_dimension_numbers<[1], [0], [0], [1], [0, 0, 1, 1], [], []>} : vector<16x48xbf16>, vector<48x32xbf16>, vector<16x32xf32> -> vector<16x32xf32>
    %11 = arith.addf %5, %10 : vector<16x32xf32>
    %c0_9 = arith.constant 0 : index
    %c40 = arith.constant 40 : index
    %c0_10 = arith.constant 0 : index
    %12 = vector.load %arg1[%c0_9, %c40, %c0_10] : memref<1x80x48xbf16, #tpu.memory_space<vmem>>, vector<1x16x48xbf16>
    %13 = vector.shape_cast %12 : vector<1x16x48xbf16> to vector<16x48xbf16>
    %c1 = arith.constant 1 : index
    %c0_11 = arith.constant 0 : index
    %c0_12 = arith.constant 0 : index
    %14 = vector.load %arg2[%c1, %c0_11, %c0_12] : memref<3x48x32xbf16, #tpu.memory_space<vmem>>, vector<1x48x32xbf16>
    %15 = vector.shape_cast %14 : vector<1x48x32xbf16> to vector<48x32xbf16>
    %cst_13 = arith.constant dense<0.000000e+00> : vector<16x32xf32>
    %16 = tpu.matmul %13, %15, %cst_13 {dimension_numbers = #tpu.dot_dimension_numbers<[1], [0], [0], [1], [0, 0, 1, 1], [], []>} : vector<16x48xbf16>, vector<48x32xbf16>, vector<16x32xf32> -> vector<16x32xf32>
    %17 = arith.addf %11, %16 : vector<16x32xf32>
    %c0_14 = arith.constant 0 : index
    %c4 = arith.constant 4 : index
    %c0_15 = arith.constant 0 : index
    %18 = vector.load %arg1[%c0_14, %c4, %c0_15] : memref<1x80x48xbf16, #tpu.memory_space<vmem>>, vector<1x16x48xbf16>
    %19 = vector.shape_cast %18 : vector<1x16x48xbf16> to vector<16x48xbf16>
    %c2 = arith.constant 2 : index
    %c0_16 = arith.constant 0 : index
    %c0_17 = arith.constant 0 : index
    %20 = vector.load %arg2[%c2, %c0_16, %c0_17] : memref<3x48x32xbf16, #tpu.memory_space<vmem>>, vector<1x48x32xbf16>
    %21 = vector.shape_cast %20 : vector<1x48x32xbf16> to vector<48x32xbf16>
    %cst_18 = arith.constant dense<0.000000e+00> : vector<16x32xf32>
    %22 = tpu.matmul %19, %21, %cst_18 {dimension_numbers = #tpu.dot_dimension_numbers<[1], [0], [0], [1], [0, 0, 1, 1], [], []>} : vector<16x48xbf16>, vector<48x32xbf16>, vector<16x32xf32> -> vector<16x32xf32>
    %23 = arith.addf %17, %22 : vector<16x32xf32>
    %c0_19 = arith.constant 0 : index
    %c0_20 = arith.constant 0 : index
    %c0_21 = arith.constant 0 : index
    %c0_22 = arith.constant 0 : index
    %24 = vector.load %arg3[%c0_19, %c0_20, %c0_21, %c0_22] : memref<1x4x16x32xf32, #tpu.memory_space<vmem>>, vector<1x1x16x32xf32>
    %25 = vector.shape_cast %24 : vector<1x1x16x32xf32> to vector<16x32xf32>
    %26 = vector.shape_cast %23 : vector<16x32xf32> to vector<1x1x16x32xf32>
    tpu.vector_store %arg3[%c0_19, %c0_20, %c0_21, %c0_22], %26 {strides = array<i32>} : memref<1x4x16x32xf32, #tpu.memory_space<vmem>>, vector<1x1x16x32xf32>,
    %cst_23 = arith.constant dense<0.000000e+00> : vector<32xf32>
    %27 = vector.multi_reduction <add>, %23, %cst_23 [0] : vector<16x32xf32> to vector<32xf32>
    %28 = vector.shape_cast %27 : vector<32xf32> to vector<1x32xf32>
    %29 = arith.addf %3, %28 : vector<1x32xf32>
    %30 = arith.mulf %23, %23 : vector<16x32xf32>
    %cst_24 = arith.constant dense<0.000000e+00> : vector<32xf32>
    %31 = vector.multi_reduction <add>, %30, %cst_24 [0] : vector<16x32xf32> to vector<32xf32>
    %32 = vector.shape_cast %31 : vector<32xf32> to vector<1x32xf32>
    %33 = arith.addf %4, %32 : vector<1x32xf32>
    %cst_25 = arith.constant 0.000000e+00 : f32
    %34 = vector.broadcast %cst_25 : f32 to vector<16x32xf32>
    %c0_26 = arith.constant 0 : index
    %c20 = arith.constant 20 : index
    %c0_27 = arith.constant 0 : index
    %35 = vector.load %arg1[%c0_26, %c20, %c0_27] : memref<1x80x48xbf16, #tpu.memory_space<vmem>>, vector<1x16x48xbf16>
    %36 = vector.shape_cast %35 : vector<1x16x48xbf16> to vector<16x48xbf16>
    %c0_28 = arith.constant 0 : index
    %c0_29 = arith.constant 0 : index
    %c0_30 = arith.constant 0 : index
    %37 = vector.load %arg2[%c0_28, %c0_29, %c0_30] : memref<3x48x32xbf16, #tpu.memory_space<vmem>>, vector<1x48x32xbf16>
    %38 = vector.shape_cast %37 : vector<1x48x32xbf16> to vector<48x32xbf16>
    %cst_31 = arith.constant dense<0.000000e+00> : vector<16x32xf32>
    %39 = tpu.matmul %36, %38, %cst_31 {dimension_numbers = #tpu.dot_dimension_numbers<[1], [0], [0], [1], [0, 0, 1, 1], [], []>} : vector<16x48xbf16>, vector<48x32xbf16>, vector<16x32xf32> -> vector<16x32xf32>
    %40 = arith.addf %34, %39 : vector<16x32xf32>
    %c0_32 = arith.constant 0 : index
    %c60 = arith.constant 60 : index
    %c0_33 = arith.constant 0 : index
    %41 = vector.load %arg1[%c0_32, %c60, %c0_33] : memref<1x80x48xbf16, #tpu.memory_space<vmem>>, vector<1x16x48xbf16>
    %42 = vector.shape_cast %41 : vector<1x16x48xbf16> to vector<16x48xbf16>
    %c1_34 = arith.constant 1 : index
    %c0_35 = arith.constant 0 : index
    %c0_36 = arith.constant 0 : index
    %43 = vector.load %arg2[%c1_34, %c0_35, %c0_36] : memref<3x48x32xbf16, #tpu.memory_space<vmem>>, vector<1x48x32xbf16>
    %44 = vector.shape_cast %43 : vector<1x48x32xbf16> to vector<48x32xbf16>
    %cst_37 = arith.constant dense<0.000000e+00> : vector<16x32xf32>
    %45 = tpu.matmul %42, %44, %cst_37 {dimension_numbers = #tpu.dot_dimension_numbers<[1], [0], [0], [1], [0, 0, 1, 1], [], []>} : vector<16x48xbf16>, vector<48x32xbf16>, vector<16x32xf32> -> vector<16x32xf32>
    %46 = arith.addf %40, %45 : vector<16x32xf32>
    %c0_38 = arith.constant 0 : index
    %c24 = arith.constant 24 : index
    %c0_39 = arith.constant 0 : index
    %47 = vector.load %arg1[%c0_38, %c24, %c0_39] : memref<1x80x48xbf16, #tpu.memory_space<vmem>>, vector<1x16x48xbf16>
    %48 = vector.shape_cast %47 : vector<1x16x48xbf16> to vector<16x48xbf16>
    %c2_40 = arith.constant 2 : index
    %c0_41 = arith.constant 0 : index
    %c0_42 = arith.constant 0 : index
    %49 = vector.load %arg2[%c2_40, %c0_41, %c0_42] : memref<3x48x32xbf16, #tpu.memory_space<vmem>>, vector<1x48x32xbf16>
    %50 = vector.shape_cast %49 : vector<1x48x32xbf16> to vector<48x32xbf16>
    %cst_43 = arith.constant dense<0.000000e+00> : vector<16x32xf32>
    %51 = tpu.matmul %48, %50, %cst_43 {dimension_numbers = #tpu.dot_dimension_numbers<[1], [0], [0], [1], [0, 0, 1, 1], [], []>} : vector<16x48xbf16>, vector<48x32xbf16>, vector<16x32xf32> -> vector<16x32xf32>
    %52 = arith.addf %46, %51 : vector<16x32xf32>
    %c0_44 = arith.constant 0 : index
    %c1_45 = arith.constant 1 : index
    %c0_46 = arith.constant 0 : index
    %c0_47 = arith.constant 0 : index
    %53 = vector.load %arg3[%c0_44, %c1_45, %c0_46, %c0_47] : memref<1x4x16x32xf32, #tpu.memory_space<vmem>>, vector<1x1x16x32xf32>
    %54 = vector.shape_cast %53 : vector<1x1x16x32xf32> to vector<16x32xf32>
    %55 = vector.shape_cast %52 : vector<16x32xf32> to vector<1x1x16x32xf32>
    tpu.vector_store %arg3[%c0_44, %c1_45, %c0_46, %c0_47], %55 {strides = array<i32>} : memref<1x4x16x32xf32, #tpu.memory_space<vmem>>, vector<1x1x16x32xf32>,
    %cst_48 = arith.constant dense<0.000000e+00> : vector<32xf32>
    %56 = vector.multi_reduction <add>, %52, %cst_48 [0] : vector<16x32xf32> to vector<32xf32>
    %57 = vector.shape_cast %56 : vector<32xf32> to vector<1x32xf32>
    %58 = arith.addf %29, %57 : vector<1x32xf32>
    %59 = arith.mulf %52, %52 : vector<16x32xf32>
    %cst_49 = arith.constant dense<0.000000e+00> : vector<32xf32>
    %60 = vector.multi_reduction <add>, %59, %cst_49 [0] : vector<16x32xf32> to vector<32xf32>
    %61 = vector.shape_cast %60 : vector<32xf32> to vector<1x32xf32>
    %62 = arith.addf %33, %61 : vector<1x32xf32>
    %cst_50 = arith.constant 0.000000e+00 : f32
    %63 = vector.broadcast %cst_50 : f32 to vector<16x32xf32>
    %c0_51 = arith.constant 0 : index
    %c40_52 = arith.constant 40 : index
    %c0_53 = arith.constant 0 : index
    %64 = vector.load %arg1[%c0_51, %c40_52, %c0_53] : memref<1x80x48xbf16, #tpu.memory_space<vmem>>, vector<1x16x48xbf16>
    %65 = vector.shape_cast %64 : vector<1x16x48xbf16> to vector<16x48xbf16>
    %c0_54 = arith.constant 0 : index
    %c0_55 = arith.constant 0 : index
    %c0_56 = arith.constant 0 : index
    %66 = vector.load %arg2[%c0_54, %c0_55, %c0_56] : memref<3x48x32xbf16, #tpu.memory_space<vmem>>, vector<1x48x32xbf16>
    %67 = vector.shape_cast %66 : vector<1x48x32xbf16> to vector<48x32xbf16>
    %cst_57 = arith.constant dense<0.000000e+00> : vector<16x32xf32>
    %68 = tpu.matmul %65, %67, %cst_57 {dimension_numbers = #tpu.dot_dimension_numbers<[1], [0], [0], [1], [0, 0, 1, 1], [], []>} : vector<16x48xbf16>, vector<48x32xbf16>, vector<16x32xf32> -> vector<16x32xf32>
    %69 = arith.addf %63, %68 : vector<16x32xf32>
    %c0_58 = arith.constant 0 : index
    %c4_59 = arith.constant 4 : index
    %c0_60 = arith.constant 0 : index
    %70 = vector.load %arg1[%c0_58, %c4_59, %c0_60] : memref<1x80x48xbf16, #tpu.memory_space<vmem>>, vector<1x16x48xbf16>
    %71 = vector.shape_cast %70 : vector<1x16x48xbf16> to vector<16x48xbf16>
    %c1_61 = arith.constant 1 : index
    %c0_62 = arith.constant 0 : index
    %c0_63 = arith.constant 0 : index
    %72 = vector.load %arg2[%c1_61, %c0_62, %c0_63] : memref<3x48x32xbf16, #tpu.memory_space<vmem>>, vector<1x48x32xbf16>
    %73 = vector.shape_cast %72 : vector<1x48x32xbf16> to vector<48x32xbf16>
    %cst_64 = arith.constant dense<0.000000e+00> : vector<16x32xf32>
    %74 = tpu.matmul %71, %73, %cst_64 {dimension_numbers = #tpu.dot_dimension_numbers<[1], [0], [0], [1], [0, 0, 1, 1], [], []>} : vector<16x48xbf16>, vector<48x32xbf16>, vector<16x32xf32> -> vector<16x32xf32>
    %75 = arith.addf %69, %74 : vector<16x32xf32>
    %c0_65 = arith.constant 0 : index
    %c44 = arith.constant 44 : index
    %c0_66 = arith.constant 0 : index
    %76 = vector.load %arg1[%c0_65, %c44, %c0_66] : memref<1x80x48xbf16, #tpu.memory_space<vmem>>, vector<1x16x48xbf16>
    %77 = vector.shape_cast %76 : vector<1x16x48xbf16> to vector<16x48xbf16>
    %c2_67 = arith.constant 2 : index
    %c0_68 = arith.constant 0 : index
    %c0_69 = arith.constant 0 : index
    %78 = vector.load %arg2[%c2_67, %c0_68, %c0_69] : memref<3x48x32xbf16, #tpu.memory_space<vmem>>, vector<1x48x32xbf16>
    %79 = vector.shape_cast %78 : vector<1x48x32xbf16> to vector<48x32xbf16>
    %cst_70 = arith.constant dense<0.000000e+00> : vector<16x32xf32>
    %80 = tpu.matmul %77, %79, %cst_70 {dimension_numbers = #tpu.dot_dimension_numbers<[1], [0], [0], [1], [0, 0, 1, 1], [], []>} : vector<16x48xbf16>, vector<48x32xbf16>, vector<16x32xf32> -> vector<16x32xf32>
    %81 = arith.addf %75, %80 : vector<16x32xf32>
    %c0_71 = arith.constant 0 : index
    %c2_72 = arith.constant 2 : index
    %c0_73 = arith.constant 0 : index
    %c0_74 = arith.constant 0 : index
    %82 = vector.load %arg3[%c0_71, %c2_72, %c0_73, %c0_74] : memref<1x4x16x32xf32, #tpu.memory_space<vmem>>, vector<1x1x16x32xf32>
    %83 = vector.shape_cast %82 : vector<1x1x16x32xf32> to vector<16x32xf32>
    %84 = vector.shape_cast %81 : vector<16x32xf32> to vector<1x1x16x32xf32>
    tpu.vector_store %arg3[%c0_71, %c2_72, %c0_73, %c0_74], %84 {strides = array<i32>} : memref<1x4x16x32xf32, #tpu.memory_space<vmem>>, vector<1x1x16x32xf32>,
    %cst_75 = arith.constant dense<0.000000e+00> : vector<32xf32>
    %85 = vector.multi_reduction <add>, %81, %cst_75 [0] : vector<16x32xf32> to vector<32xf32>
    %86 = vector.shape_cast %85 : vector<32xf32> to vector<1x32xf32>
    %87 = arith.addf %58, %86 : vector<1x32xf32>
    %88 = arith.mulf %81, %81 : vector<16x32xf32>
    %cst_76 = arith.constant dense<0.000000e+00> : vector<32xf32>
    %89 = vector.multi_reduction <add>, %88, %cst_76 [0] : vector<16x32xf32> to vector<32xf32>
    %90 = vector.shape_cast %89 : vector<32xf32> to vector<1x32xf32>
    %91 = arith.addf %62, %90 : vector<1x32xf32>
    %cst_77 = arith.constant 0.000000e+00 : f32
    %92 = vector.broadcast %cst_77 : f32 to vector<16x32xf32>
    %c0_78 = arith.constant 0 : index
    %c60_79 = arith.constant 60 : index
    %c0_80 = arith.constant 0 : index
    %93 = vector.load %arg1[%c0_78, %c60_79, %c0_80] : memref<1x80x48xbf16, #tpu.memory_space<vmem>>, vector<1x16x48xbf16>
    %94 = vector.shape_cast %93 : vector<1x16x48xbf16> to vector<16x48xbf16>
    %c0_81 = arith.constant 0 : index
    %c0_82 = arith.constant 0 : index
    %c0_83 = arith.constant 0 : index
    %95 = vector.load %arg2[%c0_81, %c0_82, %c0_83] : memref<3x48x32xbf16, #tpu.memory_space<vmem>>, vector<1x48x32xbf16>
    %96 = vector.shape_cast %95 : vector<1x48x32xbf16> to vector<48x32xbf16>
    %cst_84 = arith.constant dense<0.000000e+00> : vector<16x32xf32>
    %97 = tpu.matmul %94, %96, %cst_84 {dimension_numbers = #tpu.dot_dimension_numbers<[1], [0], [0], [1], [0, 0, 1, 1], [], []>} : vector<16x48xbf16>, vector<48x32xbf16>, vector<16x32xf32> -> vector<16x32xf32>
    %98 = arith.addf %92, %97 : vector<16x32xf32>
    %c0_85 = arith.constant 0 : index
    %c24_86 = arith.constant 24 : index
    %c0_87 = arith.constant 0 : index
    %99 = vector.load %arg1[%c0_85, %c24_86, %c0_87] : memref<1x80x48xbf16, #tpu.memory_space<vmem>>, vector<1x16x48xbf16>
    %100 = vector.shape_cast %99 : vector<1x16x48xbf16> to vector<16x48xbf16>
    %c1_88 = arith.constant 1 : index
    %c0_89 = arith.constant 0 : index
    %c0_90 = arith.constant 0 : index
    %101 = vector.load %arg2[%c1_88, %c0_89, %c0_90] : memref<3x48x32xbf16, #tpu.memory_space<vmem>>, vector<1x48x32xbf16>
    %102 = vector.shape_cast %101 : vector<1x48x32xbf16> to vector<48x32xbf16>
    %cst_91 = arith.constant dense<0.000000e+00> : vector<16x32xf32>
    %103 = tpu.matmul %100, %102, %cst_91 {dimension_numbers = #tpu.dot_dimension_numbers<[1], [0], [0], [1], [0, 0, 1, 1], [], []>} : vector<16x48xbf16>, vector<48x32xbf16>, vector<16x32xf32> -> vector<16x32xf32>
    %104 = arith.addf %98, %103 : vector<16x32xf32>
    %c0_92 = arith.constant 0 : index
    %c64 = arith.constant 64 : index
    %c0_93 = arith.constant 0 : index
    %105 = vector.load %arg1[%c0_92, %c64, %c0_93] : memref<1x80x48xbf16, #tpu.memory_space<vmem>>, vector<1x16x48xbf16>
    %106 = vector.shape_cast %105 : vector<1x16x48xbf16> to vector<16x48xbf16>
    %c2_94 = arith.constant 2 : index
    %c0_95 = arith.constant 0 : index
    %c0_96 = arith.constant 0 : index
    %107 = vector.load %arg2[%c2_94, %c0_95, %c0_96] : memref<3x48x32xbf16, #tpu.memory_space<vmem>>, vector<1x48x32xbf16>
    %108 = vector.shape_cast %107 : vector<1x48x32xbf16> to vector<48x32xbf16>
    %cst_97 = arith.constant dense<0.000000e+00> : vector<16x32xf32>
    %109 = tpu.matmul %106, %108, %cst_97 {dimension_numbers = #tpu.dot_dimension_numbers<[1], [0], [0], [1], [0, 0, 1, 1], [], []>} : vector<16x48xbf16>, vector<48x32xbf16>, vector<16x32xf32> -> vector<16x32xf32>
    %110 = arith.addf %104, %109 : vector<16x32xf32>
    %c0_98 = arith.constant 0 : index
    %c3 = arith.constant 3 : index
    %c0_99 = arith.constant 0 : index
    %c0_100 = arith.constant 0 : index
    %111 = vector.load %arg3[%c0_98, %c3, %c0_99, %c0_100] : memref<1x4x16x32xf32, #tpu.memory_space<vmem>>, vector<1x1x16x32xf32>
    %112 = vector.shape_cast %111 : vector<1x1x16x32xf32> to vector<16x32xf32>
    %113 = vector.shape_cast %110 : vector<16x32xf32> to vector<1x1x16x32xf32>
    tpu.vector_store %arg3[%c0_98, %c3, %c0_99, %c0_100], %113 {strides = array<i32>} : memref<1x4x16x32xf32, #tpu.memory_space<vmem>>, vector<1x1x16x32xf32>,
    %cst_101 = arith.constant dense<0.000000e+00> : vector<32xf32>
    %114 = vector.multi_reduction <add>, %110, %cst_101 [0] : vector<16x32xf32> to vector<32xf32>
    %115 = vector.shape_cast %114 : vector<32xf32> to vector<1x32xf32>
    %116 = arith.addf %87, %115 : vector<1x32xf32>
    %117 = arith.mulf %110, %110 : vector<16x32xf32>
    %cst_102 = arith.constant dense<0.000000e+00> : vector<32xf32>
    %118 = vector.multi_reduction <add>, %117, %cst_102 [0] : vector<16x32xf32> to vector<32xf32>
    %119 = vector.shape_cast %118 : vector<32xf32> to vector<1x32xf32>
    %120 = arith.addf %91, %119 : vector<1x32xf32>
    %c0_103 = arith.constant 0 : index
    %c0_104 = arith.constant 0 : index
    %121 = vector.load %arg4[%c0_103, %c0_104] : memref<2x32xf32, #tpu.memory_space<vmem>>, vector<1x32xf32>
    %122 = arith.addf %121, %116 : vector<1x32xf32>
    %c0_105 = arith.constant 0 : index
    %c0_106 = arith.constant 0 : index
    %123 = vector.load %arg4[%c0_105, %c0_106] : memref<2x32xf32, #tpu.memory_space<vmem>>, vector<1x32xf32>
    tpu.vector_store %arg4[%c0_105, %c0_106], %122 {strides = array<i32>} : memref<2x32xf32, #tpu.memory_space<vmem>>, vector<1x32xf32>,
    %c1_107 = arith.constant 1 : index
    %c0_108 = arith.constant 0 : index
    %124 = vector.load %arg4[%c1_107, %c0_108] : memref<2x32xf32, #tpu.memory_space<vmem>>, vector<1x32xf32>
    %125 = arith.addf %124, %120 : vector<1x32xf32>
    %c1_109 = arith.constant 1 : index
    %c0_110 = arith.constant 0 : index
    %126 = vector.load %arg4[%c1_109, %c0_110] : memref<2x32xf32, #tpu.memory_space<vmem>>, vector<1x32xf32>
    tpu.vector_store %arg4[%c1_109, %c0_110], %125 {strides = array<i32>} : memref<2x32xf32, #tpu.memory_space<vmem>>, vector<1x32xf32>,
    return
  }
  func.func @transform_0(%arg0: i32) -> (i32, i32, i32) {
    %c0_i32 = arith.constant 0 : i32
    %c0_i32_0 = arith.constant 0 : i32
    %c0_i32_1 = arith.constant 0 : i32
    return %arg0, %c0_i32, %c0_i32_0 : i32, i32, i32
  }
  func.func @transform_1(%arg0: i32) -> (i32, i32, i32) {
    %c0_i32 = arith.constant 0 : i32
    %c0_i32_0 = arith.constant 0 : i32
    %c0_i32_1 = arith.constant 0 : i32
    %c0_i32_2 = arith.constant 0 : i32
    return %c0_i32, %c0_i32_0, %c0_i32_1 : i32, i32, i32
  }
  func.func @transform_2(%arg0: i32) -> (i32, i32, i32, i32) {
    %c0_i32 = arith.constant 0 : i32
    %c0_i32_0 = arith.constant 0 : i32
    %c0_i32_1 = arith.constant 0 : i32
    %c0_i32_2 = arith.constant 0 : i32
    return %arg0, %c0_i32, %c0_i32_0, %c0_i32_1 : i32, i32, i32, i32
  }
  func.func @transform_3(%arg0: i32) -> (i32, i32) {
    %c0_i32 = arith.constant 0 : i32
    %c0_i32_0 = arith.constant 0 : i32
    %c0_i32_1 = arith.constant 0 : i32
    return %c0_i32, %c0_i32_0 : i32, i32
  }
}

module attributes {stable_mosaic.version = 11 : i64} {
  func.func @_norm_relu_pool_kernel(%arg0: i32, %arg1: memref<1x4x4x128xf32, #tpu.memory_space<vmem>>, %arg2: memref<1x128xf32, #tpu.memory_space<vmem>>, %arg3: memref<1x128xf32, #tpu.memory_space<vmem>>, %arg4: memref<1x4x128xf32, #tpu.memory_space<vmem>>) attributes {dimension_semantics = [#tpu.dimension_semantics<parallel>], iteration_bounds = array<i64: 4>, scalar_prefetch = 0 : i64, scratch_operands = 0 : i64, tpu.core_type = #tpu.core_type<tc>, window_params = [{transform_indices = @transform_0, window_bounds = array<i64: 1, 4, 4, 128>}, {pipeline_mode = #tpu.pipeline_mode<synchronous>, transform_indices = @transform_1, window_bounds = array<i64: 1, 128>}, {pipeline_mode = #tpu.pipeline_mode<synchronous>, transform_indices = @transform_2, window_bounds = array<i64: 1, 128>}, {transform_indices = @transform_3, window_bounds = array<i64: 1, 4, 128>}]} {
    %c0 = arith.constant 0 : index
    %c0_0 = arith.constant 0 : index
    %0 = vector.load %arg2[%c0, %c0_0] : memref<1x128xf32, #tpu.memory_space<vmem>>, vector<1x128xf32>
    %c0_1 = arith.constant 0 : index
    %c0_2 = arith.constant 0 : index
    %1 = vector.load %arg3[%c0_1, %c0_2] : memref<1x128xf32, #tpu.memory_space<vmem>>, vector<1x128xf32>
    %c0_3 = arith.constant 0 : index
    %c0_4 = arith.constant 0 : index
    %c0_5 = arith.constant 0 : index
    %c0_6 = arith.constant 0 : index
    %2 = vector.load %arg1[%c0_3, %c0_4, %c0_5, %c0_6] : memref<1x4x4x128xf32, #tpu.memory_space<vmem>>, vector<1x1x4x128xf32>
    %3 = vector.shape_cast %2 : vector<1x1x4x128xf32> to vector<4x128xf32>
    %4 = vector.broadcast %0 : vector<1x128xf32> to vector<4x128xf32>
    %5 = arith.mulf %3, %4 : vector<4x128xf32>
    %6 = vector.broadcast %1 : vector<1x128xf32> to vector<4x128xf32>
    %7 = arith.addf %5, %6 : vector<4x128xf32>
    %cst = arith.constant 0.000000e+00 : f32
    %8 = vector.broadcast %cst : f32 to vector<4x128xf32>
    %9 = arith.maximumf %7, %8 : vector<4x128xf32>
    %c0_7 = arith.constant 0 : index
    %c1 = arith.constant 1 : index
    %c0_8 = arith.constant 0 : index
    %c0_9 = arith.constant 0 : index
    %10 = vector.load %arg1[%c0_7, %c1, %c0_8, %c0_9] : memref<1x4x4x128xf32, #tpu.memory_space<vmem>>, vector<1x1x4x128xf32>
    %11 = vector.shape_cast %10 : vector<1x1x4x128xf32> to vector<4x128xf32>
    %12 = vector.broadcast %0 : vector<1x128xf32> to vector<4x128xf32>
    %13 = arith.mulf %11, %12 : vector<4x128xf32>
    %14 = vector.broadcast %1 : vector<1x128xf32> to vector<4x128xf32>
    %15 = arith.addf %13, %14 : vector<4x128xf32>
    %cst_10 = arith.constant 0.000000e+00 : f32
    %16 = vector.broadcast %cst_10 : f32 to vector<4x128xf32>
    %17 = arith.maximumf %15, %16 : vector<4x128xf32>
    %18 = arith.addf %9, %17 : vector<4x128xf32>
    %c0_11 = arith.constant 0 : index
    %c2 = arith.constant 2 : index
    %c0_12 = arith.constant 0 : index
    %c0_13 = arith.constant 0 : index
    %19 = vector.load %arg1[%c0_11, %c2, %c0_12, %c0_13] : memref<1x4x4x128xf32, #tpu.memory_space<vmem>>, vector<1x1x4x128xf32>
    %20 = vector.shape_cast %19 : vector<1x1x4x128xf32> to vector<4x128xf32>
    %21 = vector.broadcast %0 : vector<1x128xf32> to vector<4x128xf32>
    %22 = arith.mulf %20, %21 : vector<4x128xf32>
    %23 = vector.broadcast %1 : vector<1x128xf32> to vector<4x128xf32>
    %24 = arith.addf %22, %23 : vector<4x128xf32>
    %cst_14 = arith.constant 0.000000e+00 : f32
    %25 = vector.broadcast %cst_14 : f32 to vector<4x128xf32>
    %26 = arith.maximumf %24, %25 : vector<4x128xf32>
    %27 = arith.addf %18, %26 : vector<4x128xf32>
    %c0_15 = arith.constant 0 : index
    %c3 = arith.constant 3 : index
    %c0_16 = arith.constant 0 : index
    %c0_17 = arith.constant 0 : index
    %28 = vector.load %arg1[%c0_15, %c3, %c0_16, %c0_17] : memref<1x4x4x128xf32, #tpu.memory_space<vmem>>, vector<1x1x4x128xf32>
    %29 = vector.shape_cast %28 : vector<1x1x4x128xf32> to vector<4x128xf32>
    %30 = vector.broadcast %0 : vector<1x128xf32> to vector<4x128xf32>
    %31 = arith.mulf %29, %30 : vector<4x128xf32>
    %32 = vector.broadcast %1 : vector<1x128xf32> to vector<4x128xf32>
    %33 = arith.addf %31, %32 : vector<4x128xf32>
    %cst_18 = arith.constant 0.000000e+00 : f32
    %34 = vector.broadcast %cst_18 : f32 to vector<4x128xf32>
    %35 = arith.maximumf %33, %34 : vector<4x128xf32>
    %36 = arith.addf %27, %35 : vector<4x128xf32>
    %cst_19 = arith.constant 2.500000e-01 : f32
    %37 = vector.broadcast %cst_19 : f32 to vector<4x128xf32>
    %38 = arith.mulf %36, %37 : vector<4x128xf32>
    %c0_20 = arith.constant 0 : index
    %c0_21 = arith.constant 0 : index
    %c0_22 = arith.constant 0 : index
    %39 = vector.load %arg4[%c0_20, %c0_21, %c0_22] : memref<1x4x128xf32, #tpu.memory_space<vmem>>, vector<1x4x128xf32>
    %40 = vector.shape_cast %39 : vector<1x4x128xf32> to vector<4x128xf32>
    %41 = vector.shape_cast %38 : vector<4x128xf32> to vector<1x4x128xf32>
    tpu.vector_store %arg4[%c0_20, %c0_21, %c0_22], %41 {strides = array<i32>} : memref<1x4x128xf32, #tpu.memory_space<vmem>>, vector<1x4x128xf32>,
    return
  }
  func.func @transform_0(%arg0: i32) -> (i32, i32, i32, i32) {
    %c0_i32 = arith.constant 0 : i32
    %c0_i32_0 = arith.constant 0 : i32
    %c0_i32_1 = arith.constant 0 : i32
    %c0_i32_2 = arith.constant 0 : i32
    return %arg0, %c0_i32, %c0_i32_0, %c0_i32_1 : i32, i32, i32, i32
  }
  func.func @transform_1(%arg0: i32) -> (i32, i32) {
    %c0_i32 = arith.constant 0 : i32
    %c0_i32_0 = arith.constant 0 : i32
    %c0_i32_1 = arith.constant 0 : i32
    return %c0_i32, %c0_i32_0 : i32, i32
  }
  func.func @transform_2(%arg0: i32) -> (i32, i32) {
    %c0_i32 = arith.constant 0 : i32
    %c0_i32_0 = arith.constant 0 : i32
    %c0_i32_1 = arith.constant 0 : i32
    return %c0_i32, %c0_i32_0 : i32, i32
  }
  func.func @transform_3(%arg0: i32) -> (i32, i32, i32) {
    %c0_i32 = arith.constant 0 : i32
    %c0_i32_0 = arith.constant 0 : i32
    %c0_i32_1 = arith.constant 0 : i32
    return %arg0, %c0_i32, %c0_i32_0 : i32, i32, i32
  }
}

module attributes {stable_mosaic.version = 11 : i64} {
  func.func @_conv_stats_kernel(%arg0: i32, %arg1: memref<1x24x96xbf16, #tpu.memory_space<vmem>>, %arg2: memref<3x96x32xbf16, #tpu.memory_space<vmem>>, %arg3: memref<1x4x4x32xf32, #tpu.memory_space<vmem>>, %arg4: memref<2x32xf32, #tpu.memory_space<vmem>>) attributes {dimension_semantics = [#tpu.dimension_semantics<arbitrary>], iteration_bounds = array<i64: 4>, scalar_prefetch = 0 : i64, scratch_operands = 0 : i64, tpu.core_type = #tpu.core_type<tc>, window_params = [{transform_indices = @transform_0, window_bounds = array<i64: 1, 24, 96>}, {pipeline_mode = #tpu.pipeline_mode<synchronous>, transform_indices = @transform_1, window_bounds = array<i64: 3, 96, 32>}, {transform_indices = @transform_2, window_bounds = array<i64: 1, 4, 4, 32>}, {pipeline_mode = #tpu.pipeline_mode<synchronous>, transform_indices = @transform_3, window_bounds = array<i64: 2, 32>}]} {
    %c0_i32 = arith.constant 0 : i32
    %0 = arith.cmpi eq, %arg0, %c0_i32 : i32
    %1 = arith.extui %0 : i1 to i32
    %c0_i32_0 = arith.constant 0 : i32
    %2 = arith.cmpi ne, %1, %c0_i32_0 : i32
    scf.if %2 {
      %cst_112 = arith.constant 0.000000e+00 : f32
      %127 = vector.broadcast %cst_112 : f32 to vector<2x32xf32>
      %c0_113 = arith.constant 0 : index
      %c0_114 = arith.constant 0 : index
      %128 = vector.load %arg4[%c0_113, %c0_114] : memref<2x32xf32, #tpu.memory_space<vmem>>, vector<2x32xf32>
      tpu.vector_store %arg4[%c0_113, %c0_114], %127 {strides = array<i32>} : memref<2x32xf32, #tpu.memory_space<vmem>>, vector<2x32xf32>,
    } else {
    }
    %cst = arith.constant 0.000000e+00 : f32
    %3 = vector.broadcast %cst : f32 to vector<1x32xf32>
    %cst_1 = arith.constant 0.000000e+00 : f32
    %4 = vector.broadcast %cst_1 : f32 to vector<1x32xf32>
    %cst_2 = arith.constant 0.000000e+00 : f32
    %5 = vector.broadcast %cst_2 : f32 to vector<4x32xf32>
    %c0 = arith.constant 0 : index
    %c0_3 = arith.constant 0 : index
    %c0_4 = arith.constant 0 : index
    %6 = vector.load %arg1[%c0, %c0_3, %c0_4] : memref<1x24x96xbf16, #tpu.memory_space<vmem>>, vector<1x4x96xbf16>
    %7 = vector.shape_cast %6 : vector<1x4x96xbf16> to vector<4x96xbf16>
    %c0_5 = arith.constant 0 : index
    %c0_6 = arith.constant 0 : index
    %c0_7 = arith.constant 0 : index
    %8 = vector.load %arg2[%c0_5, %c0_6, %c0_7] : memref<3x96x32xbf16, #tpu.memory_space<vmem>>, vector<1x96x32xbf16>
    %9 = vector.shape_cast %8 : vector<1x96x32xbf16> to vector<96x32xbf16>
    %cst_8 = arith.constant dense<0.000000e+00> : vector<4x32xf32>
    %10 = tpu.matmul %7, %9, %cst_8 {dimension_numbers = #tpu.dot_dimension_numbers<[1], [0], [0], [1], [0, 0, 1, 1], [], []>} : vector<4x96xbf16>, vector<96x32xbf16>, vector<4x32xf32> -> vector<4x32xf32>
    %11 = arith.addf %5, %10 : vector<4x32xf32>
    %c0_9 = arith.constant 0 : index
    %c12 = arith.constant 12 : index
    %c0_10 = arith.constant 0 : index
    %12 = vector.load %arg1[%c0_9, %c12, %c0_10] : memref<1x24x96xbf16, #tpu.memory_space<vmem>>, vector<1x4x96xbf16>
    %13 = vector.shape_cast %12 : vector<1x4x96xbf16> to vector<4x96xbf16>
    %c1 = arith.constant 1 : index
    %c0_11 = arith.constant 0 : index
    %c0_12 = arith.constant 0 : index
    %14 = vector.load %arg2[%c1, %c0_11, %c0_12] : memref<3x96x32xbf16, #tpu.memory_space<vmem>>, vector<1x96x32xbf16>
    %15 = vector.shape_cast %14 : vector<1x96x32xbf16> to vector<96x32xbf16>
    %cst_13 = arith.constant dense<0.000000e+00> : vector<4x32xf32>
    %16 = tpu.matmul %13, %15, %cst_13 {dimension_numbers = #tpu.dot_dimension_numbers<[1], [0], [0], [1], [0, 0, 1, 1], [], []>} : vector<4x96xbf16>, vector<96x32xbf16>, vector<4x32xf32> -> vector<4x32xf32>
    %17 = arith.addf %11, %16 : vector<4x32xf32>
    %c0_14 = arith.constant 0 : index
    %c2 = arith.constant 2 : index
    %c0_15 = arith.constant 0 : index
    %18 = vector.load %arg1[%c0_14, %c2, %c0_15] : memref<1x24x96xbf16, #tpu.memory_space<vmem>>, vector<1x4x96xbf16>
    %19 = vector.shape_cast %18 : vector<1x4x96xbf16> to vector<4x96xbf16>
    %c2_16 = arith.constant 2 : index
    %c0_17 = arith.constant 0 : index
    %c0_18 = arith.constant 0 : index
    %20 = vector.load %arg2[%c2_16, %c0_17, %c0_18] : memref<3x96x32xbf16, #tpu.memory_space<vmem>>, vector<1x96x32xbf16>
    %21 = vector.shape_cast %20 : vector<1x96x32xbf16> to vector<96x32xbf16>
    %cst_19 = arith.constant dense<0.000000e+00> : vector<4x32xf32>
    %22 = tpu.matmul %19, %21, %cst_19 {dimension_numbers = #tpu.dot_dimension_numbers<[1], [0], [0], [1], [0, 0, 1, 1], [], []>} : vector<4x96xbf16>, vector<96x32xbf16>, vector<4x32xf32> -> vector<4x32xf32>
    %23 = arith.addf %17, %22 : vector<4x32xf32>
    %c0_20 = arith.constant 0 : index
    %c0_21 = arith.constant 0 : index
    %c0_22 = arith.constant 0 : index
    %c0_23 = arith.constant 0 : index
    %24 = vector.load %arg3[%c0_20, %c0_21, %c0_22, %c0_23] : memref<1x4x4x32xf32, #tpu.memory_space<vmem>>, vector<1x1x4x32xf32>
    %25 = vector.shape_cast %24 : vector<1x1x4x32xf32> to vector<4x32xf32>
    %26 = vector.shape_cast %23 : vector<4x32xf32> to vector<1x1x4x32xf32>
    tpu.vector_store %arg3[%c0_20, %c0_21, %c0_22, %c0_23], %26 {strides = array<i32>} : memref<1x4x4x32xf32, #tpu.memory_space<vmem>>, vector<1x1x4x32xf32>,
    %cst_24 = arith.constant dense<0.000000e+00> : vector<32xf32>
    %27 = vector.multi_reduction <add>, %23, %cst_24 [0] : vector<4x32xf32> to vector<32xf32>
    %28 = vector.shape_cast %27 : vector<32xf32> to vector<1x32xf32>
    %29 = arith.addf %3, %28 : vector<1x32xf32>
    %30 = arith.mulf %23, %23 : vector<4x32xf32>
    %cst_25 = arith.constant dense<0.000000e+00> : vector<32xf32>
    %31 = vector.multi_reduction <add>, %30, %cst_25 [0] : vector<4x32xf32> to vector<32xf32>
    %32 = vector.shape_cast %31 : vector<32xf32> to vector<1x32xf32>
    %33 = arith.addf %4, %32 : vector<1x32xf32>
    %cst_26 = arith.constant 0.000000e+00 : f32
    %34 = vector.broadcast %cst_26 : f32 to vector<4x32xf32>
    %c0_27 = arith.constant 0 : index
    %c6 = arith.constant 6 : index
    %c0_28 = arith.constant 0 : index
    %35 = vector.load %arg1[%c0_27, %c6, %c0_28] : memref<1x24x96xbf16, #tpu.memory_space<vmem>>, vector<1x4x96xbf16>
    %36 = vector.shape_cast %35 : vector<1x4x96xbf16> to vector<4x96xbf16>
    %c0_29 = arith.constant 0 : index
    %c0_30 = arith.constant 0 : index
    %c0_31 = arith.constant 0 : index
    %37 = vector.load %arg2[%c0_29, %c0_30, %c0_31] : memref<3x96x32xbf16, #tpu.memory_space<vmem>>, vector<1x96x32xbf16>
    %38 = vector.shape_cast %37 : vector<1x96x32xbf16> to vector<96x32xbf16>
    %cst_32 = arith.constant dense<0.000000e+00> : vector<4x32xf32>
    %39 = tpu.matmul %36, %38, %cst_32 {dimension_numbers = #tpu.dot_dimension_numbers<[1], [0], [0], [1], [0, 0, 1, 1], [], []>} : vector<4x96xbf16>, vector<96x32xbf16>, vector<4x32xf32> -> vector<4x32xf32>
    %40 = arith.addf %34, %39 : vector<4x32xf32>
    %c0_33 = arith.constant 0 : index
    %c18 = arith.constant 18 : index
    %c0_34 = arith.constant 0 : index
    %41 = vector.load %arg1[%c0_33, %c18, %c0_34] : memref<1x24x96xbf16, #tpu.memory_space<vmem>>, vector<1x4x96xbf16>
    %42 = vector.shape_cast %41 : vector<1x4x96xbf16> to vector<4x96xbf16>
    %c1_35 = arith.constant 1 : index
    %c0_36 = arith.constant 0 : index
    %c0_37 = arith.constant 0 : index
    %43 = vector.load %arg2[%c1_35, %c0_36, %c0_37] : memref<3x96x32xbf16, #tpu.memory_space<vmem>>, vector<1x96x32xbf16>
    %44 = vector.shape_cast %43 : vector<1x96x32xbf16> to vector<96x32xbf16>
    %cst_38 = arith.constant dense<0.000000e+00> : vector<4x32xf32>
    %45 = tpu.matmul %42, %44, %cst_38 {dimension_numbers = #tpu.dot_dimension_numbers<[1], [0], [0], [1], [0, 0, 1, 1], [], []>} : vector<4x96xbf16>, vector<96x32xbf16>, vector<4x32xf32> -> vector<4x32xf32>
    %46 = arith.addf %40, %45 : vector<4x32xf32>
    %c0_39 = arith.constant 0 : index
    %c8 = arith.constant 8 : index
    %c0_40 = arith.constant 0 : index
    %47 = vector.load %arg1[%c0_39, %c8, %c0_40] : memref<1x24x96xbf16, #tpu.memory_space<vmem>>, vector<1x4x96xbf16>
    %48 = vector.shape_cast %47 : vector<1x4x96xbf16> to vector<4x96xbf16>
    %c2_41 = arith.constant 2 : index
    %c0_42 = arith.constant 0 : index
    %c0_43 = arith.constant 0 : index
    %49 = vector.load %arg2[%c2_41, %c0_42, %c0_43] : memref<3x96x32xbf16, #tpu.memory_space<vmem>>, vector<1x96x32xbf16>
    %50 = vector.shape_cast %49 : vector<1x96x32xbf16> to vector<96x32xbf16>
    %cst_44 = arith.constant dense<0.000000e+00> : vector<4x32xf32>
    %51 = tpu.matmul %48, %50, %cst_44 {dimension_numbers = #tpu.dot_dimension_numbers<[1], [0], [0], [1], [0, 0, 1, 1], [], []>} : vector<4x96xbf16>, vector<96x32xbf16>, vector<4x32xf32> -> vector<4x32xf32>
    %52 = arith.addf %46, %51 : vector<4x32xf32>
    %c0_45 = arith.constant 0 : index
    %c1_46 = arith.constant 1 : index
    %c0_47 = arith.constant 0 : index
    %c0_48 = arith.constant 0 : index
    %53 = vector.load %arg3[%c0_45, %c1_46, %c0_47, %c0_48] : memref<1x4x4x32xf32, #tpu.memory_space<vmem>>, vector<1x1x4x32xf32>
    %54 = vector.shape_cast %53 : vector<1x1x4x32xf32> to vector<4x32xf32>
    %55 = vector.shape_cast %52 : vector<4x32xf32> to vector<1x1x4x32xf32>
    tpu.vector_store %arg3[%c0_45, %c1_46, %c0_47, %c0_48], %55 {strides = array<i32>} : memref<1x4x4x32xf32, #tpu.memory_space<vmem>>, vector<1x1x4x32xf32>,
    %cst_49 = arith.constant dense<0.000000e+00> : vector<32xf32>
    %56 = vector.multi_reduction <add>, %52, %cst_49 [0] : vector<4x32xf32> to vector<32xf32>
    %57 = vector.shape_cast %56 : vector<32xf32> to vector<1x32xf32>
    %58 = arith.addf %29, %57 : vector<1x32xf32>
    %59 = arith.mulf %52, %52 : vector<4x32xf32>
    %cst_50 = arith.constant dense<0.000000e+00> : vector<32xf32>
    %60 = vector.multi_reduction <add>, %59, %cst_50 [0] : vector<4x32xf32> to vector<32xf32>
    %61 = vector.shape_cast %60 : vector<32xf32> to vector<1x32xf32>
    %62 = arith.addf %33, %61 : vector<1x32xf32>
    %cst_51 = arith.constant 0.000000e+00 : f32
    %63 = vector.broadcast %cst_51 : f32 to vector<4x32xf32>
    %c0_52 = arith.constant 0 : index
    %c12_53 = arith.constant 12 : index
    %c0_54 = arith.constant 0 : index
    %64 = vector.load %arg1[%c0_52, %c12_53, %c0_54] : memref<1x24x96xbf16, #tpu.memory_space<vmem>>, vector<1x4x96xbf16>
    %65 = vector.shape_cast %64 : vector<1x4x96xbf16> to vector<4x96xbf16>
    %c0_55 = arith.constant 0 : index
    %c0_56 = arith.constant 0 : index
    %c0_57 = arith.constant 0 : index
    %66 = vector.load %arg2[%c0_55, %c0_56, %c0_57] : memref<3x96x32xbf16, #tpu.memory_space<vmem>>, vector<1x96x32xbf16>
    %67 = vector.shape_cast %66 : vector<1x96x32xbf16> to vector<96x32xbf16>
    %cst_58 = arith.constant dense<0.000000e+00> : vector<4x32xf32>
    %68 = tpu.matmul %65, %67, %cst_58 {dimension_numbers = #tpu.dot_dimension_numbers<[1], [0], [0], [1], [0, 0, 1, 1], [], []>} : vector<4x96xbf16>, vector<96x32xbf16>, vector<4x32xf32> -> vector<4x32xf32>
    %69 = arith.addf %63, %68 : vector<4x32xf32>
    %c0_59 = arith.constant 0 : index
    %c2_60 = arith.constant 2 : index
    %c0_61 = arith.constant 0 : index
    %70 = vector.load %arg1[%c0_59, %c2_60, %c0_61] : memref<1x24x96xbf16, #tpu.memory_space<vmem>>, vector<1x4x96xbf16>
    %71 = vector.shape_cast %70 : vector<1x4x96xbf16> to vector<4x96xbf16>
    %c1_62 = arith.constant 1 : index
    %c0_63 = arith.constant 0 : index
    %c0_64 = arith.constant 0 : index
    %72 = vector.load %arg2[%c1_62, %c0_63, %c0_64] : memref<3x96x32xbf16, #tpu.memory_space<vmem>>, vector<1x96x32xbf16>
    %73 = vector.shape_cast %72 : vector<1x96x32xbf16> to vector<96x32xbf16>
    %cst_65 = arith.constant dense<0.000000e+00> : vector<4x32xf32>
    %74 = tpu.matmul %71, %73, %cst_65 {dimension_numbers = #tpu.dot_dimension_numbers<[1], [0], [0], [1], [0, 0, 1, 1], [], []>} : vector<4x96xbf16>, vector<96x32xbf16>, vector<4x32xf32> -> vector<4x32xf32>
    %75 = arith.addf %69, %74 : vector<4x32xf32>
    %c0_66 = arith.constant 0 : index
    %c14 = arith.constant 14 : index
    %c0_67 = arith.constant 0 : index
    %76 = vector.load %arg1[%c0_66, %c14, %c0_67] : memref<1x24x96xbf16, #tpu.memory_space<vmem>>, vector<1x4x96xbf16>
    %77 = vector.shape_cast %76 : vector<1x4x96xbf16> to vector<4x96xbf16>
    %c2_68 = arith.constant 2 : index
    %c0_69 = arith.constant 0 : index
    %c0_70 = arith.constant 0 : index
    %78 = vector.load %arg2[%c2_68, %c0_69, %c0_70] : memref<3x96x32xbf16, #tpu.memory_space<vmem>>, vector<1x96x32xbf16>
    %79 = vector.shape_cast %78 : vector<1x96x32xbf16> to vector<96x32xbf16>
    %cst_71 = arith.constant dense<0.000000e+00> : vector<4x32xf32>
    %80 = tpu.matmul %77, %79, %cst_71 {dimension_numbers = #tpu.dot_dimension_numbers<[1], [0], [0], [1], [0, 0, 1, 1], [], []>} : vector<4x96xbf16>, vector<96x32xbf16>, vector<4x32xf32> -> vector<4x32xf32>
    %81 = arith.addf %75, %80 : vector<4x32xf32>
    %c0_72 = arith.constant 0 : index
    %c2_73 = arith.constant 2 : index
    %c0_74 = arith.constant 0 : index
    %c0_75 = arith.constant 0 : index
    %82 = vector.load %arg3[%c0_72, %c2_73, %c0_74, %c0_75] : memref<1x4x4x32xf32, #tpu.memory_space<vmem>>, vector<1x1x4x32xf32>
    %83 = vector.shape_cast %82 : vector<1x1x4x32xf32> to vector<4x32xf32>
    %84 = vector.shape_cast %81 : vector<4x32xf32> to vector<1x1x4x32xf32>
    tpu.vector_store %arg3[%c0_72, %c2_73, %c0_74, %c0_75], %84 {strides = array<i32>} : memref<1x4x4x32xf32, #tpu.memory_space<vmem>>, vector<1x1x4x32xf32>,
    %cst_76 = arith.constant dense<0.000000e+00> : vector<32xf32>
    %85 = vector.multi_reduction <add>, %81, %cst_76 [0] : vector<4x32xf32> to vector<32xf32>
    %86 = vector.shape_cast %85 : vector<32xf32> to vector<1x32xf32>
    %87 = arith.addf %58, %86 : vector<1x32xf32>
    %88 = arith.mulf %81, %81 : vector<4x32xf32>
    %cst_77 = arith.constant dense<0.000000e+00> : vector<32xf32>
    %89 = vector.multi_reduction <add>, %88, %cst_77 [0] : vector<4x32xf32> to vector<32xf32>
    %90 = vector.shape_cast %89 : vector<32xf32> to vector<1x32xf32>
    %91 = arith.addf %62, %90 : vector<1x32xf32>
    %cst_78 = arith.constant 0.000000e+00 : f32
    %92 = vector.broadcast %cst_78 : f32 to vector<4x32xf32>
    %c0_79 = arith.constant 0 : index
    %c18_80 = arith.constant 18 : index
    %c0_81 = arith.constant 0 : index
    %93 = vector.load %arg1[%c0_79, %c18_80, %c0_81] : memref<1x24x96xbf16, #tpu.memory_space<vmem>>, vector<1x4x96xbf16>
    %94 = vector.shape_cast %93 : vector<1x4x96xbf16> to vector<4x96xbf16>
    %c0_82 = arith.constant 0 : index
    %c0_83 = arith.constant 0 : index
    %c0_84 = arith.constant 0 : index
    %95 = vector.load %arg2[%c0_82, %c0_83, %c0_84] : memref<3x96x32xbf16, #tpu.memory_space<vmem>>, vector<1x96x32xbf16>
    %96 = vector.shape_cast %95 : vector<1x96x32xbf16> to vector<96x32xbf16>
    %cst_85 = arith.constant dense<0.000000e+00> : vector<4x32xf32>
    %97 = tpu.matmul %94, %96, %cst_85 {dimension_numbers = #tpu.dot_dimension_numbers<[1], [0], [0], [1], [0, 0, 1, 1], [], []>} : vector<4x96xbf16>, vector<96x32xbf16>, vector<4x32xf32> -> vector<4x32xf32>
    %98 = arith.addf %92, %97 : vector<4x32xf32>
    %c0_86 = arith.constant 0 : index
    %c8_87 = arith.constant 8 : index
    %c0_88 = arith.constant 0 : index
    %99 = vector.load %arg1[%c0_86, %c8_87, %c0_88] : memref<1x24x96xbf16, #tpu.memory_space<vmem>>, vector<1x4x96xbf16>
    %100 = vector.shape_cast %99 : vector<1x4x96xbf16> to vector<4x96xbf16>
    %c1_89 = arith.constant 1 : index
    %c0_90 = arith.constant 0 : index
    %c0_91 = arith.constant 0 : index
    %101 = vector.load %arg2[%c1_89, %c0_90, %c0_91] : memref<3x96x32xbf16, #tpu.memory_space<vmem>>, vector<1x96x32xbf16>
    %102 = vector.shape_cast %101 : vector<1x96x32xbf16> to vector<96x32xbf16>
    %cst_92 = arith.constant dense<0.000000e+00> : vector<4x32xf32>
    %103 = tpu.matmul %100, %102, %cst_92 {dimension_numbers = #tpu.dot_dimension_numbers<[1], [0], [0], [1], [0, 0, 1, 1], [], []>} : vector<4x96xbf16>, vector<96x32xbf16>, vector<4x32xf32> -> vector<4x32xf32>
    %104 = arith.addf %98, %103 : vector<4x32xf32>
    %c0_93 = arith.constant 0 : index
    %c20 = arith.constant 20 : index
    %c0_94 = arith.constant 0 : index
    %105 = vector.load %arg1[%c0_93, %c20, %c0_94] : memref<1x24x96xbf16, #tpu.memory_space<vmem>>, vector<1x4x96xbf16>
    %106 = vector.shape_cast %105 : vector<1x4x96xbf16> to vector<4x96xbf16>
    %c2_95 = arith.constant 2 : index
    %c0_96 = arith.constant 0 : index
    %c0_97 = arith.constant 0 : index
    %107 = vector.load %arg2[%c2_95, %c0_96, %c0_97] : memref<3x96x32xbf16, #tpu.memory_space<vmem>>, vector<1x96x32xbf16>
    %108 = vector.shape_cast %107 : vector<1x96x32xbf16> to vector<96x32xbf16>
    %cst_98 = arith.constant dense<0.000000e+00> : vector<4x32xf32>
    %109 = tpu.matmul %106, %108, %cst_98 {dimension_numbers = #tpu.dot_dimension_numbers<[1], [0], [0], [1], [0, 0, 1, 1], [], []>} : vector<4x96xbf16>, vector<96x32xbf16>, vector<4x32xf32> -> vector<4x32xf32>
    %110 = arith.addf %104, %109 : vector<4x32xf32>
    %c0_99 = arith.constant 0 : index
    %c3 = arith.constant 3 : index
    %c0_100 = arith.constant 0 : index
    %c0_101 = arith.constant 0 : index
    %111 = vector.load %arg3[%c0_99, %c3, %c0_100, %c0_101] : memref<1x4x4x32xf32, #tpu.memory_space<vmem>>, vector<1x1x4x32xf32>
    %112 = vector.shape_cast %111 : vector<1x1x4x32xf32> to vector<4x32xf32>
    %113 = vector.shape_cast %110 : vector<4x32xf32> to vector<1x1x4x32xf32>
    tpu.vector_store %arg3[%c0_99, %c3, %c0_100, %c0_101], %113 {strides = array<i32>} : memref<1x4x4x32xf32, #tpu.memory_space<vmem>>, vector<1x1x4x32xf32>,
    %cst_102 = arith.constant dense<0.000000e+00> : vector<32xf32>
    %114 = vector.multi_reduction <add>, %110, %cst_102 [0] : vector<4x32xf32> to vector<32xf32>
    %115 = vector.shape_cast %114 : vector<32xf32> to vector<1x32xf32>
    %116 = arith.addf %87, %115 : vector<1x32xf32>
    %117 = arith.mulf %110, %110 : vector<4x32xf32>
    %cst_103 = arith.constant dense<0.000000e+00> : vector<32xf32>
    %118 = vector.multi_reduction <add>, %117, %cst_103 [0] : vector<4x32xf32> to vector<32xf32>
    %119 = vector.shape_cast %118 : vector<32xf32> to vector<1x32xf32>
    %120 = arith.addf %91, %119 : vector<1x32xf32>
    %c0_104 = arith.constant 0 : index
    %c0_105 = arith.constant 0 : index
    %121 = vector.load %arg4[%c0_104, %c0_105] : memref<2x32xf32, #tpu.memory_space<vmem>>, vector<1x32xf32>
    %122 = arith.addf %121, %116 : vector<1x32xf32>
    %c0_106 = arith.constant 0 : index
    %c0_107 = arith.constant 0 : index
    %123 = vector.load %arg4[%c0_106, %c0_107] : memref<2x32xf32, #tpu.memory_space<vmem>>, vector<1x32xf32>
    tpu.vector_store %arg4[%c0_106, %c0_107], %122 {strides = array<i32>} : memref<2x32xf32, #tpu.memory_space<vmem>>, vector<1x32xf32>,
    %c1_108 = arith.constant 1 : index
    %c0_109 = arith.constant 0 : index
    %124 = vector.load %arg4[%c1_108, %c0_109] : memref<2x32xf32, #tpu.memory_space<vmem>>, vector<1x32xf32>
    %125 = arith.addf %124, %120 : vector<1x32xf32>
    %c1_110 = arith.constant 1 : index
    %c0_111 = arith.constant 0 : index
    %126 = vector.load %arg4[%c1_110, %c0_111] : memref<2x32xf32, #tpu.memory_space<vmem>>, vector<1x32xf32>
    tpu.vector_store %arg4[%c1_110, %c0_111], %125 {strides = array<i32>} : memref<2x32xf32, #tpu.memory_space<vmem>>, vector<1x32xf32>,
    return
  }
  func.func @transform_0(%arg0: i32) -> (i32, i32, i32) {
    %c0_i32 = arith.constant 0 : i32
    %c0_i32_0 = arith.constant 0 : i32
    %c0_i32_1 = arith.constant 0 : i32
    return %arg0, %c0_i32, %c0_i32_0 : i32, i32, i32
  }
  func.func @transform_1(%arg0: i32) -> (i32, i32, i32) {
    %c0_i32 = arith.constant 0 : i32
    %c0_i32_0 = arith.constant 0 : i32
    %c0_i32_1 = arith.constant 0 : i32
    %c0_i32_2 = arith.constant 0 : i32
    return %c0_i32, %c0_i32_0, %c0_i32_1 : i32, i32, i32
  }
  func.func @transform_2(%arg0: i32) -> (i32, i32, i32, i32) {
    %c0_i32 = arith.constant 0 : i32
    %c0_i32_0 = arith.constant 0 : i32
    %c0_i32_1 = arith.constant 0 : i32
    %c0_i32_2 = arith.constant 0 : i32
    return %arg0, %c0_i32, %c0_i32_0, %c0_i32_1 : i32, i32, i32, i32
  }
  func.func @transform_3(%arg0: i32) -> (i32, i32) {
    %c0_i32 = arith.constant 0 : i32
    %c0_i32_0 = arith.constant 0 : i32
    %c0_i32_1 = arith.constant 0 : i32
    return %c0_i32, %c0_i32_0 : i32, i32
  }
}

module attributes {stable_mosaic.version = 11 : i64} {
  func.func @_norm_relu_pool_kernel(%arg0: i32, %arg1: memref<1x4x2x64xf32, #tpu.memory_space<vmem>>, %arg2: memref<1x64xf32, #tpu.memory_space<vmem>>, %arg3: memref<1x64xf32, #tpu.memory_space<vmem>>, %arg4: memref<1x2x64xf32, #tpu.memory_space<vmem>>) attributes {dimension_semantics = [#tpu.dimension_semantics<parallel>], iteration_bounds = array<i64: 4>, scalar_prefetch = 0 : i64, scratch_operands = 0 : i64, tpu.core_type = #tpu.core_type<tc>, window_params = [{transform_indices = @transform_0, window_bounds = array<i64: 1, 4, 2, 64>}, {pipeline_mode = #tpu.pipeline_mode<synchronous>, transform_indices = @transform_1, window_bounds = array<i64: 1, 64>}, {pipeline_mode = #tpu.pipeline_mode<synchronous>, transform_indices = @transform_2, window_bounds = array<i64: 1, 64>}, {transform_indices = @transform_3, window_bounds = array<i64: 1, 2, 64>}]} {
    %c0 = arith.constant 0 : index
    %c0_0 = arith.constant 0 : index
    %0 = vector.load %arg2[%c0, %c0_0] : memref<1x64xf32, #tpu.memory_space<vmem>>, vector<1x64xf32>
    %c0_1 = arith.constant 0 : index
    %c0_2 = arith.constant 0 : index
    %1 = vector.load %arg3[%c0_1, %c0_2] : memref<1x64xf32, #tpu.memory_space<vmem>>, vector<1x64xf32>
    %c0_3 = arith.constant 0 : index
    %c0_4 = arith.constant 0 : index
    %c0_5 = arith.constant 0 : index
    %c0_6 = arith.constant 0 : index
    %2 = vector.load %arg1[%c0_3, %c0_4, %c0_5, %c0_6] : memref<1x4x2x64xf32, #tpu.memory_space<vmem>>, vector<1x1x2x64xf32>
    %3 = vector.shape_cast %2 : vector<1x1x2x64xf32> to vector<2x64xf32>
    %4 = vector.broadcast %0 : vector<1x64xf32> to vector<2x64xf32>
    %5 = arith.mulf %3, %4 : vector<2x64xf32>
    %6 = vector.broadcast %1 : vector<1x64xf32> to vector<2x64xf32>
    %7 = arith.addf %5, %6 : vector<2x64xf32>
    %cst = arith.constant 0.000000e+00 : f32
    %8 = vector.broadcast %cst : f32 to vector<2x64xf32>
    %9 = arith.maximumf %7, %8 : vector<2x64xf32>
    %c0_7 = arith.constant 0 : index
    %c1 = arith.constant 1 : index
    %c0_8 = arith.constant 0 : index
    %c0_9 = arith.constant 0 : index
    %10 = vector.load %arg1[%c0_7, %c1, %c0_8, %c0_9] : memref<1x4x2x64xf32, #tpu.memory_space<vmem>>, vector<1x1x2x64xf32>
    %11 = vector.shape_cast %10 : vector<1x1x2x64xf32> to vector<2x64xf32>
    %12 = vector.broadcast %0 : vector<1x64xf32> to vector<2x64xf32>
    %13 = arith.mulf %11, %12 : vector<2x64xf32>
    %14 = vector.broadcast %1 : vector<1x64xf32> to vector<2x64xf32>
    %15 = arith.addf %13, %14 : vector<2x64xf32>
    %cst_10 = arith.constant 0.000000e+00 : f32
    %16 = vector.broadcast %cst_10 : f32 to vector<2x64xf32>
    %17 = arith.maximumf %15, %16 : vector<2x64xf32>
    %18 = arith.addf %9, %17 : vector<2x64xf32>
    %c0_11 = arith.constant 0 : index
    %c2 = arith.constant 2 : index
    %c0_12 = arith.constant 0 : index
    %c0_13 = arith.constant 0 : index
    %19 = vector.load %arg1[%c0_11, %c2, %c0_12, %c0_13] : memref<1x4x2x64xf32, #tpu.memory_space<vmem>>, vector<1x1x2x64xf32>
    %20 = vector.shape_cast %19 : vector<1x1x2x64xf32> to vector<2x64xf32>
    %21 = vector.broadcast %0 : vector<1x64xf32> to vector<2x64xf32>
    %22 = arith.mulf %20, %21 : vector<2x64xf32>
    %23 = vector.broadcast %1 : vector<1x64xf32> to vector<2x64xf32>
    %24 = arith.addf %22, %23 : vector<2x64xf32>
    %cst_14 = arith.constant 0.000000e+00 : f32
    %25 = vector.broadcast %cst_14 : f32 to vector<2x64xf32>
    %26 = arith.maximumf %24, %25 : vector<2x64xf32>
    %27 = arith.addf %18, %26 : vector<2x64xf32>
    %c0_15 = arith.constant 0 : index
    %c3 = arith.constant 3 : index
    %c0_16 = arith.constant 0 : index
    %c0_17 = arith.constant 0 : index
    %28 = vector.load %arg1[%c0_15, %c3, %c0_16, %c0_17] : memref<1x4x2x64xf32, #tpu.memory_space<vmem>>, vector<1x1x2x64xf32>
    %29 = vector.shape_cast %28 : vector<1x1x2x64xf32> to vector<2x64xf32>
    %30 = vector.broadcast %0 : vector<1x64xf32> to vector<2x64xf32>
    %31 = arith.mulf %29, %30 : vector<2x64xf32>
    %32 = vector.broadcast %1 : vector<1x64xf32> to vector<2x64xf32>
    %33 = arith.addf %31, %32 : vector<2x64xf32>
    %cst_18 = arith.constant 0.000000e+00 : f32
    %34 = vector.broadcast %cst_18 : f32 to vector<2x64xf32>
    %35 = arith.maximumf %33, %34 : vector<2x64xf32>
    %36 = arith.addf %27, %35 : vector<2x64xf32>
    %cst_19 = arith.constant 2.500000e-01 : f32
    %37 = vector.broadcast %cst_19 : f32 to vector<2x64xf32>
    %38 = arith.mulf %36, %37 : vector<2x64xf32>
    %c0_20 = arith.constant 0 : index
    %c0_21 = arith.constant 0 : index
    %c0_22 = arith.constant 0 : index
    %39 = vector.load %arg4[%c0_20, %c0_21, %c0_22] : memref<1x2x64xf32, #tpu.memory_space<vmem>>, vector<1x2x64xf32>
    %40 = vector.shape_cast %39 : vector<1x2x64xf32> to vector<2x64xf32>
    %41 = vector.shape_cast %38 : vector<2x64xf32> to vector<1x2x64xf32>
    tpu.vector_store %arg4[%c0_20, %c0_21, %c0_22], %41 {strides = array<i32>} : memref<1x2x64xf32, #tpu.memory_space<vmem>>, vector<1x2x64xf32>,
    return
  }
  func.func @transform_0(%arg0: i32) -> (i32, i32, i32, i32) {
    %c0_i32 = arith.constant 0 : i32
    %c0_i32_0 = arith.constant 0 : i32
    %c0_i32_1 = arith.constant 0 : i32
    %c0_i32_2 = arith.constant 0 : i32
    return %arg0, %c0_i32, %c0_i32_0, %c0_i32_1 : i32, i32, i32, i32
  }
  func.func @transform_1(%arg0: i32) -> (i32, i32) {
    %c0_i32 = arith.constant 0 : i32
    %c0_i32_0 = arith.constant 0 : i32
    %c0_i32_1 = arith.constant 0 : i32
    return %c0_i32, %c0_i32_0 : i32, i32
  }
  func.func @transform_2(%arg0: i32) -> (i32, i32) {
    %c0_i32 = arith.constant 0 : i32
    %c0_i32_0 = arith.constant 0 : i32
    %c0_i32_1 = arith.constant 0 : i32
    return %c0_i32, %c0_i32_0 : i32, i32
  }
  func.func @transform_3(%arg0: i32) -> (i32, i32, i32) {
    %c0_i32 = arith.constant 0 : i32
    %c0_i32_0 = arith.constant 0 : i32
    %c0_i32_1 = arith.constant 0 : i32
    return %arg0, %c0_i32, %c0_i32_0 : i32, i32, i32
  }
}

</mosaic_0001>

<bundles_post_ra>
// kernel: tile.33
= control target key start
LH: loop header
LB: loop body
LE: loop exit
PB: predicated region body
PF: predicated region fallthrough
CT: control target
= control target key end

     0   :  { %s22_s0 = inlined_call_operand.vmem [shape: f32[16], index: 0, kind: input, shape index: {}]   ;;  %s23_s1 = inlined_call_operand.vmem [shape: f32[8,16], index: 1, kind: output, shape index: {}]  }
   0x1   :  { %v4_v0 = vld [vmem:[%s22_s0] ss:$0 sm:$0xff] }
   0x2   :  { %5 = vst [vmem:[%s23_s1] sm:$0xff] %v4_v0 }

// kernel: tile.34
= control target key start
LH: loop header
LB: loop body
LE: loop exit
PB: predicated region body
PF: predicated region fallthrough
CT: control target
= control target key end

     0   :  { %s67_s10 = smov 112   ;;  %s68_s11 = smov 80   ;;  %vm3_vm0 = vcmask 130048   ;;  %vm9_vm1 = vcmask 1048448   ;;  %vm15_vm2 = vcmask 917248   ;;  %vm21_vm3 = vcmask 786048   ;;  %s111_s0 = inlined_call_operand.vmem [shape: f32[8,16], index: 0, kind: input, shape index: {}]   ;;  %s112_s1 = inlined_call_operand.vmem [shape: f32[1,128], index: 1, kind: output, shape index: {}]  }
   0x1   :  { %v53_v0 = vld [vmem:[%s111_s0 + $0x7] sm:$0x1]   ;;  %v55_v1 = vld [vmem:[%s111_s0 + $0x5] sm:$0x1]   ;;  %v57_v2 = vld [vmem:[%s111_s0 + $0x3] sm:$0x1]  }
   0x2   :  { %7 = vrot.lane.b32.xlu0 %v53_v0, %s67_s10  ;;  %19 = vrot.lane.b32.xlu1 %v55_v1, %s68_s11  ;;  %s69_s14 = smov 48   ;;  %v54_v3 = vld [vmem:[%s111_s0 + $0x6] sm:$0x1]   ;;  %v56_v4 = vld [vmem:[%s111_s0 + $0x4] sm:$0x1]   ;;  %s70_s21 = smov 96  }
   0x3   :  { %31 = vrot.lane.b32.xlu2 %v57_v2, %s69_s14  ;;  %v58_v5 = vld [vmem:[%s111_s0 + $0x2] sm:$0x1]   ;;  %s71_s22 = smov 64   ;;  %s72_s23 = smov 32   ;;  %v59_v6 = vld [vmem:[%s111_s0 + $0x1] sm:$0x1]  }
   0x4   :  { %s73_s26 = smov 16   ;;  %v2_v7 = vld [vmem:[%s111_s0] sm:$0x1]   ;;  %vm27_vm4 = vcmask 654848   ;;  %vm33_vm5 = vcmask 523648   ;;  %vm39_vm6 = vcmask 392448  }
   0x5   :  { %4 = vst.msk [vmem:[#allocation0] sm:$0x1] %vm3_vm0, %v2_v7   ;;  %vm45_vm7 = vcmask 261248  }
   0xa   :  { %13 = vrot.lane.b32.xlu0 %v54_v3, %s70_s21  ;;  %25 = vrot.lane.b32.xlu1 %v56_v4, %s71_s22 }
   0xb   :  { %37 = vrot.lane.b32.xlu2 %v58_v5, %s72_s23 }
  0x12   :  { %43 = vrot.lane.b32.xlu0 %v59_v6, %s73_s26 }
  0x5d   :  { %v32_v8 = vpop.permute.xlu2 %31  }
  0x65   :  { %v38_v9 = vpop.permute.xlu2 %37  }
  0x74   :  { %v8_v10 = vpop.permute.xlu0 %7   ;;  %v20_v11 = vpop.permute.xlu1 %19  }
  0x75   :  { %10 = vst.msk [vmem:[#allocation0] sm:$0x1] %vm9_vm1, %v8_v10  }
  0x7c   :  { %v14_v12 = vpop.permute.xlu0 %13   ;;  %v26_v13 = vpop.permute.xlu1 %25  }
  0x7d   :  { %16 = vst.msk [vmem:[#allocation0] sm:$0x1] %vm15_vm2, %v14_v12  }
  0x7e   :  { %22 = vst.msk [vmem:[#allocation0] sm:$0x1] %vm21_vm3, %v20_v11  }
  0x7f   :  { %28 = vst.msk [vmem:[#allocation0] sm:$0x1] %vm27_vm4, %v26_v13  }
  0x80   :  { %34 = vst.msk [vmem:[#allocation0] sm:$0x1] %vm33_vm5, %v32_v8  }
  0x81   :  { %40 = vst.msk [vmem:[#allocation0] sm:$0x1] %vm39_vm6, %v38_v9  }
  0x84   :  { %v44_v14 = vpop.permute.xlu0 %43  }
  0x85   :  { %46 = vst.msk [vmem:[#allocation0] sm:$0x1] %vm45_vm7, %v44_v14  }
  0x8c   :  { %v49_v15 = vld [vmem:[#allocation0] sm:$0x1] }
  0x8d   :  { %52 = vst [vmem:[%s112_s1] sm:$0x1] %v49_v15 }

// kernel: encoder_forward.7
= control target key start
LH: loop header
LB: loop body
LE: loop exit
PB: predicated region body
PF: predicated region fallthrough
CT: control target
= control target key end

     0   :  { %s306_s12 = smov 0   ;;  %s329_s0 = inlined_call_operand.vmem [shape: f32[4,4,8,128], index: 0, kind: input, shape index: {}]   ;;  %s330_s1 = inlined_call_operand.vmem [shape: f32[1,128], index: 1, kind: input, shape index: {}]   ;;  %s331_s2 = inlined_call_operand.vmem [shape: f32[1,128], index: 2, kind: input, shape index: {}]   ;;  %s332_s3 = inlined_call_operand.vmem [shape: f32[4,8,128], index: 3, kind: output, shape index: {}]  }
   0x1 LB: > { %s254_s13 = sadd.s32 4294967295, %s284_s12   ;;  %p258_p0 = scmp.ge.s32.totalorder %s284_s12, 1  ;;  %s284_s12 = sphi %s306_s12, %s13_s12  }
   0x2   : > { %p137_p1 = scmp.lt.s32.totalorder %s284_s12, 5 }
   0x4   : > { %p138_p2 = pnand %p258_p0, %p137_p1 }
   0x5   : > { %p160_p3 = scmp.lt.s32.totalorder (!%p138_p2), %s254_s13, 3 }
   0x6   : > { %141 = sbr.rel (%p138_p2) target bundleno = 30 (0x1e), region = 32 }
   0xb   : > { %s334_s13 = smov (!%p160_p3, %s254_s13), 3  ;;  %v276_v0 = vld [vmem:[%s330_s1] ss:$0 sm:$0xff] }
   0xc   : > { %s267_s16 = sshll.u32 %s334_s13, 5  ;;  %v277_v1 = vld [vmem:[%s331_s2] ss:$0 sm:$0xff]  ;;  %s261_s22 = sshll.u32 %s334_s13, 3 }
   0xd   : > { %s164_s19 = scalar_lea.vmem %s329_s0, %s267_s16  ;;  %s168_s25 = scalar_lea.vmem %s332_s3, %s261_s22 }
   0xe   : > { %v171_v2 = vld [vmem:[%s164_s19] sm:$0xff]  ;;  %v262_v3 = vld [vmem:[%s164_s19 + $0x8] sm:$0xff]  ;;  %v263_v4 = vld [vmem:[%s164_s19 + $0x10] sm:$0xff] }
   0xf   : > { %v175_v5 = vmul.f32 %v276_v0, %v171_v2  ;;  %v183_v6 = vmul.f32 %v276_v0, %v262_v3  ;;  %v189_v7 = vmul.f32 %v276_v0, %v263_v4  ;;  %v264_v8 = vld [vmem:[%s164_s19 + $0x18] sm:$0xff] }
  0x10   : > { %v195_v9 = vmul.f32 %v276_v0, %v264_v8 }
  0x11   : > { %v179_v10 = vadd.f32 %v277_v1, %v175_v5  ;;  %v184_v11 = vadd.f32 %v277_v1, %v183_v6  ;;  %v190_v12 = vadd.f32 %v277_v1, %v189_v7 }
  0x12   : > { %v196_v13 = vadd.f32 %v277_v1, %v195_v9 }
  0x13   : > { %v180_v14 = vmax.f32 %v179_v10, 0.0  ;;  %v185_v15 = vmax.f32 %v184_v11, 0.0  ;;  %v191_v16 = vmax.f32 %v190_v12, 0.0 }
  0x14   : > { %v197_v18 = vmax.f32 %v196_v13, 0.0 }
  0x15   : > { %v186_v17 = vadd.f32 %v185_v15, %v180_v14 }
  0x17   : > { %v192_v19 = vadd.f32 %v191_v16, %v186_v17 }
  0x19   : > { %v198_v20 = vadd.f32 %v197_v18, %v192_v19 }
  0x1b   : > { %v199_v21 = vmul.f32 0.25, %v198_v20 }
  0x1d   : > { %200 = vst [vmem:[%s168_s25] sm:$0xff] %v199_v21 }
  0x1e PF: > { %s13_s12 = sadd.s32 1, %s284_s12  }
  0x1f   : > { %p10_p4 = scmp.ge.s32.totalorder %s13_s12, 6  }
  0x21   :  { %12 = sbr.rel (!%p10_p4) target bundleno = 1 (0x1), region = 65 }

// kernel: tile.43
= control target key start
LH: loop header
LB: loop body
LE: loop exit
PB: predicated region body
PF: predicated region fallthrough
CT: control target
= control target key end

     0   :  { %s22_s0 = inlined_call_operand.vmem [shape: f32[32], index: 0, kind: input, shape index: {}]   ;;  %s23_s1 = inlined_call_operand.vmem [shape: f32[4,32], index: 1, kind: output, shape index: {}]  }
   0x1   :  { %v4_v0 = vld [vmem:[%s22_s0] ss:$0 sm:$0xff] }
   0x2   :  { %5 = vst [vmem:[%s23_s1] sm:$0xf] %v4_v0 }

// kernel: encoder_forward.6
= control target key start
LH: loop header
LB: loop body
LE: loop exit
PB: predicated region body
PF: predicated region fallthrough
CT: control target
= control target key end

     0   :  { %s1911_s12 = smov 0   ;;  %s2371_s0 = inlined_call_operand.vmem [shape: bf16[4,288,12], index: 0, kind: input, shape index: {}]   ;;  %s2372_s1 = inlined_call_operand.vmem [shape: bf16[3,12,16], index: 1, kind: input, shape index: {}]   ;;  %s2373_s2 = inlined_call_operand.vmem [shape: f32[4,4,64,16], index: 2, kind: output, shape index: {0}]   ;;  %s2374_s3 = inlined_call_operand.vmem [shape: f32[2,16], index: 3, kind: output, shape index: {1}]  }
   0x1 LB: > { %s1472_s13 = sadd.s32 4294967295, %s1888_s12   ;;  %p1476_p0 = scmp.ge.s32.totalorder %s1888_s12, 1  ;;  %s1888_s12 = sphi %s1911_s12, %s14_s12  }
   0x2   : > { %p135_p1 = scmp.lt.s32.totalorder %s1888_s12, 5 }
   0x4   : > { %p136_p2 = pnand %p1476_p0, %p135_p1 }
   0x5   : > { %p159_p3 = scmp.lt.s32.totalorder (!%p136_p2), %s1472_s13, 3  ;;  %p1480_p4 = scmp.ne.s32.totalorder (!%p136_p2), %s1472_s13, 0 }
   0x6   : > { %139 = sbr.rel (%p136_p2) target bundleno = 370 (0x172), region = 28 }
   0xb   : > { %s160_s14 = scalar_select %p159_p3, %s1472_s13, 3 }
   0xc   : > { %173 = sbr.rel (%p1480_p4) target bundleno = 19 (0x13), region = 32 }
   0xd   : > { %s1872_s15 = smul.u32 144, %s160_s14  ;;  %s1811_s16 = sshll.u32 %s160_s14, 8 }
   0xe   : > { %s1922_s19 = scalar_lea.vmem %s2373_s2, %s1811_s16 }
   0xf   : > { %s1927_s22 = scalar_lea.vmem %s2371_s0, %s1872_s15 }
  0x11   : > { %vm174_vm0 = vcmask 123904   ;;  %v1890_v0 = vmov 0.0  }
  0x12   : > { %175 = vst.msk [vmem:[%s2374_s3] sm:$0x3] %vm174_vm0, %v1890_v0 }
  0x13 PF: > { %v1501_v1 = vld [vmem:[%s2372_s1 + $0x8] sm:$0xf]  ;;  %v1821_v2 = vld [vmem:[%s2372_s1 + $0x8] sm:$0x30]  ;;  %vm235_vm1 = vcmask 1045504   ;;  %vm222_vm2 = vcmask 97280  }
  0x14   : > { %v1502_v3 = vor.u32 %v1821_v2, %v1501_v1  ;;  %v1525_v4 = vld [vmem:[%s2372_s1] sm:$0xf]  ;;  %v1816_v5 = vld [vmem:[%s2372_s1] sm:$0x30]  ;;  %v1551_v6 = vld [vmem:[%s2372_s1 + $0x10] sm:$0xf] }
  0x15   : > { %v1526_v7 = vor.u32 %v1816_v5, %v1525_v4  ;;  %v1826_v8 = vld [vmem:[%s2372_s1 + $0x10] sm:$0x30]  ;;  %v1577_v9 = vld [vmem:[%s2372_s1 + $0x8] sm:$0xf]  ;;  %v1836_v10 = vld [vmem:[%s2372_s1 + $0x8] sm:$0x30] }
  0x16   : > { %v237_v11 = vsel %vm235_vm1, %v1502_v3, 0  ;;  %v1552_v12 = vor.u32 %v1826_v8, %v1551_v6  ;;  %v1578_v13 = vor.u32 %v1836_v10, %v1577_v9  ;;  %v1817_v14 = vld [vmem:[%s1927_s22 + $0x48] sm:$0xff]  ;;  %v1812_v15 = vld [vmem:[%s1927_s22] sm:$0xff]  ;;  %v1627_v29 = vld [vmem:[%s2372_s1 + $0x10] sm:$0xf]  ;;  %vm425_vm3 = vcmask 130048  }
  0x17   : > { %v1822_v16 = vld [vmem:[%s1927_s22 + $0x4] sm:$0xff]  ;;  %246 = vmatpush.bf16.msra.mxu0 %v237_v11  ;;  %v306_v17 = vsel %vm235_vm1, %v1526_v7, 0  ;;  %v1832_v18 = vld [vmem:[%s1927_s22 + $0x6c] sm:$0xff]  ;;  %v1685_v24 = vld [vmem:[%s2372_s1] sm:$0xf]  ;;  %vm1406_vm4 = vcmask 122880  }
  0x18   : > { %v1661_v19 = vld [vmem:[%s2372_s1 + $0x8] sm:$0xf]  ;;  %v1851_v20 = vld [vmem:[%s2372_s1 + $0x8] sm:$0x30]  ;;  %315 = vmatpush.bf16.msra.mxu1 %v306_v17  ;;  %v386_v21 = vsel %vm235_vm1, %v1552_v12, 0  ;;  %v544_v22 = vsel %vm235_vm1, %v1578_v13, 0 }
  0x19   : > { %v1662_v23 = vor.u32 %v1851_v20, %v1661_v19  ;;  %v1846_v25 = vld [vmem:[%s2372_s1] sm:$0x30]  ;;  %395 = vmatpush.bf16.msra.mxu2 %v386_v21  ;;  %553 = vmatpush.bf16.msra.mxu3 %v544_v22  ;;  %v1601_v27 = vld [vmem:[%s2372_s1] sm:$0xf]  ;;  %v1841_v32 = vld [vmem:[%s2372_s1 + $0x10] sm:$0x30] }
  0x1a   : > { %v1686_v26 = vor.u32 %v1846_v25, %v1685_v24  ;;  %v1831_v28 = vld [vmem:[%s2372_s1] sm:$0x30]  ;;  %1503 = vmatmul.msk.bf16.vlgmr.msra.gmra.mxu0 %vm222_vm2, %v1817_v14  ;;  %v1628_v34 = vor.u32 %v1841_v32, %v1627_v29  ;;  %v1818_v37 = vld [vmem:[%s1927_s22 + $0x50] sm:$0xff]  ;;  %v1813_v38 = vld [vmem:[%s1927_s22 + $0x8] sm:$0xff] }
  0x1b   : > { %v850_v30 = vsel %vm235_vm1, %v1662_v23, 0  ;;  %v1602_v31 = vor.u32 %v1831_v28, %v1601_v27  ;;  %1527 = vmatmul.msk.bf16.vlgmr.msra.gmra.mxu1 %vm222_vm2, %v1812_v15  ;;  %v1823_v39 = vld [vmem:[%s1927_s22 + $0xc] sm:$0xff]  ;;  %v1833_v40 = vld [vmem:[%s1927_s22 + $0x74] sm:$0xff]  ;;  %v1834_v44 = vld [vmem:[%s1927_s22 + $0x7c] sm:$0xff] }
  0x1c   : > { %v919_v33 = vsel %vm235_vm1, %v1686_v26, 0  ;;  %1553 = vmatmul.msk.bf16.vlgmr.msra.gmra.mxu2 %vm222_vm2, %v1822_v16  ;;  %1579 = vmatmul.msk.bf16.vlgmr.msra.gmra.mxu3 %vm222_vm2, %v1832_v18  ;;  %v692_v36 = vsel %vm235_vm1, %v1628_v34, 0  ;;  %v1819_v41 = vld [vmem:[%s1927_s22 + $0x58] sm:$0xff]  ;;  %v1814_v42 = vld [vmem:[%s1927_s22 + $0x10] sm:$0xff]  ;;  %v1769_v45 = vld [vmem:[%s2372_s1] sm:$0xf] }
  0x1d   : > { %859 = vmatpush.bf16.msrb.mxu2 %v850_v30  ;;  %v613_v35 = vsel %vm235_vm1, %v1602_v31, 0  ;;  %928 = vmatpush.bf16.msrb.mxu3 %v919_v33  ;;  %v1824_v43 = vld [vmem:[%s1927_s22 + $0x14] sm:$0xff]  ;;  %v1861_v46 = vld [vmem:[%s2372_s1] sm:$0x30]  ;;  %v1795_v47 = vld [vmem:[%s2372_s1 + $0x10] sm:$0xf] }
  0x1e   : > { %622 = vmatpush.bf16.msrb.mxu0 %v613_v35  ;;  %701 = vmatpush.bf16.msrb.mxu1 %v692_v36  ;;  %v1770_v48 = vor.u32 %v1861_v46, %v1769_v45  ;;  %v1871_v49 = vld [vmem:[%s2372_s1 + $0x10] sm:$0x30]  ;;  %v1711_v50 = vld [vmem:[%s2372_s1 + $0x10] sm:$0xf]  ;;  %v1745_v54 = vld [vmem:[%s2372_s1 + $0x8] sm:$0xf] }
  0x1f   : > { %v1856_v51 = vld [vmem:[%s2372_s1 + $0x10] sm:$0x30]  ;;  %v1796_v52 = vor.u32 %v1871_v49, %v1795_v47  ;;  %v1866_v55 = vld [vmem:[%s2372_s1 + $0x8] sm:$0x30]  ;;  %v1820_v61 = vld [vmem:[%s1927_s22 + $0x60] sm:$0xff] }
  0x20   : > { %v1712_v53 = vor.u32 %v1856_v51, %v1711_v50  ;;  %v1225_v56 = vsel %vm235_vm1, %v1770_v48, 0  ;;  %v1746_v57 = vor.u32 %v1866_v55, %v1745_v54  ;;  %v1815_v62 = vld [vmem:[%s1927_s22 + $0x18] sm:$0xff]  ;;  %v1835_v0 = vld [vmem:[%s1927_s22 + $0x84] sm:$0xff]  ;;  %v1828_v5 = vld [vmem:[%s1927_s22 + $0x2c] sm:$0xff] }
  0x21   : > { %1234 = vmatpush.bf16.msra.mxu2 %v1225_v56  ;;  %v1304_v58 = vsel %vm235_vm1, %v1796_v52, 0  ;;  %v1825_v63 = vld [vmem:[%s1927_s22 + $0x1c] sm:$0xff]  ;;  %v1827_v1 = vld [vmem:[%s1927_s22 + $0x24] sm:$0xff]  ;;  %v1838_v6 = vld [vmem:[%s1927_s22 + $0x30] sm:$0xff] }
  0x22   : > { %v998_v59 = vsel %vm235_vm1, %v1712_v53, 0  ;;  %1313 = vmatpush.bf16.msra.mxu3 %v1304_v58  ;;  %v1156_v60 = vsel %vm235_vm1, %v1746_v57, 0  ;;  %v1837_v2 = vld [vmem:[%s1927_s22 + $0x28] sm:$0xff]  ;;  %v1843_v8 = vld [vmem:[%s1927_s22 + $0x50] sm:$0xff]  ;;  %v1839_v10 = vld [vmem:[%s1927_s22 + $0x38] sm:$0xff] }
  0x23   : > { %1007 = vmatpush.bf16.msra.mxu0 %v998_v59  ;;  %1165 = vmatpush.bf16.msra.mxu1 %v1156_v60  ;;  %v1847_v3 = vld [vmem:[%s1927_s22 + $0x4] sm:$0xff]  ;;  %v1848_v7 = vld [vmem:[%s1927_s22 + $0xc] sm:$0xff]  ;;  %v1829_v9 = vld [vmem:[%s1927_s22 + $0x34] sm:$0xff] }
  0x24   : > { %v1842_v4 = vld [vmem:[%s1927_s22 + $0x48] sm:$0xff]  ;;  %v1849_v11 = vld [vmem:[%s1927_s22 + $0x14] sm:$0xff]  ;;  %v1830_v13 = vld [vmem:[%s1927_s22 + $0x3c] sm:$0xff] }
  0x25   : > { %v1844_v12 = vld [vmem:[%s1927_s22 + $0x58] sm:$0xff]  ;;  %v1840_v14 = vld [vmem:[%s1927_s22 + $0x40] sm:$0xff]  ;;  %v1852_v17 = vld [vmem:[%s1927_s22 + $0x4c] sm:$0xff] }
  0x26   : > { %v1850_v15 = vld [vmem:[%s1927_s22 + $0x1c] sm:$0xff]  ;;  %v1862_v19 = vld [vmem:[%s1927_s22 + $0x28] sm:$0xff]  ;;  %v1867_v22 = vld [vmem:[%s1927_s22 + $0x70] sm:$0xff] }
  0x27   : > { %v1845_v16 = vld [vmem:[%s1927_s22 + $0x60] sm:$0xff]  ;;  %v1857_v21 = vld [vmem:[%s1927_s22 + $0x6c] sm:$0xff]  ;;  %v1853_v30 = vld [vmem:[%s1927_s22 + $0x54] sm:$0xff] }
  0x28   : > { %v1863_v33 = vld [vmem:[%s1927_s22 + $0x30] sm:$0xff]  ;;  %v1854_v59 = vld [vmem:[%s1927_s22 + $0x5c] sm:$0xff] }
  0x2a   : > { %1504 = vmatmul.msk.bf16.gmra.mxu0 %vm222_vm2, %v1818_v37 }
  0x2b   : > { %1528 = vmatmul.msk.bf16.gmra.mxu1 %vm222_vm2, %v1813_v38  ;;  %v1858_v38 = vld [vmem:[%s1927_s22 + $0x74] sm:$0xff] }
  0x2c   : > { %1554 = vmatmul.msk.bf16.gmra.mxu2 %vm222_vm2, %v1823_v39  ;;  %1580 = vmatmul.msk.bf16.gmra.mxu3 %vm222_vm2, %v1833_v40  ;;  %v1868_v39 = vld [vmem:[%s1927_s22 + $0x78] sm:$0xff] }
  0x3a   : > { %1505 = vmatmul.msk.bf16.gmra.mxu0 %vm222_vm2, %v1819_v41 }
  0x3b   : > { %1529 = vmatmul.msk.bf16.gmra.mxu1 %vm222_vm2, %v1814_v42 }
  0x3c   : > { %1555 = vmatmul.msk.bf16.gmra.mxu2 %vm222_vm2, %v1824_v43  ;;  %1581 = vmatmul.msk.bf16.gmra.mxu3 %vm222_vm2, %v1834_v44 }
  0x4a   : > { %1506 = vmatmul.msk.bf16.gmra.mxu0 %vm222_vm2, %v1820_v61 }
  0x4b   : > { %1530 = vmatmul.msk.bf16.gmra.mxu1 %vm222_vm2, %v1815_v62  ;;  %v1864_v62 = vld [vmem:[%s1927_s22 + $0x38] sm:$0xff] }
  0x4c   : > { %1556 = vmatmul.msk.bf16.gmra.mxu2 %vm222_vm2, %v1825_v63  ;;  %1582 = vmatmul.msk.bf16.gmra.mxu3 %vm222_vm2, %v1835_v0 }
  0x5a   : > { %1603 = vmatmul.msk.bf16.vlgmr.msrb.gmra.mxu0 %vm222_vm2, %v1827_v1 }
  0x5b   : > { %1629 = vmatmul.msk.bf16.vlgmr.msrb.gmra.mxu1 %vm222_vm2, %v1837_v2  ;;  %v1859_v2 = vld [vmem:[%s1927_s22 + $0x7c] sm:$0xff] }
  0x5c   : > { %1663 = vmatmul.msk.bf16.vlgmr.msrb.gmra.mxu2 %vm222_vm2, %v1847_v3  ;;  %1687 = vmatmul.msk.bf16.vlgmr.msrb.gmra.mxu3 %vm222_vm2, %v1842_v4  ;;  %v1869_v3 = vld [vmem:[%s1927_s22 + $0x80] sm:$0xff] }
  0x6a   : > { %1604 = vmatmul.msk.bf16.gmra.mxu0 %vm222_vm2, %v1828_v5 }
  0x6b   : > { %1630 = vmatmul.msk.bf16.gmra.mxu1 %vm222_vm2, %v1838_v6 }
  0x6c   : > { %1664 = vmatmul.msk.bf16.gmra.mxu2 %vm222_vm2, %v1848_v7  ;;  %1688 = vmatmul.msk.bf16.gmra.mxu3 %vm222_vm2, %v1843_v8 }
  0x7a   : > { %1605 = vmatmul.msk.bf16.gmra.mxu0 %vm222_vm2, %v1829_v9 }
  0x7b   : > { %1631 = vmatmul.msk.bf16.gmra.mxu1 %vm222_vm2, %v1839_v10 }
  0x7c   : > { %1665 = vmatmul.msk.bf16.gmra.mxu2 %vm222_vm2, %v1849_v11  ;;  %1689 = vmatmul.msk.bf16.gmra.mxu3 %vm222_vm2, %v1844_v12 }
  0x8a   : > { %1606 = vmatmul.msk.bf16.gmra.mxu0 %vm222_vm2, %v1830_v13 }
  0x8b   : > { %1632 = vmatmul.msk.bf16.gmra.mxu1 %vm222_vm2, %v1840_v14 }
  0x8c   : > { %1666 = vmatmul.msk.bf16.gmra.mxu2 %vm222_vm2, %v1850_v15  ;;  %1690 = vmatmul.msk.bf16.gmra.mxu3 %vm222_vm2, %v1845_v16 }
  0x97   : > { %v248_v18 = vpop.f32.mrf.mxu0 }
  0x98   : > { %v317_v20 = vpop.f32.mrf.mxu1 }
  0x99   : > { %v318_v23 = vadd.f32 %v317_v20, %v248_v18 }
  0x9a   : > { %1713 = vmatmul.msk.bf16.vlgmr.msra.gmra.mxu0 %vm222_vm2, %v1852_v17 }
  0x9b   : > { %1747 = vmatmul.msk.bf16.vlgmr.msra.gmra.mxu1 %vm222_vm2, %v1862_v19 }
  0x9c   : > { %1771 = vmatmul.msk.bf16.vlgmr.msra.gmra.mxu2 %vm222_vm2, %v1857_v21  ;;  %1797 = vmatmul.msk.bf16.vlgmr.msra.gmra.mxu3 %vm222_vm2, %v1867_v22  ;;  %v1855_v21 = vld [vmem:[%s1927_s22 + $0x64] sm:$0xff] }
  0x9f   : > { %v397_v24 = vpop.f32.mrf.mxu2  ;;  %v2088_v25 = vpop.f32.mrf.mxu3 }
  0xa0   : > { %v417_v26 = vadd.f32 %v397_v24, %v318_v23  ;;  %v250_v27 = vpop.f32.mrf.mxu0  ;;  %v319_v28 = vpop.f32.mrf.mxu1  ;;  %v1865_v24 = vld [vmem:[%s1927_s22 + $0x40] sm:$0xff] }
  0xa1   : > { %v320_v29 = vadd.f32 %v319_v28, %v250_v27 }
  0xa2   : > { %426 = vst.msk [vmem:[%s1922_s19] sm:$0xff] %vm425_vm3, %v417_v26  ;;  %v456_v34 = vmul.f32 %v417_v26, %v417_v26  ;;  %v434_v40 = vsel %vm425_vm3, %v417_v26, 0.0 }
  0xa4   : > { %v464_v44 = vsel %vm425_vm3, %v456_v34, 0.0 }
  0xa7   : > { %v399_v31 = vpop.f32.mrf.mxu2  ;;  %v2093_v32 = vpop.f32.mrf.mxu3 }
  0xa8   : > { %v418_v35 = vadd.f32 %v399_v31, %v320_v29  ;;  %v253_v36 = vpop.f32.mrf.mxu0  ;;  %v322_v37 = vpop.f32.mrf.mxu1  ;;  %v1860_v29 = vld [vmem:[%s1927_s22 + $0x84] sm:$0xff] }
  0xa9   : > { %v323_v46 = vadd.f32 %v322_v37, %v253_v36 }
  0xaa   : > { %427 = vst.msk [vmem:[%s1922_s19 + $0x8] sm:$0xff] %vm425_vm3, %v418_v35  ;;  %v435_v41 = vsel %vm425_vm3, %v418_v35, 0.0  ;;  %v457_v42 = vmul.f32 %v418_v35, %v418_v35  ;;  %1714 = vmatmul.msk.bf16.gmra.mxu0 %vm222_vm2, %v1853_v30  ;;  %v1870_v30 = vld [vmem:[%s1927_s22 + $0x88] sm:$0xff] }
  0xab   : > { %v436_v43 = vadd.f32 %v435_v41, %v434_v40  ;;  %1748 = vmatmul.msk.bf16.gmra.mxu1 %vm222_vm2, %v1863_v33 }
  0xac   : > { %v465_v45 = vsel %vm425_vm3, %v457_v42, 0.0  ;;  %1772 = vmatmul.msk.bf16.gmra.mxu2 %vm222_vm2, %v1858_v38  ;;  %1798 = vmatmul.msk.bf16.gmra.mxu3 %vm222_vm2, %v1868_v39 }
  0xad   : > { %v466_v47 = vadd.f32 %v465_v45, %v464_v44 }
  0xaf   : > { %v402_v48 = vpop.f32.mrf.mxu2  ;;  %v2108_v49 = vpop.f32.mrf.mxu3 }
  0xb0   : > { %v419_v50 = vadd.f32 %v402_v48, %v323_v46  ;;  %v255_v51 = vpop.f32.mrf.mxu0  ;;  %v324_v52 = vpop.f32.mrf.mxu1 }
  0xb1   : > { %v325_v58 = vadd.f32 %v324_v52, %v255_v51 }
  0xb2   : > { %428 = vst.msk [vmem:[%s1922_s19 + $0x10] sm:$0xff] %vm425_vm3, %v419_v50  ;;  %v437_v53 = vsel %vm425_vm3, %v419_v50, 0.0  ;;  %v458_v54 = vmul.f32 %v419_v50, %v419_v50 }
  0xb3   : > { %v438_v55 = vadd.f32 %v437_v53, %v436_v43 }
  0xb4   : > { %v467_v56 = vsel %vm425_vm3, %v458_v54, 0.0 }
  0xb5   : > { %v468_v57 = vadd.f32 %v467_v56, %v466_v47 }
  0xb7   : > { %v404_v60 = vpop.f32.mrf.mxu2  ;;  %v2115_v61 = vpop.f32.mrf.mxu3 }
  0xb8   : > { %v420_v63 = vadd.f32 %v404_v60, %v325_v58  ;;  %v258_v0 = vpop.f32.mrf.mxu0  ;;  %v327_v1 = vpop.f32.mrf.mxu1 }
  0xb9   : > { %v328_v8 = vadd.f32 %v327_v1, %v258_v0 }
  0xba   : > { %429 = vst.msk [vmem:[%s1922_s19 + $0x18] sm:$0xff] %vm425_vm3, %v420_v63  ;;  %v439_v4 = vsel %vm425_vm3, %v420_v63, 0.0  ;;  %v459_v5 = vmul.f32 %v420_v63, %v420_v63  ;;  %1715 = vmatmul.msk.bf16.gmra.mxu0 %vm222_vm2, %v1854_v59 }
  0xbb   : > { %v440_v6 = vadd.f32 %v439_v4, %v438_v55  ;;  %1749 = vmatmul.msk.bf16.gmra.mxu1 %vm222_vm2, %v1864_v62 }
  0xbc   : > { %v469_v7 = vsel %vm425_vm3, %v459_v5, 0.0  ;;  %1773 = vmatmul.msk.bf16.gmra.mxu2 %vm222_vm2, %v1859_v2  ;;  %1799 = vmatmul.msk.bf16.gmra.mxu3 %vm222_vm2, %v1869_v3 }
  0xbd   : > { %v470_v9 = vadd.f32 %v469_v7, %v468_v57 }
  0xbf   : > { %v407_v10 = vpop.f32.mrf.mxu2  ;;  %v2128_v11 = vpop.f32.mrf.mxu3 }
  0xc0   : > { %v421_v12 = vadd.f32 %v407_v10, %v328_v8  ;;  %v260_v13 = vpop.f32.mrf.mxu0  ;;  %v329_v14 = vpop.f32.mrf.mxu1 }
  0xc1   : > { %v330_v20 = vadd.f32 %v329_v14, %v260_v13 }
  0xc2   : > { %430 = vst.msk [vmem:[%s1922_s19 + $0x20] sm:$0xff] %vm425_vm3, %v421_v12  ;;  %v441_v15 = vsel %vm425_vm3, %v421_v12, 0.0  ;;  %v460_v16 = vmul.f32 %v421_v12, %v421_v12 }
  0xc3   : > { %v442_v17 = vadd.f32 %v441_v15, %v440_v6 }
  0xc4   : > { %v471_v18 = vsel %vm425_vm3, %v460_v16, 0.0 }
  0xc5   : > { %v472_v19 = vadd.f32 %v471_v18, %v470_v9 }
  0xc7   : > { %v409_v22 = vpop.f32.mrf.mxu2  ;;  %v2135_v23 = vpop.f32.mrf.mxu3 }
  0xc8   : > { %v422_v26 = vadd.f32 %v409_v22, %v330_v20  ;;  %v263_v27 = vpop.f32.mrf.mxu0  ;;  %v332_v28 = vpop.f32.mrf.mxu1 }
  0xc9   : > { %v333_v36 = vadd.f32 %v332_v28, %v263_v27 }
  0xca   : > { %431 = vst.msk [vmem:[%s1922_s19 + $0x28] sm:$0xff] %vm425_vm3, %v422_v26  ;;  %v443_v31 = vsel %vm425_vm3, %v422_v26, 0.0  ;;  %v461_v33 = vmul.f32 %v422_v26, %v422_v26  ;;  %1716 = vmatmul.msk.bf16.gmra.mxu0 %vm222_vm2, %v1855_v21 }
  0xcb   : > { %v444_v34 = vadd.f32 %v443_v31, %v442_v17  ;;  %1750 = vmatmul.msk.bf16.gmra.mxu1 %vm222_vm2, %v1865_v24 }
  0xcc   : > { %v473_v35 = vsel %vm425_vm3, %v461_v33, 0.0  ;;  %1774 = vmatmul.msk.bf16.gmra.mxu2 %vm222_vm2, %v1860_v29  ;;  %1800 = vmatmul.msk.bf16.gmra.mxu3 %vm222_vm2, %v1870_v30 }
  0xcd   : > { %v474_v37 = vadd.f32 %v473_v35, %v472_v19 }
  0xcf   : > { %v412_v38 = vpop.f32.mrf.mxu2  ;;  %v2148_v39 = vpop.f32.mrf.mxu3 }
  0xd0   : > { %v423_v40 = vadd.f32 %v412_v38, %v333_v36  ;;  %v265_v41 = vpop.f32.mrf.mxu0  ;;  %v334_v42 = vpop.f32.mrf.mxu1 }
  0xd1   : > { %v335_v48 = vadd.f32 %v334_v42, %v265_v41 }
  0xd2   : > { %432 = vst.msk [vmem:[%s1922_s19 + $0x30] sm:$0xff] %vm425_vm3, %v423_v40  ;;  %v445_v43 = vsel %vm425_vm3, %v423_v40, 0.0  ;;  %v462_v44 = vmul.f32 %v423_v40, %v423_v40 }
  0xd3   : > { %v446_v45 = vadd.f32 %v445_v43, %v444_v34 }
  0xd4   : > { %v475_v46 = vsel %vm425_vm3, %v462_v44, 0.0 }
  0xd5   : > { %v476_v47 = vadd.f32 %v475_v46, %v474_v37 }
  0xd7   : > { %v414_v50 = vpop.f32.mrf.mxu2  ;;  %v2154_v51 = vpop.f32.mrf.mxu3 }
  0xd8   : > { %v424_v52 = vadd.f32 %v414_v50, %v335_v48  ;;  %v624_v53 = vpop.f32.mrf.mxu0  ;;  %v703_v54 = vpop.f32.mrf.mxu1 }
  0xd9   : > { %v625_v55 = vadd.f32 %v624_v53, %v2088_v25 }
  0xda   : > { %433 = vst.msk [vmem:[%s1922_s19 + $0x38] sm:$0xff] %vm425_vm3, %v424_v52  ;;  %v447_v56 = vsel %vm425_vm3, %v424_v52, 0.0  ;;  %v463_v57 = vmul.f32 %v424_v52, %v424_v52 }
  0xdb   : > { %v2160_v58 = vadd.f32 %v447_v56, %v446_v45  ;;  %v723_v59 = vadd.f32 %v703_v54, %v625_v55 }
  0xdc   : > { %v477_v60 = vsel %vm425_vm3, %v463_v57, 0.0 }
  0xdd   : > { %v2163_v62 = vadd.f32 %v477_v60, %v476_v47  ;;  %1633 = vst.msk [vmem:[%s1922_s19 + $0x40] sm:$0xff] %vm425_vm3, %v723_v59  ;;  %v762_v3 = vmul.f32 %v723_v59, %v723_v59  ;;  %v740_v5 = vsel %vm425_vm3, %v723_v59, 0.0 }
  0xdf   : > { %v2167_v63 = vpop.f32.mrf.mxu2  ;;  %v2169_v0 = vpop.f32.mrf.mxu3  ;;  %v770_v9 = vsel %vm425_vm3, %v762_v3, 0.0 }
  0xe0   : > { %v626_v25 = vpop.f32.mrf.mxu0  ;;  %v705_v1 = vpop.f32.mrf.mxu1 }
  0xe1   : > { %v627_v2 = vadd.f32 %v626_v25, %v2093_v32 }
  0xe3   : > { %v724_v4 = vadd.f32 %v705_v1, %v627_v2 }
  0xe5   : > { %1634 = vst.msk [vmem:[%s1922_s19 + $0x48] sm:$0xff] %vm425_vm3, %v724_v4  ;;  %v741_v6 = vsel %vm425_vm3, %v724_v4, 0.0  ;;  %v763_v7 = vmul.f32 %v724_v4, %v724_v4 }
  0xe6   : > { %v742_v8 = vadd.f32 %v741_v6, %v740_v5  ;;  %v449_v6 = vrot.slane %v2160_v58, 4 }
  0xe7   : > { %v771_v10 = vsel %vm425_vm3, %v763_v7, 0.0  ;;  %v2178_v12 = vpop.f32.mrf.mxu2  ;;  %v2180_v13 = vpop.f32.mrf.mxu3 }
  0xe8   : > { %v772_v32 = vadd.f32 %v771_v10, %v770_v9  ;;  %v629_v14 = vpop.f32.mrf.mxu0  ;;  %v708_v15 = vpop.f32.mrf.mxu1 }
  0xe9   : > { %v630_v16 = vadd.f32 %v629_v14, %v2108_v49 }
  0xeb   : > { %v725_v17 = vadd.f32 %v708_v15, %v630_v16 }
  0xed   : > { %1635 = vst.msk [vmem:[%s1922_s19 + $0x50] sm:$0xff] %vm425_vm3, %v725_v17  ;;  %v743_v18 = vsel %vm425_vm3, %v725_v17, 0.0  ;;  %v764_v19 = vmul.f32 %v725_v17, %v725_v17  ;;  %v450_v17 = vadd.f32 %v449_v6, %v2160_v58 }
  0xee   : > { %v744_v20 = vadd.f32 %v743_v18, %v742_v8 }
  0xef   : > { %v773_v21 = vsel %vm425_vm3, %v764_v19, 0.0  ;;  %v2187_v22 = vpop.f32.mrf.mxu2  ;;  %v2189_v24 = vpop.f32.mrf.mxu3 }
  0xf0   : > { %v774_v26 = vadd.f32 %v773_v21, %v772_v32  ;;  %v631_v27 = vpop.f32.mrf.mxu0  ;;  %v710_v28 = vpop.f32.mrf.mxu1  ;;  %v479_v32 = vrot.slane %v2163_v62, 4 }
  0xf1   : > { %v632_v29 = vadd.f32 %v631_v27, %v2115_v61 }
  0xf2   : > { %v480_v19 = vadd.f32 %v479_v32, %v2163_v62 }
  0xf3   : > { %v726_v49 = vadd.f32 %v710_v28, %v632_v29  ;;  %v931_v28 = vadd.f32 %v2169_v0, %v2167_v63 }
  0xf4   : > { %v481_v58 = vrot.slane %v480_v19, 2 }
  0xf5   : > { %1636 = vst.msk [vmem:[%s1922_s19 + $0x58] sm:$0xff] %vm425_vm3, %v726_v49  ;;  %v745_v30 = vsel %vm425_vm3, %v726_v49, 0.0  ;;  %v765_v31 = vmul.f32 %v726_v49, %v726_v49 }
  0xf6   : > { %v746_v33 = vadd.f32 %v745_v30, %v744_v20  ;;  %v482_v63 = vadd.f32 %v481_v58, %v480_v19 }
  0xf7   : > { %v775_v34 = vsel %vm425_vm3, %v765_v31, 0.0  ;;  %v2196_v35 = vpop.f32.mrf.mxu2  ;;  %v2198_v36 = vpop.f32.mrf.mxu3 }
  0xf8   : > { %v776_v37 = vadd.f32 %v775_v34, %v774_v26  ;;  %v634_v38 = vpop.f32.mrf.mxu0  ;;  %v713_v40 = vpop.f32.mrf.mxu1  ;;  %v451_v26 = vrot.slane %v450_v17, 2 }
  0xf9   : > { %v635_v41 = vadd.f32 %v634_v38, %v2128_v11 }
  0xfb   : > { %v727_v61 = vadd.f32 %v713_v40, %v635_v41 }
  0xfd   : > { %1637 = vst.msk [vmem:[%s1922_s19 + $0x60] sm:$0xff] %vm425_vm3, %v727_v61  ;;  %v747_v42 = vsel %vm425_vm3, %v727_v61, 0.0  ;;  %v766_v43 = vmul.f32 %v727_v61, %v727_v61 }
  0xfe   : > { %v748_v44 = vadd.f32 %v747_v42, %v746_v33 }
  0xff   : > { %v777_v45 = vsel %vm425_vm3, %v766_v43, 0.0  ;;  %v2205_v46 = vpop.f32.mrf.mxu2  ;;  %v2207_v47 = vpop.f32.mrf.mxu3 }
 0x100   : > { %v778_v48 = vadd.f32 %v777_v45, %v776_v37  ;;  %v636_v50 = vpop.f32.mrf.mxu0  ;;  %v715_v52 = vpop.f32.mrf.mxu1  ;;  %v452_v37 = vadd.f32 %v451_v26, %v450_v17 }
 0x101   : > { %v637_v53 = vadd.f32 %v636_v50, %v2135_v23  ;;  %v483_v50 = vrot.slane %v482_v63, 1 }
 0x102   : > { %v453_v61 = vrot.slane %v452_v37, 1 }
 0x103   : > { %v728_v11 = vadd.f32 %v715_v52, %v637_v53 }
 0x105   : > { %1638 = vst.msk [vmem:[%s1922_s19 + $0x68] sm:$0xff] %vm425_vm3, %v728_v11  ;;  %v749_v54 = vsel %vm425_vm3, %v728_v11, 0.0  ;;  %v767_v55 = vmul.f32 %v728_v11, %v728_v11 }
 0x106   : > { %v750_v56 = vadd.f32 %v749_v54, %v748_v44  ;;  %v933_v44 = vadd.f32 %v2180_v13, %v2178_v12  ;;  %v484_v12 = vadd.f32 %v483_v50, %v482_v63 }
 0x107   : > { %v779_v57 = vsel %vm425_vm3, %v767_v55, 0.0  ;;  %v2214_v59 = vpop.f32.mrf.mxu2  ;;  %v2216_v60 = vpop.f32.mrf.mxu3 }
 0x108   : > { %v780_v25 = vadd.f32 %v779_v57, %v778_v48  ;;  %v639_v1 = vpop.f32.mrf.mxu0  ;;  %v718_v2 = vpop.f32.mrf.mxu1  ;;  %v454_v57 = vadd.f32 %v453_v61, %v452_v37 }
 0x109   : > { %v640_v3 = vadd.f32 %v639_v1, %v2148_v39 }
 0x10b   : > { %v729_v4 = vadd.f32 %v718_v2, %v640_v3 }
 0x10d   : > { %1639 = vst.msk [vmem:[%s1922_s19 + $0x70] sm:$0xff] %vm425_vm3, %v729_v4  ;;  %v751_v23 = vsel %vm425_vm3, %v729_v4, 0.0  ;;  %v768_v5 = vmul.f32 %v729_v4, %v729_v4 }
 0x10e   : > { %v752_v7 = vadd.f32 %v751_v23, %v750_v56  ;;  %v936_v23 = vadd.f32 %v2189_v24, %v2187_v22 }
 0x10f   : > { %v781_v8 = vsel %vm425_vm3, %v768_v5, 0.0  ;;  %v2224_v9 = vpop.f32.mrf.mxu2  ;;  %v2226_v10 = vpop.f32.mrf.mxu3 }
 0x110   : > { %v782_v14 = vadd.f32 %v781_v8, %v780_v25  ;;  %v641_v39 = vpop.f32.mrf.mxu0  ;;  %v720_v15 = vpop.f32.mrf.mxu1 }
 0x111   : > { %v642_v16 = vadd.f32 %v641_v39, %v2154_v51 }
 0x113   : > { %v730_v18 = vadd.f32 %v720_v15, %v642_v16  ;;  %v938_v15 = vadd.f32 %v2198_v36, %v2196_v35 }
 0x115   : > { %1640 = vst.msk [vmem:[%s1922_s19 + $0x78] sm:$0xff] %vm425_vm3, %v730_v18  ;;  %v753_v20 = vsel %vm425_vm3, %v730_v18, 0.0  ;;  %v769_v21 = vmul.f32 %v730_v18, %v730_v18 }
 0x116   : > { %v754_v27 = vadd.f32 %v753_v20, %v752_v7 }
 0x117   : > { %v783_v29 = vsel %vm425_vm3, %v769_v21, 0.0  ;;  %v2238_v49 = vpop.f32.mrf.mxu2  ;;  %v2240_v51 = vpop.f32.mrf.mxu3  ;;  %v941_v21 = vadd.f32 %v2207_v47, %v2205_v46 }
 0x118   : > { %v755_v30 = vrot.slane %v754_v27, 4  ;;  %v784_v62 = vadd.f32 %v783_v29, %v782_v14  ;;  %v1009_v31 = vpop.f32.mrf.mxu0  ;;  %v1167_v33 = vpop.f32.mrf.mxu1 }
 0x119   : > { %v2242_v34 = vadd.f32 %v1009_v31, %v931_v28 }
 0x11a   : > { %v756_v38 = vadd.f32 %v755_v30, %v754_v27  ;;  %v785_v40 = vrot.slane %v784_v62, 4  ;;  %v943_v30 = vadd.f32 %v2216_v60, %v2214_v59  ;;  %v946_v60 = vadd.f32 %v2226_v10, %v2224_v9 }
 0x11b   : > { %1717 = vst.msk [vmem:[%s1922_s19 + $0x80] sm:$0xff] %vm425_vm3, %v2242_v34  ;;  %v1068_v63 = vmul.f32 %v2242_v34, %v2242_v34  ;;  %v1046_v61 = vsel %vm425_vm3, %v2242_v34, 0.0 }
 0x11c   : > { %v757_v0 = vrot.slane %v756_v38, 2  ;;  %v786_v41 = vadd.f32 %v785_v40, %v784_v62 }
 0x11d   : > { %v1076_v50 = vsel %vm425_vm3, %v1068_v63, 0.0 }
 0x11e   : > { %v758_v42 = vadd.f32 %v757_v0, %v756_v38  ;;  %v787_v43 = vrot.slane %v786_v41, 2 }
 0x11f   : > { %v1236_v45 = vpop.f32.mrf.mxu2  ;;  %v1315_v48 = vpop.f32.mrf.mxu3 }
 0x120   : > { %v759_v52 = vrot.slane %v758_v42, 1  ;;  %v788_v53 = vadd.f32 %v787_v43, %v786_v41  ;;  %v1237_v11 = vadd.f32 %v1236_v45, %v1167_v33  ;;  %v1011_v54 = vpop.f32.mrf.mxu0  ;;  %v1169_v55 = vpop.f32.mrf.mxu1  ;;  %v948_v41 = vadd.f32 %v2240_v51, %v2238_v49 }
 0x121   : > { %v1030_v56 = vadd.f32 %v1011_v54, %v933_v44 }
 0x122   : > { %v760_v25 = vadd.f32 %v759_v52, %v758_v42  ;;  %v789_v1 = vrot.slane %v788_v53, 1  ;;  %v2249_v2 = vadd.f32 %v1315_v48, %v1237_v11 }
 0x123   : > { %1718 = vst.msk [vmem:[%s1922_s19 + $0x88] sm:$0xff] %vm425_vm3, %v1030_v56  ;;  %v1069_v38 = vmul.f32 %v1030_v56, %v1030_v56  ;;  %v1047_v0 = vsel %vm425_vm3, %v1030_v56, 0.0 }
 0x124   : > { %v2253_v13 = vadd.f32 %v760_v25, %v454_v57  ;;  %v790_v3 = vadd.f32 %v789_v1, %v788_v53  ;;  %1801 = vst.msk [vmem:[%s1922_s19 + $0xc0] sm:$0xff] %vm425_vm3, %v2249_v2  ;;  %v1048_v52 = vadd.f32 %v1047_v0, %v1046_v61  ;;  %v1374_v54 = vmul.f32 %v2249_v2, %v2249_v2 }
 0x125   : > { %v1077_v42 = vsel %vm425_vm3, %v1069_v38, 0.0 }
 0x126   : > { %v2258_v4 = vadd.f32 %v790_v3, %v484_v12 }
 0x127   : > { %v1238_v5 = vpop.f32.mrf.mxu2  ;;  %v1317_v6 = vpop.f32.mrf.mxu3 }
 0x128   : > { %v1239_v7 = vadd.f32 %v1238_v5, %v1169_v55  ;;  %v1014_v8 = vpop.f32.mrf.mxu0  ;;  %v1172_v32 = vpop.f32.mrf.mxu1  ;;  %v1078_v55 = vadd.f32 %v1077_v42, %v1076_v50 }
 0x129   : > { %v1031_v14 = vadd.f32 %v1014_v8, %v936_v23  ;;  %v1352_v23 = vsel %vm425_vm3, %v2249_v2, 0.0 }
 0x12a   : > { %v1336_v39 = vadd.f32 %v1317_v6, %v1239_v7 }
 0x12b   : > { %1719 = vst.msk [vmem:[%s1922_s19 + $0x90] sm:$0xff] %vm425_vm3, %v1031_v14  ;;  %v1070_v59 = vmul.f32 %v1031_v14, %v1031_v14  ;;  %v1049_v43 = vsel %vm425_vm3, %v1031_v14, 0.0 }
 0x12c   : > { %1802 = vst.msk [vmem:[%s1922_s19 + $0xc8] sm:$0xff] %vm425_vm3, %v1336_v39  ;;  %v1375_v53 = vmul.f32 %v1336_v39, %v1336_v39  ;;  %v1050_v56 = vadd.f32 %v1049_v43, %v1048_v52  ;;  %v1353_v25 = vsel %vm425_vm3, %v1336_v39, 0.0 }
 0x12d   : > { %v1079_v10 = vsel %vm425_vm3, %v1070_v59, 0.0 }
 0x12e   : > { %v1383_v5 = vsel %vm425_vm3, %v1375_v53, 0.0  ;;  %v1080_v6 = vadd.f32 %v1079_v10, %v1078_v55 }
 0x12f   : > { %v1241_v16 = vpop.f32.mrf.mxu2  ;;  %v1320_v17 = vpop.f32.mrf.mxu3 }
 0x130   : > { %v1242_v22 = vadd.f32 %v1241_v16, %v1172_v32  ;;  %v1016_v24 = vpop.f32.mrf.mxu0  ;;  %v1174_v18 = vpop.f32.mrf.mxu1  ;;  %v1382_v16 = vsel %vm425_vm3, %v1374_v54, 0.0 }
 0x131   : > { %v1032_v19 = vadd.f32 %v1016_v24, %v938_v15  ;;  %v1384_v24 = vadd.f32 %v1383_v5, %v1382_v16 }
 0x132   : > { %v2268_v20 = vadd.f32 %v1320_v17, %v1242_v22  ;;  %v1354_v17 = vadd.f32 %v1353_v25, %v1352_v23 }
 0x133   : > { %1720 = vst.msk [vmem:[%s1922_s19 + $0x98] sm:$0xff] %vm425_vm3, %v1032_v19  ;;  %v1071_v44 = vmul.f32 %v1032_v19, %v1032_v19  ;;  %v1051_v49 = vsel %vm425_vm3, %v1032_v19, 0.0 }
 0x134   : > { %1803 = vst.msk [vmem:[%s1922_s19 + $0xd0] sm:$0xff] %vm425_vm3, %v2268_v20  ;;  %v1052_v7 = vadd.f32 %v1051_v49, %v1050_v56  ;;  %v1376_v8 = vmul.f32 %v2268_v20, %v2268_v20 }
 0x135   : > { %v1081_v1 = vsel %vm425_vm3, %v1071_v44, 0.0 }
 0x136   : > { %v1082_v22 = vadd.f32 %v1081_v1, %v1080_v6 }
 0x137   : > { %v1243_v26 = vpop.f32.mrf.mxu2  ;;  %v1322_v35 = vpop.f32.mrf.mxu3 }
 0x138   : > { %v1244_v36 = vadd.f32 %v1243_v26, %v1174_v18  ;;  %v1019_v27 = vpop.f32.mrf.mxu0  ;;  %v1177_v29 = vpop.f32.mrf.mxu1  ;;  %v1355_v18 = vsel %vm425_vm3, %v2268_v20, 0.0 }
 0x139   : > { %v1033_v28 = vadd.f32 %v1019_v27, %v941_v21  ;;  %v1356_v63 = vadd.f32 %v1355_v18, %v1354_v17 }
 0x13a   : > { %v2277_v58 = vadd.f32 %v1322_v35, %v1244_v36 }
 0x13b   : > { %1721 = vst.msk [vmem:[%s1922_s19 + $0xa0] sm:$0xff] %vm425_vm3, %v1033_v28  ;;  %v1072_v51 = vmul.f32 %v1033_v28, %v1033_v28  ;;  %v1053_v12 = vsel %vm425_vm3, %v1033_v28, 0.0 }
 0x13c   : > { %1804 = vst.msk [vmem:[%s1922_s19 + $0xd8] sm:$0xff] %vm425_vm3, %v2277_v58  ;;  %v1054_v2 = vadd.f32 %v1053_v12, %v1052_v7  ;;  %v1377_v36 = vmul.f32 %v2277_v58, %v2277_v58 }
 0x13d   : > { %v1083_v32 = vsel %vm425_vm3, %v1072_v51, 0.0 }
 0x13e   : > { %v1084_v27 = vadd.f32 %v1083_v32, %v1082_v22  ;;  %v1387_v61 = vsel %vm425_vm3, %v1377_v36, 0.0 }
 0x13f   : > { %v1246_v62 = vpop.f32.mrf.mxu2  ;;  %v1325_v46 = vpop.f32.mrf.mxu3 }
 0x140   : > { %v1247_v47 = vadd.f32 %v1246_v62, %v1177_v29  ;;  %v1021_v31 = vpop.f32.mrf.mxu0  ;;  %v1179_v40 = vpop.f32.mrf.mxu1  ;;  %v1385_v62 = vsel %vm425_vm3, %v1376_v8, 0.0 }
 0x141   : > { %v1034_v33 = vadd.f32 %v1021_v31, %v943_v30  ;;  %v1357_v31 = vsel %vm425_vm3, %v2277_v58, 0.0  ;;  %v1386_v58 = vadd.f32 %v1385_v62, %v1384_v24 }
 0x142   : > { %v2286_v37 = vadd.f32 %v1325_v46, %v1247_v47  ;;  %v1358_v44 = vadd.f32 %v1357_v31, %v1356_v63 }
 0x143   : > { %1722 = vst.msk [vmem:[%s1922_s19 + $0xa8] sm:$0xff] %vm425_vm3, %v1034_v33  ;;  %v1073_v3 = vmul.f32 %v1034_v33, %v1034_v33  ;;  %v1055_v14 = vsel %vm425_vm3, %v1034_v33, 0.0 }
 0x144   : > { %1805 = vst.msk [vmem:[%s1922_s19 + $0xe0] sm:$0xff] %vm425_vm3, %v2286_v37  ;;  %v1056_v28 = vadd.f32 %v1055_v14, %v1054_v2  ;;  %v1378_v20 = vmul.f32 %v2286_v37, %v2286_v37  ;;  %v1359_v42 = vsel %vm425_vm3, %v2286_v37, 0.0 }
 0x145   : > { %v1085_v19 = vsel %vm425_vm3, %v1073_v3, 0.0  ;;  %v1360_v10 = vadd.f32 %v1359_v42, %v1358_v44 }
 0x146   : > { %v1086_v33 = vadd.f32 %v1085_v19, %v1084_v27 }
 0x147   : > { %v1248_v45 = vpop.f32.mrf.mxu2  ;;  %v1327_v48 = vpop.f32.mrf.mxu3 }
 0x148   : > { %v1249_v11 = vadd.f32 %v1248_v45, %v1179_v40  ;;  %v1024_v9 = vpop.f32.mrf.mxu0  ;;  %v1182_v15 = vpop.f32.mrf.mxu1  ;;  %v1389_v45 = vsel %vm425_vm3, %v1378_v20, 0.0 }
 0x149   : > { %v1035_v34 = vadd.f32 %v1024_v9, %v946_v60  ;;  %v1388_v9 = vadd.f32 %v1387_v61, %v1386_v58 }
 0x14a   : > { %v1340_v57 = vadd.f32 %v1327_v48, %v1249_v11 }
 0x14b   : > { %1723 = vst.msk [vmem:[%s1922_s19 + $0xb0] sm:$0xff] %vm425_vm3, %v1035_v34  ;;  %v1074_v39 = vmul.f32 %v1035_v34, %v1035_v34  ;;  %v1057_v21 = vsel %vm425_vm3, %v1035_v34, 0.0  ;;  %v1390_v25 = vadd.f32 %v1389_v45, %v1388_v9 }
 0x14c   : > { %1806 = vst.msk [vmem:[%s1922_s19 + $0xe8] sm:$0xff] %vm425_vm3, %v1340_v57  ;;  %v1058_v38 = vadd.f32 %v1057_v21, %v1056_v28  ;;  %v1379_v0 = vmul.f32 %v1340_v57, %v1340_v57  ;;  %v1361_v50 = vsel %vm425_vm3, %v1340_v57, 0.0 }
 0x14d   : > { %v1087_v46 = vsel %vm425_vm3, %v1074_v39, 0.0  ;;  %v1362_v1 = vadd.f32 %v1361_v50, %v1360_v10 }
 0x14e   : > { %v1088_v43 = vadd.f32 %v1087_v46, %v1086_v33  ;;  %v1391_v49 = vsel %vm425_vm3, %v1379_v0, 0.0  ;;  %v1404_v33 = vld [vmem:[%s2374_s3] sm:$0x1]  ;;  %v1408_v0 = vld [vmem:[%s2374_s3 + $0x1] sm:$0x1] }
 0x14f   : > { %v1251_v26 = vpop.f32.mrf.mxu2  ;;  %v1330_v35 = vpop.f32.mrf.mxu3  ;;  %v1392_v6 = vadd.f32 %v1391_v49, %v1390_v25 }
 0x150   : > { %v1252_v29 = vadd.f32 %v1251_v26, %v1182_v15  ;;  %v1026_v30 = vpop.f32.mrf.mxu0  ;;  %v1184_v37 = vpop.f32.mrf.mxu1 }
 0x151   : > { %v1036_v47 = vadd.f32 %v1026_v30, %v948_v41 }
 0x152   : > { %v1341_v40 = vadd.f32 %v1330_v35, %v1252_v29 }
 0x153   : > { %1724 = vst.msk [vmem:[%s1922_s19 + $0xb8] sm:$0xff] %vm425_vm3, %v1036_v47  ;;  %v1059_v59 = vsel %vm425_vm3, %v1036_v47, 0.0  ;;  %v1075_v60 = vmul.f32 %v1036_v47, %v1036_v47 }
 0x154   : > { %1807 = vst.msk [vmem:[%s1922_s19 + $0xf0] sm:$0xff] %vm425_vm3, %v1341_v40  ;;  %v1060_v41 = vadd.f32 %v1059_v59, %v1058_v38  ;;  %v1380_v52 = vmul.f32 %v1341_v40, %v1341_v40  ;;  %v1363_v34 = vsel %vm425_vm3, %v1341_v40, 0.0 }
 0x155   : > { %v1089_v48 = vsel %vm425_vm3, %v1075_v60, 0.0  ;;  %v1364_v7 = vadd.f32 %v1363_v34, %v1362_v1 }
 0x156   : > { %v1061_v53 = vrot.slane %v1060_v41, 4  ;;  %v1090_v11 = vadd.f32 %v1089_v48, %v1088_v43  ;;  %v1393_v57 = vsel %vm425_vm3, %v1380_v52, 0.0 }
 0x157   : > { %v1253_v51 = vpop.f32.mrf.mxu2  ;;  %v1332_v12 = vpop.f32.mrf.mxu3  ;;  %v1394_v39 = vadd.f32 %v1393_v57, %v1392_v6 }
 0x158   : > { %v1062_v54 = vadd.f32 %v1061_v53, %v1060_v41  ;;  %v1091_v55 = vrot.slane %v1090_v11, 4  ;;  %v1254_v56 = vadd.f32 %v1253_v51, %v1184_v37 }
 0x15a   : > { %v1063_v3 = vrot.slane %v1062_v54, 2  ;;  %v1092_v23 = vadd.f32 %v1091_v55, %v1090_v11  ;;  %v1342_v5 = vadd.f32 %v1332_v12, %v1254_v56 }
 0x15c   : > { %v1093_v8 = vrot.slane %v1092_v23, 2  ;;  %1808 = vst.msk [vmem:[%s1922_s19 + $0xf8] sm:$0xff] %vm425_vm3, %v1342_v5  ;;  %v1365_v32 = vsel %vm425_vm3, %v1342_v5, 0.0  ;;  %v1381_v14 = vmul.f32 %v1342_v5, %v1342_v5  ;;  %v1064_v15 = vadd.f32 %v1063_v3, %v1062_v54 }
 0x15d   : > { %v1366_v16 = vadd.f32 %v1365_v32, %v1364_v7 }
 0x15e   : > { %v1395_v17 = vsel %vm425_vm3, %v1381_v14, 0.0  ;;  %v1094_v22 = vadd.f32 %v1093_v8, %v1092_v23  ;;  %v1065_v18 = vrot.slane %v1064_v15, 1 }
 0x15f   : > { %v1367_v2 = vrot.slane %v1366_v16, 4  ;;  %v1396_v24 = vadd.f32 %v1395_v17, %v1394_v39 }
 0x160   : > { %v1095_v26 = vrot.slane %v1094_v22, 1  ;;  %v1066_v27 = vadd.f32 %v1065_v18, %v1064_v15 }
 0x161   : > { %v1368_v19 = vadd.f32 %v1367_v2, %v1366_v16  ;;  %v1397_v21 = vrot.slane %v1396_v24, 4 }
 0x162   : > { %v1096_v30 = vadd.f32 %v1095_v26, %v1094_v22  ;;  %v1067_v46 = vadd.f32 %v1066_v27, %v2253_v13 }
 0x163   : > { %v1369_v35 = vrot.slane %v1368_v19, 2  ;;  %v1398_v36 = vadd.f32 %v1397_v21, %v1396_v24 }
 0x164   : > { %v1097_v38 = vadd.f32 %v1096_v30, %v2258_v4 }
 0x165   : > { %v1370_v28 = vadd.f32 %v1369_v35, %v1368_v19  ;;  %v1399_v29 = vrot.slane %v1398_v36, 2 }
 0x167   : > { %v1371_v62 = vrot.slane %v1370_v28, 1  ;;  %v1400_v20 = vadd.f32 %v1399_v29, %v1398_v36 }
 0x169   : > { %v1372_v47 = vadd.f32 %v1371_v62, %v1370_v28  ;;  %v1401_v31 = vrot.slane %v1400_v20, 1 }
 0x16b   : > { %v1373_v40 = vadd.f32 %v1372_v47, %v1067_v46  ;;  %v1402_v63 = vadd.f32 %v1401_v31, %v1400_v20 }
 0x16d   : > { %v1403_v59 = vadd.f32 %v1402_v63, %v1097_v38  ;;  %v1405_v60 = vadd.f32 %v1404_v33, %v1373_v40 }
 0x16f   : > { %1407 = vst.msk [vmem:[%s2374_s3] sm:$0x1] %vm1406_vm4, %v1405_v60  ;;  %v1409_v13 = vadd.f32 %v1408_v0, %v1403_v59 }
 0x171   : > { %1410 = vst.msk [vmem:[%s2374_s3 + $0x1] sm:$0x1] %vm1406_vm4, %v1409_v13 }
 0x172 PF: > { %s14_s12 = sadd.s32 1, %s1888_s12  }
 0x173   : > { %p11_p5 = scmp.ge.s32.totalorder %s14_s12, 6  }
 0x175   :  { %13 = sbr.rel (!%p11_p5) target bundleno = 1 (0x1), region = 75 }

// kernel: tile.44
= control target key start
LH: loop header
LB: loop body
LE: loop exit
PB: predicated region body
PF: predicated region fallthrough
CT: control target
= control target key end

     0   :  { %s37_s8 = smov 32   ;;  %s38_s9 = smov 64   ;;  %vm7_vm0 = vcmask 261120   ;;  %vm13_vm1 = vcmask 1048320   ;;  %vm19_vm2 = vcmask 785920   ;;  %vm25_vm3 = vcmask 523520   ;;  %s55_s0 = inlined_call_operand.vmem [shape: f32[4,32], index: 0, kind: input, shape index: {}]   ;;  %s56_s1 = inlined_call_operand.vmem [shape: f32[1,128], index: 1, kind: output, shape index: {}]  }
   0x1   :  { %v4_v0 = vld [vmem:[%s55_s0] sm:$0xf]  ;;  %s36_s0 = smov 96  }
   0x2   :  { %5 = vst [vmem:[#allocation1] sm:$0xf] %v4_v0 }
   0x9   :  { %v10_v1 = vld [vmem:[#allocation1 + $0x3] sm:$0x1]   ;;  %v22_v2 = vld [vmem:[#allocation1 + $0x1] sm:$0x1]   ;;  %v16_v3 = vld [vmem:[#allocation1 + $0x2] sm:$0x1]  }
   0xa   :  { %11 = vrot.lane.b32.xlu0 %v10_v1, %s36_s0  ;;  %23 = vrot.lane.b32.xlu1 %v22_v2, %s37_s8  ;;  %v6_v4 = vld [vmem:[#allocation1] sm:$0x1]  }
   0xb   :  { %8 = vst.msk [vmem:[#allocation0] sm:$0x1] %vm7_vm0, %v6_v4  }
  0x12   :  { %17 = vrot.lane.b32.xlu0 %v16_v3, %s38_s9 }
  0x7c   :  { %v12_v5 = vpop.permute.xlu0 %11   ;;  %v24_v6 = vpop.permute.xlu1 %23  }
  0x7d   :  { %14 = vst.msk [vmem:[#allocation0] sm:$0x1] %vm13_vm1, %v12_v5  }
  0x84   :  { %v18_v7 = vpop.permute.xlu0 %17  }
  0x85   :  { %20 = vst.msk [vmem:[#allocation0] sm:$0x1] %vm19_vm2, %v18_v7  }
  0x86   :  { %26 = vst.msk [vmem:[#allocation0] sm:$0x1] %vm25_vm3, %v24_v6  }
  0x8d   :  { %v29_v8 = vld [vmem:[#allocation0] sm:$0x1] }
  0x8e   :  { %32 = vst [vmem:[%s56_s1] sm:$0x1] %v29_v8 }

// kernel: encoder_forward.9
= control target key start
LH: loop header
LB: loop body
LE: loop exit
PB: predicated region body
PF: predicated region fallthrough
CT: control target
= control target key end

     0   :  { %s306_s12 = smov 0   ;;  %s329_s0 = inlined_call_operand.vmem [shape: f32[4,4,4,128], index: 0, kind: input, shape index: {}]   ;;  %s330_s1 = inlined_call_operand.vmem [shape: f32[1,128], index: 1, kind: input, shape index: {}]   ;;  %s331_s2 = inlined_call_operand.vmem [shape: f32[1,128], index: 2, kind: input, shape index: {}]   ;;  %s332_s3 = inlined_call_operand.vmem [shape: f32[4,4,128], index: 3, kind: output, shape index: {}]  }
   0x1 LB: > { %s254_s13 = sadd.s32 4294967295, %s284_s12   ;;  %p258_p0 = scmp.ge.s32.totalorder %s284_s12, 1  ;;  %s284_s12 = sphi %s306_s12, %s13_s12  }
   0x2   : > { %p137_p1 = scmp.lt.s32.totalorder %s284_s12, 5 }
   0x4   : > { %p138_p2 = pnand %p258_p0, %p137_p1 }
   0x5   : > { %p160_p3 = scmp.lt.s32.totalorder (!%p138_p2), %s254_s13, 3 }
   0x6   : > { %141 = sbr.rel (%p138_p2) target bundleno = 30 (0x1e), region = 32 }
   0xb   : > { %s334_s13 = smov (!%p160_p3, %s254_s13), 3  ;;  %v276_v0 = vld [vmem:[%s330_s1] ss:$0 sm:$0xff] }
   0xc   : > { %s267_s16 = sshll.u32 %s334_s13, 4  ;;  %v277_v1 = vld [vmem:[%s331_s2] ss:$0 sm:$0xff]  ;;  %s261_s22 = sshll.u32 %s334_s13, 2 }
   0xd   : > { %s164_s19 = scalar_lea.vmem %s329_s0, %s267_s16  ;;  %s168_s25 = scalar_lea.vmem %s332_s3, %s261_s22 }
   0xe   : > { %v171_v2 = vld [vmem:[%s164_s19] sm:$0xf]  ;;  %v262_v3 = vld [vmem:[%s164_s19 + $0x4] sm:$0xf]  ;;  %v263_v4 = vld [vmem:[%s164_s19 + $0x8] sm:$0xf] }
   0xf   : > { %v175_v5 = vmul.f32 %v276_v0, %v171_v2  ;;  %v183_v6 = vmul.f32 %v276_v0, %v262_v3  ;;  %v189_v7 = vmul.f32 %v276_v0, %v263_v4  ;;  %v264_v8 = vld [vmem:[%s164_s19 + $0xc] sm:$0xf] }
  0x10   : > { %v195_v9 = vmul.f32 %v276_v0, %v264_v8 }
  0x11   : > { %v179_v10 = vadd.f32 %v277_v1, %v175_v5  ;;  %v184_v11 = vadd.f32 %v277_v1, %v183_v6  ;;  %v190_v12 = vadd.f32 %v277_v1, %v189_v7 }
  0x12   : > { %v196_v13 = vadd.f32 %v277_v1, %v195_v9 }
  0x13   : > { %v180_v14 = vmax.f32 %v179_v10, 0.0  ;;  %v185_v15 = vmax.f32 %v184_v11, 0.0  ;;  %v191_v16 = vmax.f32 %v190_v12, 0.0 }
  0x14   : > { %v197_v18 = vmax.f32 %v196_v13, 0.0 }
  0x15   : > { %v186_v17 = vadd.f32 %v185_v15, %v180_v14 }
  0x17   : > { %v192_v19 = vadd.f32 %v191_v16, %v186_v17 }
  0x19   : > { %v198_v20 = vadd.f32 %v197_v18, %v192_v19 }
  0x1b   : > { %v199_v21 = vmul.f32 0.25, %v198_v20 }
  0x1d   : > { %200 = vst [vmem:[%s168_s25] sm:$0xf] %v199_v21 }
  0x1e PF: > { %s13_s12 = sadd.s32 1, %s284_s12  }
  0x1f   : > { %p10_p4 = scmp.ge.s32.totalorder %s13_s12, 6  }
  0x21   :  { %12 = sbr.rel (!%p10_p4) target bundleno = 1 (0x1), region = 65 }

// kernel: tile.53
= control target key start
LH: loop header
LB: loop body
LE: loop exit
PB: predicated region body
PF: predicated region fallthrough
CT: control target
= control target key end

     0   :  { %s22_s0 = inlined_call_operand.vmem [shape: f32[32], index: 0, kind: input, shape index: {}]   ;;  %s23_s1 = inlined_call_operand.vmem [shape: f32[2,32], index: 1, kind: output, shape index: {}]  }
   0x1   :  { %v4_v0 = vld [vmem:[%s22_s0] ss:$0 sm:$0xff] }
   0x2   :  { %5 = vst [vmem:[%s23_s1] sm:$0x3] %v4_v0 }

// kernel: tile.54
= control target key start
LH: loop header
LB: loop body
LE: loop exit
PB: predicated region body
PF: predicated region fallthrough
CT: control target
= control target key end

     0   :  { %vm7_vm0 = vcmask 261120   ;;  %vm13_vm1 = vcmask 523520   ;;  %s39_s0 = inlined_call_operand.vmem [shape: f32[2,32], index: 0, kind: input, shape index: {}]   ;;  %s40_s1 = inlined_call_operand.vmem [shape: f32[1,64], index: 1, kind: output, shape index: {}]  }
   0x1   :  { %v4_v0 = vld [vmem:[%s39_s0] sm:$0x3]  ;;  %s22_s0 = smov 32  }
   0x2   :  { %5 = vst [vmem:[#allocation1] sm:$0x3] %v4_v0 }
   0x9   :  { %v10_v1 = vld [vmem:[#allocation1 + $0x1] sm:$0x1]   ;;  %v6_v2 = vld [vmem:[#allocation1] sm:$0x1]  }
   0xa   :  { %11 = vrot.lane.b32.xlu0 %v10_v1, %s22_s0  ;;  %8 = vst.msk [vmem:[#allocation0] sm:$0x1] %vm7_vm0, %v6_v2  }
  0x7c   :  { %v12_v3 = vpop.permute.xlu0 %11  }
  0x7d   :  { %14 = vst.msk [vmem:[#allocation0] sm:$0x1] %vm13_vm1, %v12_v3  }
  0x84   :  { %v17_v4 = vld [vmem:[#allocation0] sm:$0x1] }
  0x85   :  { %20 = vst [vmem:[%s40_s1] sm:$0x1] %v17_v4 }

// kernel: encoder_forward.8
= control target key start
LH: loop header
LB: loop body
LE: loop exit
PB: predicated region body
PF: predicated region fallthrough
CT: control target
= control target key end

     0   :  { %s1315_s12 = smov 0   ;;  %s1536_s0 = inlined_call_operand.vmem [shape: bf16[4,80,48], index: 0, kind: input, shape index: {}]   ;;  %s1537_s1 = inlined_call_operand.vmem [shape: bf16[3,48,32], index: 1, kind: input, shape index: {}]   ;;  %s1538_s2 = inlined_call_operand.vmem [shape: f32[4,4,16,32], index: 2, kind: output, shape index: {0}]   ;;  %s1539_s3 = inlined_call_operand.vmem [shape: f32[2,32], index: 3, kind: output, shape index: {1}]  }
   0x1 LB: > { %s968_s13 = sadd.s32 4294967295, %s1292_s12   ;;  %p972_p0 = scmp.ge.s32.totalorder %s1292_s12, 1  ;;  %s1292_s12 = sphi %s1315_s12, %s14_s12  }
   0x2   : > { %p135_p1 = scmp.lt.s32.totalorder %s1292_s12, 5 }
   0x4   : > { %p136_p2 = pnand %p972_p0, %p135_p1 }
   0x5   : > { %p159_p3 = scmp.lt.s32.totalorder (!%p136_p2), %s968_s13, 3  ;;  %p976_p4 = scmp.ne.s32.totalorder (!%p136_p2), %s968_s13, 0 }
   0x6   : > { %139 = sbr.rel (%p136_p2) target bundleno = 230 (0xe6), region = 28 }
   0xb   : > { %s160_s14 = scalar_select %p159_p3, %s968_s13, 3 }
   0xc   : > { %173 = sbr.rel (%p976_p4) target bundleno = 19 (0x13), region = 32 }
   0xd   : > { %s1266_s15 = smul.u32 40, %s160_s14  ;;  %s1221_s16 = sshll.u32 %s160_s14, 6 }
   0xe   : > { %s1326_s19 = scalar_lea.vmem %s1538_s2, %s1221_s16 }
   0xf   : > { %s1331_s22 = scalar_lea.vmem %s1536_s0, %s1266_s15 }
  0x11   : > { %vm174_vm0 = vcmask 254976   ;;  %v1294_v0 = vmov 0.0  }
  0x12   : > { %175 = vst.msk [vmem:[%s1539_s3] sm:$0x3] %vm174_vm0, %v1294_v0 }
  0x13 PF: > { %v1229_v1 = vld [vmem:[%s1537_s1 + $0x28] sm:$0xff]  ;;  %v1225_v2 = vld [vmem:[%s1537_s1 + $0x10] sm:$0xff]  ;;  %v1233_v3 = vld [vmem:[%s1537_s1 + $0x40] sm:$0xff]  ;;  %vm292_vm1 = vcmask 1045504   ;;  %vm216_vm2 = vcmask 392192   ;;  %vm333_vm3 = vcmask 261120  }
  0x14   : > { %v1240_v4 = vld [vmem:[%s1537_s1 + $0x28] sm:$0xff]  ;;  %225 = vmatpush.bf16.msra.mxu0 %v1229_v1  ;;  %265 = vmatpush.bf16.msra.mxu1 %v1225_v2  ;;  %v1228_v5 = vld [vmem:[%s1537_s1 + $0x20] sm:$0xff]  ;;  %v1232_v7 = vld [vmem:[%s1537_s1 + $0x38] sm:$0xff]  ;;  %vm902_vm4 = vcmask 253952  }
  0x15   : > { %v1224_v6 = vld [vmem:[%s1537_s1 + $0x8] sm:$0xff]  ;;  %322 = vmatpush.bf16.msra.mxu2 %v1233_v3  ;;  %413 = vmatpush.bf16.msra.mxu3 %v1240_v4  ;;  %v1239_v8 = vld [vmem:[%s1537_s1 + $0x20] sm:$0xff]  ;;  %v1227_v9 = vld [vmem:[%s1537_s1 + $0x18] sm:$0xff] }
  0x16   : > { %v1025_v10 = vld [vmem:[%s1331_s22] sm:$0xc]  ;;  %v1230_v11 = vld [vmem:[%s1331_s22] sm:$0xf0]  ;;  %v276_v12 = vld [vmem:[%s1331_s22 + $0x8] sm:$0x3] }
  0x17   : > { %v1048_v13 = vld [vmem:[%s1331_s22 + $0x1c] sm:$0xc]  ;;  %v1223_v14 = vld [vmem:[%s1537_s1] sm:$0xff]  ;;  %v289_v15 = vunpack.c.l.b16 %v276_v12  ;;  %v1026_v16 = vor.u32 %v1230_v11, %v1025_v10  ;;  %v1231_v19 = vld [vmem:[%s1537_s1 + $0x30] sm:$0xff] }
  0x18   : > { %226 = vmatpush.bf16.msra.mxu0 %v1228_v5  ;;  %266 = vmatpush.bf16.msra.mxu1 %v1224_v6  ;;  %v1237_v17 = vld [vmem:[%s1331_s22 + $0x1c] sm:$0xf0]  ;;  %v369_v18 = vld [vmem:[%s1331_s22 + $0x24] sm:$0x3]  ;;  %v1238_v20 = vld [vmem:[%s1537_s1 + $0x18] sm:$0xff] }
  0x19   : > { %323 = vmatpush.bf16.msra.mxu2 %v1232_v7  ;;  %414 = vmatpush.bf16.msra.mxu3 %v1239_v8  ;;  %v381_v21 = vunpack.c.l.b16 %v369_v18  ;;  %v1049_v22 = vor.u32 %v1237_v17, %v1048_v13  ;;  %v291_v23 = vpack.c.b16 %v289_v15, %v289_v15  ;;  %v293_v24 = vrot.slane %v1026_v16, 2  ;;  %v1251_v25 = vld [vmem:[%s1537_s1 + $0x28] sm:$0xff]  ;;  %v1247_v26 = vld [vmem:[%s1537_s1 + $0x10] sm:$0xff]  ;;  %v1222_v28 = vld [vmem:[%s1331_s22] sm:$0xff] }
  0x1a   : > { %v1226_v27 = vld [vmem:[%s1331_s22 + $0x14] sm:$0xff]  ;;  %v1243_v33 = vld [vmem:[%s1537_s1 + $0x40] sm:$0xff]  ;;  %v1282_v35 = vld [vmem:[%s1331_s22 + $0x8] sm:$0xc] }
  0x1b   : > { %v383_v29 = vpack.c.b16 %v381_v21, %v381_v21  ;;  %v384_v30 = vrot.slane %v1049_v22, 2  ;;  %v294_v31 = vrot.slane %v291_v23, 2  ;;  %v1236_v32 = vld [vmem:[%s1537_s1 + $0x10] sm:$0xff]  ;;  %v1288_v37 = vld [vmem:[%s1331_s22 + $0x8] sm:$0xf0]   ;;  %v1250_v40 = vld [vmem:[%s1537_s1 + $0x20] sm:$0xff] }
  0x1c   : > { %227 = vmatpush.bf16.msra.mxu0 %v1227_v9  ;;  %267 = vmatpush.bf16.msra.mxu1 %v1223_v14  ;;  %v1394_v36 = vld [vmem:[%s1331_s22 + $0xc] sm:$0xff]   ;;  %v550_v42 = vld [vmem:[%s1331_s22 + $0x8] sm:$0x3]  ;;  %v1242_v46 = vld [vmem:[%s1537_s1 + $0x38] sm:$0xff]  ;;  %v1283_v54 = vor.u32 %v1288_v37, %v1282_v35 }
  0x1d   : > { %324 = vmatpush.bf16.msra.mxu2 %v1231_v19  ;;  %415 = vmatpush.bf16.msra.mxu3 %v1238_v20  ;;  %v385_v34 = vrot.slane %v383_v29, 2  ;;  %v360_v38 = vld [vmem:[%s1331_s22 + $0x10] sm:$0x3]  ;;  %v295_v39 = vsel %vm292_vm1, %v293_v24, %v294_v31  ;;  %v1246_v41 = vld [vmem:[%s1537_s1 + $0x8] sm:$0xff]  ;;  %v1249_v47 = vld [vmem:[%s1537_s1 + $0x18] sm:$0xff]  ;;  %v562_v48 = vunpack.c.l.b16 %v550_v42 }
  0x1e   : > { %v427_v44 = vunpack.c.l.b16 %v360_v38  ;;  %v1235_v45 = vld [vmem:[%s1537_s1 + $0x8] sm:$0xff]  ;;  %v1245_v49 = vld [vmem:[%s1537_s1] sm:$0xff]  ;;  %v1258_v52 = vld [vmem:[%s1537_s1 + $0x10] sm:$0xff]  ;;  %v430_v0 = vrot.slane %v1283_v54, 2 }
  0x1f   : > { %999 = vmatmul.msk.bf16.vlgmr.msra.gmra.mxu0 %vm216_vm2, %v1226_v27  ;;  %1016 = vmatmul.msk.bf16.vlgmr.msra.gmra.mxu1 %vm216_vm2, %v1222_v28  ;;  %v386_v43 = vsel %vm292_vm1, %v384_v30, %v385_v34  ;;  %v1105_v50 = vld [vmem:[%s1331_s22] sm:$0xc]  ;;  %v1248_v51 = vld [vmem:[%s1331_s22] sm:$0xf0]  ;;  %v1241_v57 = vld [vmem:[%s1537_s1 + $0x30] sm:$0xff]  ;;  %v564_v59 = vpack.c.b16 %v562_v48, %v562_v48 }
  0x20   : > { %1039 = vmatmul.msk.bf16.vlgmr.msra.gmra.mxu2 %vm216_vm2, %v295_v39  ;;  %1062 = vmatmul.msk.bf16.vlgmr.msra.gmra.mxu3 %vm216_vm2, %v386_v43  ;;  %v1265_v53 = vld [vmem:[%s1537_s1 + $0x40] sm:$0xff]  ;;  %v429_v55 = vpack.c.b16 %v427_v44, %v427_v44  ;;  %v1106_v58 = vor.u32 %v1248_v51, %v1105_v50  ;;  %v1262_v61 = vld [vmem:[%s1537_s1 + $0x28] sm:$0xff]  ;;  %v1264_v63 = vld [vmem:[%s1537_s1 + $0x38] sm:$0xff] }
  0x21   : > { %594 = vmatpush.bf16.msrb.mxu2 %v1251_v25  ;;  %634 = vmatpush.bf16.msrb.mxu3 %v1247_v26  ;;  %v1234_v56 = vld [vmem:[%s1537_s1] sm:$0xff]  ;;  %v1257_v62 = vld [vmem:[%s1537_s1 + $0x8] sm:$0xff]  ;;  %v566_v3 = vrot.slane %v564_v59, 2  ;;  %v1254_v4 = vld [vmem:[%s1537_s1 + $0x38] sm:$0xff] }
  0x22   : > { %459 = vmatpush.bf16.msrb.mxu0 %v1236_v32  ;;  %504 = vmatpush.bf16.msrb.mxu1 %v1243_v33  ;;  %v1255_v60 = vld [vmem:[%s1537_s1 + $0x40] sm:$0xff]  ;;  %v431_v1 = vrot.slane %v429_v55, 2  ;;  %v565_v2 = vrot.slane %v1106_v58, 2  ;;  %v1244_v7 = vld [vmem:[%s1331_s22 + $0x14] sm:$0xff]  ;;  %v645_v13 = vld [vmem:[%s1331_s22 + $0x1c] sm:$0x3] }
  0x23   : > { %v1261_v5 = vld [vmem:[%s1537_s1 + $0x20] sm:$0xff]  ;;  %v1253_v9 = vld [vmem:[%s1537_s1 + $0x30] sm:$0xff]  ;;  %v1260_v11 = vld [vmem:[%s1537_s1 + $0x18] sm:$0xff]  ;;  %v657_v18 = vunpack.c.l.b16 %v645_v13 }
  0x24   : > { %v432_v6 = vsel %vm292_vm1, %v430_v0, %v431_v1  ;;  %v1256_v8 = vld [vmem:[%s1537_s1] sm:$0xff]  ;;  %v567_v10 = vsel %vm292_vm1, %v565_v2, %v566_v3  ;;  %v1263_v12 = vld [vmem:[%s1537_s1 + $0x30] sm:$0xff]  ;;  %v1286_v14 = vld [vmem:[%s1331_s22 + $0x1c] sm:$0xc] }
  0x25   : > { %595 = vmatpush.bf16.msrb.mxu2 %v1250_v40  ;;  %635 = vmatpush.bf16.msrb.mxu3 %v1246_v41  ;;  %v726_v15 = vld [vmem:[%s1331_s22 + $0x20] sm:$0xff]   ;;  %v1145_v19 = vld [vmem:[%s1331_s22 + $0x14] sm:$0xc]  ;;  %v1252_v20 = vld [vmem:[%s1331_s22 + $0x14] sm:$0xf0]  ;;  %v659_v23 = vpack.c.b16 %v657_v18, %v657_v18 }
  0x26   : > { %460 = vmatpush.bf16.msrb.mxu0 %v1235_v45  ;;  %505 = vmatpush.bf16.msrb.mxu1 %v1242_v46  ;;  %v1289_v16 = vld [vmem:[%s1331_s22 + $0x1c] sm:$0xf0]   ;;  %v727_v17 = vld [vmem:[%s1331_s22 + $0x24] sm:$0x3]  ;;  %v1146_v22 = vor.u32 %v1252_v20, %v1145_v19  ;;  %v1259_v30 = vld [vmem:[%s1331_s22 + $0xc] sm:$0xff] }
  0x27   : > { %v787_v21 = vunpack.c.l.b16 %v727_v17  ;;  %v1287_v24 = vor.u32 %v1289_v16, %v1286_v14  ;;  %v661_v27 = vrot.slane %v659_v23, 2 }
  0x28   : > { %v660_v26 = vrot.slane %v1146_v22, 2 }
  0x29   : > { %596 = vmatpush.bf16.msrb.mxu2 %v1249_v47  ;;  %636 = vmatpush.bf16.msrb.mxu3 %v1245_v49  ;;  %v789_v25 = vpack.c.b16 %v787_v21, %v787_v21  ;;  %v790_v28 = vrot.slane %v1287_v24, 2 }
  0x2a   : > { %461 = vmatpush.bf16.msrb.mxu0 %v1234_v56  ;;  %506 = vmatpush.bf16.msrb.mxu1 %v1241_v57  ;;  %v662_v31 = vsel %vm292_vm1, %v660_v26, %v661_v27 }
  0x2b   : > { %v791_v29 = vrot.slane %v789_v25, 2 }
  0x2d   : > { %819 = vmatpush.bf16.msra.mxu2 %v1258_v52  ;;  %864 = vmatpush.bf16.msra.mxu3 %v1265_v53  ;;  %v792_v32 = vsel %vm292_vm1, %v790_v28, %v791_v29 }
  0x2e   : > { %689 = vmatpush.bf16.msra.mxu0 %v1255_v60  ;;  %773 = vmatpush.bf16.msra.mxu1 %v1262_v61 }
  0x2f   : > { %1075 = vmatmul.msk.bf16.vlgmr.msrb.gmra.mxu0 %vm216_vm2, %v432_v6  ;;  %1094 = vmatmul.msk.bf16.vlgmr.msrb.gmra.mxu1 %vm216_vm2, %v1394_v36 }
  0x30   : > { %1119 = vmatmul.msk.bf16.vlgmr.msrb.gmra.mxu2 %vm216_vm2, %v567_v10  ;;  %1136 = vmatmul.msk.bf16.vlgmr.msrb.gmra.mxu3 %vm216_vm2, %v1244_v7 }
  0x31   : > { %820 = vmatpush.bf16.msra.mxu2 %v1257_v62  ;;  %865 = vmatpush.bf16.msra.mxu3 %v1264_v63 }
  0x32   : > { %690 = vmatpush.bf16.msra.mxu0 %v1254_v4  ;;  %774 = vmatpush.bf16.msra.mxu1 %v1261_v5 }
  0x35   : > { %821 = vmatpush.bf16.msra.mxu2 %v1256_v8  ;;  %866 = vmatpush.bf16.msra.mxu3 %v1263_v12 }
  0x36   : > { %691 = vmatpush.bf16.msra.mxu0 %v1253_v9  ;;  %775 = vmatpush.bf16.msra.mxu1 %v1260_v11 }
  0x3f   : > { %1159 = vmatmul.msk.bf16.vlgmr.msra.gmra.mxu0 %vm216_vm2, %v662_v31  ;;  %1184 = vmatmul.msk.bf16.vlgmr.msra.gmra.mxu1 %vm216_vm2, %v1259_v30 }
  0x40   : > { %1197 = vmatmul.msk.bf16.vlgmr.msra.gmra.mxu2 %vm216_vm2, %v792_v32  ;;  %1216 = vmatmul.msk.bf16.vlgmr.msra.gmra.mxu3 %vm216_vm2, %v726_v15 }
  0x9c   : > { %v229_v33 = vpop.f32.mrf.mxu0  ;;  %v269_v34 = vpop.f32.mrf.mxu1 }
  0x9d   : > { %v270_v35 = vadd.f32 %v269_v34, %v229_v33 }
  0xa3   : > { %v326_v36 = vpop.f32.mrf.mxu2  ;;  %v417_v37 = vpop.f32.mrf.mxu3 }
  0xa4   : > { %v331_v38 = vadd.f32 %v326_v36, %v270_v35  ;;  %v231_v39 = vpop.f32.mrf.mxu0  ;;  %v271_v40 = vpop.f32.mrf.mxu1 }
  0xa5   : > { %v272_v41 = vadd.f32 %v271_v40, %v231_v39 }
  0xa6   : > { %334 = vst.msk [vmem:[%s1326_s19] sm:$0xff] %vm333_vm3, %v331_v38  ;;  %v346_v0 = vmul.f32 %v331_v38, %v331_v38  ;;  %v336_v2 = vsel %vm333_vm3, %v331_v38, 0.0 }
  0xa8   : > { %v348_v9 = vsel %vm333_vm3, %v346_v0, 0.0 }
  0xab   : > { %v328_v42 = vpop.f32.mrf.mxu2  ;;  %v419_v43 = vpop.f32.mrf.mxu3 }
  0xac   : > { %v332_v44 = vadd.f32 %v328_v42, %v272_v41  ;;  %v463_v45 = vpop.f32.mrf.mxu0  ;;  %v508_v46 = vpop.f32.mrf.mxu1 }
  0xad   : > { %v464_v47 = vadd.f32 %v463_v45, %v417_v37 }
  0xae   : > { %335 = vst.msk [vmem:[%s1326_s19 + $0x8] sm:$0xff] %vm333_vm3, %v332_v44  ;;  %v347_v56 = vmul.f32 %v332_v44, %v332_v44  ;;  %v337_v60 = vsel %vm333_vm3, %v332_v44, 0.0 }
  0xaf   : > { %v513_v48 = vadd.f32 %v508_v46, %v464_v47  ;;  %v338_v5 = vadd.f32 %v337_v60, %v336_v2 }
  0xb0   : > { %v349_v6 = vsel %vm333_vm3, %v347_v56, 0.0 }
  0xb1   : > { %1095 = vst.msk [vmem:[%s1326_s19 + $0x10] sm:$0xff] %vm333_vm3, %v513_v48  ;;  %v528_v61 = vmul.f32 %v513_v48, %v513_v48  ;;  %v518_v3 = vsel %vm333_vm3, %v513_v48, 0.0  ;;  %v350_v12 = vadd.f32 %v349_v6, %v348_v9  ;;  %v339_v13 = vrot.slane %v338_v5, 4 }
  0xb3   : > { %v598_v49 = vpop.f32.mrf.mxu2  ;;  %v638_v50 = vpop.f32.mrf.mxu3  ;;  %v530_v8 = vsel %vm333_vm3, %v528_v61, 0.0  ;;  %v351_v23 = vrot.slane %v350_v12, 4  ;;  %v340_v25 = vadd.f32 %v339_v13, %v338_v5 }
  0xb4   : > { %v465_v51 = vpop.f32.mrf.mxu0  ;;  %v510_v53 = vpop.f32.mrf.mxu1  ;;  %v639_v57 = vadd.f32 %v638_v50, %v598_v49 }
  0xb5   : > { %v466_v52 = vadd.f32 %v465_v51, %v419_v43  ;;  %v352_v34 = vadd.f32 %v351_v23, %v350_v12  ;;  %v341_v36 = vrot.slane %v340_v25, 2 }
  0xb7   : > { %v514_v54 = vadd.f32 %v510_v53, %v466_v52  ;;  %v353_v46 = vrot.slane %v352_v34, 2  ;;  %v342_v50 = vadd.f32 %v341_v36, %v340_v25 }
  0xb9   : > { %1096 = vst.msk [vmem:[%s1326_s19 + $0x18] sm:$0xff] %vm333_vm3, %v514_v54  ;;  %v529_v55 = vmul.f32 %v514_v54, %v514_v54  ;;  %v519_v62 = vsel %vm333_vm3, %v514_v54, 0.0  ;;  %v354_v60 = vadd.f32 %v353_v46, %v352_v34 }
  0xba   : > { %v520_v7 = vadd.f32 %v519_v62, %v518_v3  ;;  %v343_v3 = vrot.slane %v342_v50, 1 }
  0xbb   : > { %v600_v58 = vpop.f32.mrf.mxu2  ;;  %v640_v59 = vpop.f32.mrf.mxu3  ;;  %v531_v4 = vsel %vm333_vm3, %v529_v55, 0.0 }
  0xbc   : > { %v693_v63 = vpop.f32.mrf.mxu0  ;;  %v532_v10 = vadd.f32 %v531_v4, %v530_v8  ;;  %v777_v11 = vpop.f32.mrf.mxu1  ;;  %v521_v14 = vrot.slane %v520_v7, 4  ;;  %v641_v15 = vadd.f32 %v640_v59, %v600_v58  ;;  %v355_v8 = vrot.slane %v354_v60, 1 }
  0xbd   : > { %v698_v1 = vadd.f32 %v693_v63, %v639_v57  ;;  %v344_v13 = vadd.f32 %v343_v3, %v342_v50 }
  0xbe   : > { %v533_v20 = vrot.slane %v532_v10, 4  ;;  %v522_v26 = vadd.f32 %v521_v14, %v520_v7 }
  0xbf   : > { %1160 = vst.msk [vmem:[%s1326_s19 + $0x20] sm:$0xff] %vm333_vm3, %v698_v1  ;;  %v713_v21 = vmul.f32 %v698_v1, %v698_v1  ;;  %v703_v29 = vsel %vm333_vm3, %v698_v1, 0.0 }
  0xc0   : > { %v534_v30 = vadd.f32 %v533_v20, %v532_v10  ;;  %v523_v37 = vrot.slane %v522_v26, 2 }
  0xc1   : > { %v715_v31 = vsel %vm333_vm3, %v713_v21, 0.0 }
  0xc2   : > { %v535_v43 = vrot.slane %v534_v30, 2  ;;  %v524_v51 = vadd.f32 %v523_v37, %v522_v26 }
  0xc3   : > { %v823_v16 = vpop.f32.mrf.mxu2  ;;  %v868_v17 = vpop.f32.mrf.mxu3 }
  0xc4   : > { %v824_v18 = vadd.f32 %v823_v16, %v777_v11  ;;  %v695_v19 = vpop.f32.mrf.mxu0  ;;  %v779_v39 = vpop.f32.mrf.mxu1  ;;  %v536_v57 = vadd.f32 %v535_v43, %v534_v30  ;;  %v525_v63 = vrot.slane %v524_v51, 1 }
  0xc5   : > { %v699_v22 = vadd.f32 %v695_v19, %v641_v15 }
  0xc6   : > { %v873_v24 = vadd.f32 %v868_v17, %v824_v18  ;;  %v537_v4 = vrot.slane %v536_v57, 1  ;;  %v526_v9 = vadd.f32 %v525_v63, %v524_v51  ;;  %v356_v18 = vadd.f32 %v355_v8, %v354_v60 }
  0xc7   : > { %1161 = vst.msk [vmem:[%s1326_s19 + $0x28] sm:$0xff] %vm333_vm3, %v699_v22  ;;  %v704_v27 = vsel %vm333_vm3, %v699_v22, 0.0  ;;  %v714_v28 = vmul.f32 %v699_v22, %v699_v22 }
  0xc8   : > { %1217 = vst.msk [vmem:[%s1326_s19 + $0x30] sm:$0xff] %vm333_vm3, %v873_v24  ;;  %v705_v32 = vadd.f32 %v704_v27, %v703_v29  ;;  %v888_v47 = vmul.f32 %v873_v24, %v873_v24  ;;  %v878_v53 = vsel %vm333_vm3, %v873_v24, 0.0  ;;  %v538_v14 = vadd.f32 %v537_v4, %v536_v57  ;;  %v900_v27 = vld [vmem:[%s1539_s3] sm:$0x1] }
  0xc9   : > { %v716_v33 = vsel %vm333_vm3, %v714_v28, 0.0  ;;  %v527_v19 = vadd.f32 %v526_v9, %v344_v13 }
  0xca   : > { %v717_v35 = vadd.f32 %v716_v33, %v715_v31  ;;  %v706_v38 = vrot.slane %v705_v32, 4  ;;  %v890_v61 = vsel %vm333_vm3, %v888_v47, 0.0  ;;  %v539_v23 = vadd.f32 %v538_v14, %v356_v18  ;;  %v904_v31 = vld [vmem:[%s1539_s3 + $0x1] sm:$0x1] }
  0xcb   : > { %v825_v40 = vpop.f32.mrf.mxu2  ;;  %v870_v45 = vpop.f32.mrf.mxu3 }
  0xcc   : > { %v718_v41 = vrot.slane %v717_v35, 4  ;;  %v826_v42 = vadd.f32 %v825_v40, %v779_v39  ;;  %v707_v44 = vadd.f32 %v706_v38, %v705_v32 }
  0xce   : > { %v719_v48 = vadd.f32 %v718_v41, %v717_v35  ;;  %v874_v49 = vadd.f32 %v870_v45, %v826_v42  ;;  %v708_v52 = vrot.slane %v707_v44, 2 }
  0xd0   : > { %v720_v54 = vrot.slane %v719_v48, 2  ;;  %1218 = vst.msk [vmem:[%s1326_s19 + $0x38] sm:$0xff] %vm333_vm3, %v874_v49  ;;  %v879_v55 = vsel %vm333_vm3, %v874_v49, 0.0  ;;  %v889_v56 = vmul.f32 %v874_v49, %v874_v49  ;;  %v709_v58 = vadd.f32 %v708_v52, %v707_v44 }
  0xd1   : > { %v880_v59 = vadd.f32 %v879_v55, %v878_v53 }
  0xd2   : > { %v891_v62 = vsel %vm333_vm3, %v889_v56, 0.0  ;;  %v721_v0 = vadd.f32 %v720_v54, %v719_v48  ;;  %v710_v5 = vrot.slane %v709_v58, 1 }
  0xd3   : > { %v881_v1 = vrot.slane %v880_v59, 4  ;;  %v892_v2 = vadd.f32 %v891_v62, %v890_v61 }
  0xd4   : > { %v722_v10 = vrot.slane %v721_v0, 1  ;;  %v711_v15 = vadd.f32 %v710_v5, %v709_v58 }
  0xd5   : > { %v882_v6 = vadd.f32 %v881_v1, %v880_v59  ;;  %v893_v7 = vrot.slane %v892_v2, 4 }
  0xd6   : > { %v723_v20 = vadd.f32 %v722_v10, %v721_v0  ;;  %v712_v24 = vadd.f32 %v711_v15, %v527_v19 }
  0xd7   : > { %v883_v11 = vrot.slane %v882_v6, 2  ;;  %v894_v12 = vadd.f32 %v893_v7, %v892_v2 }
  0xd8   : > { %v724_v28 = vadd.f32 %v723_v20, %v539_v23 }
  0xd9   : > { %v884_v16 = vadd.f32 %v883_v11, %v882_v6  ;;  %v895_v17 = vrot.slane %v894_v12, 2 }
  0xdb   : > { %v885_v21 = vrot.slane %v884_v16, 1  ;;  %v896_v22 = vadd.f32 %v895_v17, %v894_v12 }
  0xdd   : > { %v886_v25 = vadd.f32 %v885_v21, %v884_v16  ;;  %v897_v26 = vrot.slane %v896_v22, 1 }
  0xdf   : > { %v887_v29 = vadd.f32 %v886_v25, %v712_v24  ;;  %v898_v30 = vadd.f32 %v897_v26, %v896_v22 }
  0xe1   : > { %v899_v32 = vadd.f32 %v898_v30, %v724_v28  ;;  %v901_v33 = vadd.f32 %v900_v27, %v887_v29 }
  0xe3   : > { %903 = vst.msk [vmem:[%s1539_s3] sm:$0x1] %vm902_vm4, %v901_v33  ;;  %v905_v34 = vadd.f32 %v904_v31, %v899_v32 }
  0xe5   : > { %906 = vst.msk [vmem:[%s1539_s3 + $0x1] sm:$0x1] %vm902_vm4, %v905_v34 }
  0xe6 PF: > { %s14_s12 = sadd.s32 1, %s1292_s12  }
  0xe7   : > { %p11_p5 = scmp.ge.s32.totalorder %s14_s12, 6  }
  0xe9   :  { %13 = sbr.rel (!%p11_p5) target bundleno = 1 (0x1), region = 75 }

// kernel: encoder_forward.11
= control target key start
LH: loop header
LB: loop body
LE: loop exit
PB: predicated region body
PF: predicated region fallthrough
CT: control target
= control target key end

     0   :  { %s307_s12 = smov 0   ;;  %s330_s0 = inlined_call_operand.vmem [shape: f32[4,4,2,64], index: 0, kind: input, shape index: {}]   ;;  %s331_s1 = inlined_call_operand.vmem [shape: f32[1,64], index: 1, kind: input, shape index: {}]   ;;  %s332_s2 = inlined_call_operand.vmem [shape: f32[1,64], index: 2, kind: input, shape index: {}]   ;;  %s333_s3 = inlined_call_operand.vmem [shape: f32[4,2,64], index: 3, kind: output, shape index: {}]  }
   0x1 LB: > { %s255_s13 = sadd.s32 4294967295, %s285_s12   ;;  %p259_p0 = scmp.ge.s32.totalorder %s285_s12, 1  ;;  %s285_s12 = sphi %s307_s12, %s13_s12  }
   0x2   : > { %p137_p1 = scmp.lt.s32.totalorder %s285_s12, 5 }
   0x4   : > { %p138_p2 = pnand %p259_p0, %p137_p1 }
   0x5   : > { %p160_p3 = scmp.lt.s32.totalorder (!%p138_p2), %s255_s13, 3 }
   0x6   : > { %141 = sbr.rel (%p138_p2) target bundleno = 30 (0x1e), region = 32 }
   0xb   : > { %s335_s13 = smov (!%p160_p3, %s255_s13), 3  ;;  %v277_v0 = vld [vmem:[%s331_s1] ss:$0 sm:$0xff]  ;;  %vm200_vm0 = vcmask 517120  }
   0xc   : > { %s268_s16 = sshll.u32 %s335_s13, 3  ;;  %v278_v1 = vld [vmem:[%s332_s2] ss:$0 sm:$0xff]  ;;  %s262_s22 = sshll.u32 %s335_s13, 1 }
   0xd   : > { %s164_s19 = scalar_lea.vmem %s330_s0, %s268_s16  ;;  %s168_s25 = scalar_lea.vmem %s333_s3, %s262_s22 }
   0xe   : > { %v171_v2 = vld [vmem:[%s164_s19] sm:$0x3]  ;;  %v263_v3 = vld [vmem:[%s164_s19 + $0x2] sm:$0x3]  ;;  %v264_v4 = vld [vmem:[%s164_s19 + $0x4] sm:$0x3] }
   0xf   : > { %v175_v5 = vmul.f32 %v277_v0, %v171_v2  ;;  %v183_v6 = vmul.f32 %v277_v0, %v263_v3  ;;  %v189_v7 = vmul.f32 %v277_v0, %v264_v4  ;;  %v265_v8 = vld [vmem:[%s164_s19 + $0x6] sm:$0x3] }
  0x10   : > { %v195_v9 = vmul.f32 %v277_v0, %v265_v8 }
  0x11   : > { %v179_v10 = vadd.f32 %v278_v1, %v175_v5  ;;  %v184_v11 = vadd.f32 %v278_v1, %v183_v6  ;;  %v190_v12 = vadd.f32 %v278_v1, %v189_v7 }
  0x12   : > { %v196_v13 = vadd.f32 %v278_v1, %v195_v9 }
  0x13   : > { %v180_v14 = vmax.f32 %v179_v10, 0.0  ;;  %v185_v15 = vmax.f32 %v184_v11, 0.0  ;;  %v191_v16 = vmax.f32 %v190_v12, 0.0 }
  0x14   : > { %v197_v18 = vmax.f32 %v196_v13, 0.0 }
  0x15   : > { %v186_v17 = vadd.f32 %v185_v15, %v180_v14 }
  0x17   : > { %v192_v19 = vadd.f32 %v191_v16, %v186_v17 }
  0x19   : > { %v198_v20 = vadd.f32 %v197_v18, %v192_v19 }
  0x1b   : > { %v199_v21 = vmul.f32 0.25, %v198_v20 }
  0x1d   : > { %201 = vst.msk [vmem:[%s168_s25] sm:$0x3] %vm200_vm0, %v199_v21 }
  0x1e PF: > { %s13_s12 = sadd.s32 1, %s285_s12  }
  0x1f   : > { %p10_p4 = scmp.ge.s32.totalorder %s13_s12, 6  }
  0x21   :  { %12 = sbr.rel (!%p10_p4) target bundleno = 1 (0x1), region = 65 }

// kernel: encoder_forward.10
= control target key start
LH: loop header
LB: loop body
LE: loop exit
PB: predicated region body
PF: predicated region fallthrough
CT: control target
= control target key end

     0   :  { %s1681_s12 = smov 0   ;;  %s1975_s0 = inlined_call_operand.vmem [shape: bf16[4,24,96], index: 0, kind: input, shape index: {}]   ;;  %s1976_s1 = inlined_call_operand.vmem [shape: bf16[3,96,32], index: 1, kind: input, shape index: {}]   ;;  %s1977_s2 = inlined_call_operand.vmem [shape: f32[4,4,4,32], index: 2, kind: output, shape index: {0}]   ;;  %s1978_s3 = inlined_call_operand.vmem [shape: f32[2,32], index: 3, kind: output, shape index: {1}]  }
   0x1 LB: > { %s1149_s13 = sadd.s32 4294967295, %s1658_s12   ;;  %p1153_p0 = scmp.ge.s32.totalorder %s1658_s12, 1  ;;  %s1658_s12 = sphi %s1681_s12, %s14_s12  }
   0x2   : > { %p135_p1 = scmp.lt.s32.totalorder %s1658_s12, 5 }
   0x4   : > { %p136_p2 = pnand %p1153_p0, %p135_p1 }
   0x5   : > { %p159_p3 = scmp.lt.s32.totalorder (!%p136_p2), %s1149_s13, 3  ;;  %p1157_p4 = scmp.ne.s32.totalorder (!%p136_p2), %s1149_s13, 0 }
   0x6   : > { %139 = sbr.rel (%p136_p2) target bundleno = 248 (0xf8), region = 28 }
   0xb   : > { %s160_s14 = scalar_select %p159_p3, %s1149_s13, 3 }
   0xc   : > { %173 = sbr.rel (%p1157_p4) target bundleno = 19 (0x13), region = 32 }
   0xd   : > { %s1642_s15 = smul.u32 12, %s160_s14  ;;  %s1567_s16 = sshll.u32 %s160_s14, 4 }
   0xe   : > { %s1692_s19 = scalar_lea.vmem %s1977_s2, %s1567_s16 }
   0xf   : > { %s1697_s22 = scalar_lea.vmem %s1975_s0, %s1642_s15 }
  0x11   : > { %vm174_vm0 = vcmask 254976   ;;  %v1660_v0 = vmov 0.0  }
  0x12   : > { %175 = vst.msk [vmem:[%s1978_s3] sm:$0x3] %vm174_vm0, %v1660_v0 }
  0x13 PF: > { %v1579_v1 = vld [vmem:[%s1976_s1 + $0x58] sm:$0xff]  ;;  %v1573_v2 = vld [vmem:[%s1976_s1 + $0x28] sm:$0xff]  ;;  %v1578_v5 = vld [vmem:[%s1976_s1 + $0x50] sm:$0xff]  ;;  %vm243_vm1 = vcmask 785408   ;;  %vm383_vm2 = vcmask 257024   ;;  %vm1083_vm3 = vcmask 253952  }
  0x14   : > { %v1585_v3 = vld [vmem:[%s1976_s1 + $0x88] sm:$0xff]  ;;  %v1598_v4 = vld [vmem:[%s1976_s1 + $0x58] sm:$0xff]  ;;  %249 = vmatpush.bf16.msra.mxu0 %v1579_v1  ;;  %301 = vmatpush.bf16.msra.mxu1 %v1573_v2  ;;  %v1572_v6 = vld [vmem:[%s1976_s1 + $0x20] sm:$0xff] }
  0x15   : > { %371 = vmatpush.bf16.msra.mxu2 %v1585_v3  ;;  %474 = vmatpush.bf16.msra.mxu3 %v1598_v4  ;;  %v1584_v7 = vld [vmem:[%s1976_s1 + $0x80] sm:$0xff]  ;;  %v1597_v8 = vld [vmem:[%s1976_s1 + $0x50] sm:$0xff]  ;;  %v1577_v9 = vld [vmem:[%s1976_s1 + $0x48] sm:$0xff] }
  0x16   : > { %v1571_v10 = vld [vmem:[%s1976_s1 + $0x18] sm:$0xff]  ;;  %v1596_v12 = vld [vmem:[%s1976_s1 + $0x48] sm:$0xff]  ;;  %v1576_v13 = vld [vmem:[%s1976_s1 + $0x40] sm:$0xff] }
  0x17   : > { %v1583_v11 = vld [vmem:[%s1976_s1 + $0x78] sm:$0xff]  ;;  %v1570_v14 = vld [vmem:[%s1976_s1 + $0x10] sm:$0xff]  ;;  %v1595_v16 = vld [vmem:[%s1976_s1 + $0x40] sm:$0xff] }
  0x18   : > { %250 = vmatpush.bf16.msra.mxu0 %v1578_v5  ;;  %302 = vmatpush.bf16.msra.mxu1 %v1572_v6  ;;  %v1582_v15 = vld [vmem:[%s1976_s1 + $0x70] sm:$0xff]  ;;  %v312_v17 = vld [vmem:[%s1697_s22] sm:$0x6]  ;;  %v416_v18 = vld [vmem:[%s1697_s22 + $0x8] sm:$0x6] }
  0x19   : > { %372 = vmatpush.bf16.msra.mxu2 %v1584_v7  ;;  %475 = vmatpush.bf16.msra.mxu3 %v1597_v8  ;;  %v189_v19 = vld [vmem:[%s1697_s22 + $0x4] sm:$0xc]  ;;  %v1575_v20 = vld [vmem:[%s1976_s1 + $0x38] sm:$0xff]  ;;  %v1569_v21 = vld [vmem:[%s1976_s1 + $0x8] sm:$0xff]  ;;  %v327_v22 = vunpack.c.l.b16 %v312_v17  ;;  %v430_v23 = vunpack.c.l.b16 %v416_v18 }
  0x1a   : > { %v1581_v24 = vld [vmem:[%s1976_s1 + $0x68] sm:$0xff]  ;;  %v1594_v25 = vld [vmem:[%s1976_s1 + $0x38] sm:$0xff]  ;;  %v204_v26 = vunpack.c.l.b16 %v189_v19  ;;  %v1574_v27 = vld [vmem:[%s1976_s1 + $0x30] sm:$0xff] }
  0x1b   : > { %v1568_v28 = vld [vmem:[%s1976_s1] sm:$0xff]  ;;  %v328_v29 = vpack.c.b16 %v327_v22, %v327_v22  ;;  %v431_v30 = vpack.c.b16 %v430_v23, %v430_v23  ;;  %v1593_v32 = vld [vmem:[%s1976_s1 + $0x30] sm:$0xff]  ;;  %v1592_v34 = vld [vmem:[%s1976_s1 + $0x28] sm:$0xff] }
  0x1c   : > { %251 = vmatpush.bf16.msra.mxu0 %v1577_v9  ;;  %303 = vmatpush.bf16.msra.mxu1 %v1571_v10  ;;  %v1580_v31 = vld [vmem:[%s1976_s1 + $0x60] sm:$0xff]  ;;  %v205_v33 = vpack.c.b16 %v204_v26, %v204_v26  ;;  %v1604_v35 = vld [vmem:[%s1976_s1 + $0x88] sm:$0xff]  ;;  %v1616_v36 = vld [vmem:[%s1976_s1 + $0x58] sm:$0xff] }
  0x1d   : > { %373 = vmatpush.bf16.msra.mxu2 %v1583_v11  ;;  %476 = vmatpush.bf16.msra.mxu3 %v1596_v12  ;;  %v1610_v37 = vld [vmem:[%s1976_s1 + $0x28] sm:$0xff]  ;;  %v329_v38 = vrot.slane %v328_v29, 1  ;;  %v432_v39 = vrot.slane %v431_v30, 1  ;;  %v1591_v41 = vld [vmem:[%s1976_s1 + $0x20] sm:$0xff]  ;;  %v1615_v44 = vld [vmem:[%s1976_s1 + $0x50] sm:$0xff] }
  0x1e   : > { %v206_v40 = vrot.slane %v205_v33, 2  ;;  %v1603_v42 = vld [vmem:[%s1976_s1 + $0x80] sm:$0xff]  ;;  %v1590_v46 = vld [vmem:[%s1976_s1 + $0x18] sm:$0xff]  ;;  %v1614_v48 = vld [vmem:[%s1976_s1 + $0x48] sm:$0xff] }
  0x1f   : > { %v176_v43 = vld [vmem:[%s1697_s22] sm:$0x3]  ;;  %v1602_v47 = vld [vmem:[%s1976_s1 + $0x78] sm:$0xff]  ;;  %v1589_v50 = vld [vmem:[%s1976_s1 + $0x10] sm:$0xff] }
  0x20   : > { %252 = vmatpush.bf16.msra.mxu0 %v1576_v13  ;;  %304 = vmatpush.bf16.msra.mxu1 %v1570_v14  ;;  %v1609_v45 = vld [vmem:[%s1976_s1 + $0x20] sm:$0xff]  ;;  %v1608_v49 = vld [vmem:[%s1976_s1 + $0x18] sm:$0xff]  ;;  %v1601_v51 = vld [vmem:[%s1976_s1 + $0x70] sm:$0xff] }
  0x21   : > { %374 = vmatpush.bf16.msra.mxu2 %v1582_v15  ;;  %477 = vmatpush.bf16.msra.mxu3 %v1595_v16  ;;  %v1613_v52 = vld [vmem:[%s1976_s1 + $0x40] sm:$0xff]  ;;  %v1607_v53 = vld [vmem:[%s1976_s1 + $0x10] sm:$0xff]  ;;  %v1588_v56 = vld [vmem:[%s1976_s1 + $0x8] sm:$0xff] }
  0x22   : > { %v641_v54 = vld [vmem:[%s1697_s22] sm:$0x6]  ;;  %v628_v55 = vld [vmem:[%s1697_s22 + $0x4] sm:$0xc]  ;;  %v1600_v57 = vld [vmem:[%s1976_s1 + $0x68] sm:$0xff] }
  0x23   : > { %v1612_v58 = vld [vmem:[%s1976_s1 + $0x38] sm:$0xff]  ;;  %v655_v59 = vunpack.c.l.b16 %v641_v54  ;;  %v1606_v60 = vld [vmem:[%s1976_s1 + $0x8] sm:$0xff]  ;;  %v1296_v61 = vld [vmem:[%s1697_s22] sm:$0x8]  ;;  %v711_v63 = vunpack.c.l.b16 %v628_v55 }
  0x24   : > { %253 = vmatpush.bf16.msra.mxu0 %v1575_v20  ;;  %305 = vmatpush.bf16.msra.mxu1 %v1569_v21  ;;  %v1586_v62 = vld [vmem:[%s1697_s22] sm:$0x10]  ;;  %v1611_v4 = vld [vmem:[%s1976_s1 + $0x30] sm:$0xff]  ;;  %v1623_v7 = vld [vmem:[%s1976_s1 + $0x88] sm:$0xff] }
  0x25   : > { %375 = vmatpush.bf16.msra.mxu2 %v1581_v24  ;;  %478 = vmatpush.bf16.msra.mxu3 %v1594_v25  ;;  %v1587_v0 = vld [vmem:[%s1976_s1] sm:$0xff]  ;;  %v1297_v2 = vor.u32 %v1586_v62, %v1296_v61  ;;  %v656_v3 = vpack.c.b16 %v655_v59, %v655_v59  ;;  %v712_v6 = vpack.c.b16 %v711_v63, %v711_v63  ;;  %v1635_v8 = vld [vmem:[%s1976_s1 + $0x58] sm:$0xff]  ;;  %v1629_v9 = vld [vmem:[%s1976_s1 + $0x28] sm:$0xff] }
  0x26   : > { %v1599_v1 = vld [vmem:[%s1976_s1 + $0x60] sm:$0xff]  ;;  %v1641_v10 = vld [vmem:[%s1976_s1 + $0x88] sm:$0xff]  ;;  %v1634_v16 = vld [vmem:[%s1976_s1 + $0x50] sm:$0xff] }
  0x27   : > { %v1605_v5 = vld [vmem:[%s1976_s1] sm:$0xff]  ;;  %v490_v11 = vrot.slane %v1297_v2, 3  ;;  %v657_v12 = vrot.slane %v656_v3, 1  ;;  %v713_v13 = vrot.slane %v712_v6, 2  ;;  %v1621_v19 = vld [vmem:[%s1976_s1 + $0x78] sm:$0xff]  ;;  %v1633_v20 = vld [vmem:[%s1976_s1 + $0x48] sm:$0xff] }
  0x28   : > { %254 = vmatpush.bf16.msra.mxu0 %v1574_v27  ;;  %306 = vmatpush.bf16.msra.mxu1 %v1568_v28  ;;  %v543_v14 = vld [vmem:[%s1697_s22 + $0x4] sm:$0x3]  ;;  %v1627_v21 = vld [vmem:[%s1976_s1 + $0x18] sm:$0xff]  ;;  %v1620_v23 = vld [vmem:[%s1976_s1 + $0x70] sm:$0xff] }
  0x29   : > { %376 = vmatpush.bf16.msra.mxu2 %v1580_v31  ;;  %479 = vmatpush.bf16.msra.mxu3 %v1593_v32  ;;  %v1622_v15 = vld [vmem:[%s1976_s1 + $0x80] sm:$0xff]  ;;  %v1639_v22 = vld [vmem:[%s1976_s1 + $0x78] sm:$0xff]  ;;  %v1626_v25 = vld [vmem:[%s1976_s1 + $0x10] sm:$0xff] }
  0x2a   : > { %v1628_v17 = vld [vmem:[%s1976_s1 + $0x20] sm:$0xff]  ;;  %v1638_v26 = vld [vmem:[%s1976_s1 + $0x70] sm:$0xff]  ;;  %v858_v27 = vld [vmem:[%s1697_s22 + $0x8] sm:$0x6] }
  0x2b   : > { %1194 = vmatmul.msk.bf16.vlgmr.msra.gmra.mxu0 %vm243_vm1, %v206_v40  ;;  %1219 = vmatmul.msk.bf16.vlgmr.msra.gmra.mxu1 %vm243_vm1, %v176_v43  ;;  %v1640_v18 = vld [vmem:[%s1976_s1 + $0x80] sm:$0xff]  ;;  %v992_v28 = vld [vmem:[%s1697_s22 + $0x8] sm:$0xc]  ;;  %v1631_v30 = vld [vmem:[%s1976_s1 + $0x38] sm:$0xff]  ;;  %v937_v33 = vunpack.c.l.b16 %v858_v27 }
  0x2c   : > { %532 = vmatpush.bf16.msrb.mxu0 %v1592_v34  ;;  %597 = vmatpush.bf16.msrb.mxu1 %v1604_v35  ;;  %v1632_v24 = vld [vmem:[%s1976_s1 + $0x40] sm:$0xff]  ;;  %v1619_v29 = vld [vmem:[%s1976_s1 + $0x68] sm:$0xff]  ;;  %v1006_v34 = vunpack.c.l.b16 %v992_v28 }
  0x2d   : > { %699 = vmatpush.bf16.msrb.mxu2 %v1616_v36  ;;  %755 = vmatpush.bf16.msrb.mxu3 %v1610_v37  ;;  %v1437_v31 = vld [vmem:[%s1697_s22 + $0x4] sm:$0x8]  ;;  %v1617_v32 = vld [vmem:[%s1697_s22 + $0x4] sm:$0x10]  ;;  %v938_v40 = vpack.c.b16 %v937_v33, %v937_v33 }
  0x2e   : > { %1256 = vmatmul.msk.bf16.vlgmr.msra.gmra.mxu2 %vm243_vm1, %v329_v38  ;;  %1293 = vmatmul.msk.bf16.vlgmr.msra.gmra.mxu3 %vm243_vm1, %v432_v39  ;;  %v1625_v35 = vld [vmem:[%s1976_s1 + $0x8] sm:$0xff]  ;;  %v1438_v37 = vor.u32 %v1617_v32, %v1437_v31  ;;  %v1618_v38 = vld [vmem:[%s1976_s1 + $0x60] sm:$0xff]  ;;  %v1630_v39 = vld [vmem:[%s1976_s1 + $0x30] sm:$0xff] }
  0x2f   : > { %v1637_v36 = vld [vmem:[%s1976_s1 + $0x68] sm:$0xff]  ;;  %v1636_v43 = vld [vmem:[%s1976_s1 + $0x60] sm:$0xff] }
  0x30   : > { %533 = vmatpush.bf16.msrb.mxu0 %v1591_v41  ;;  %598 = vmatpush.bf16.msrb.mxu1 %v1603_v42  ;;  %v1007_v41 = vpack.c.b16 %v1006_v34, %v1006_v34  ;;  %v1624_v42 = vld [vmem:[%s1976_s1] sm:$0xff] }
  0x31   : > { %700 = vmatpush.bf16.msrb.mxu2 %v1615_v44  ;;  %756 = vmatpush.bf16.msrb.mxu3 %v1609_v45  ;;  %v785_v44 = vrot.slane %v1438_v37, 3  ;;  %v871_v45 = vld [vmem:[%s1697_s22 + $0x4] sm:$0x3] }
  0x34   : > { %534 = vmatpush.bf16.msrb.mxu0 %v1590_v46  ;;  %599 = vmatpush.bf16.msrb.mxu1 %v1602_v47  ;;  %v939_v46 = vrot.slane %v938_v40, 1  ;;  %v1008_v47 = vrot.slane %v1007_v41, 2 }
  0x35   : > { %701 = vmatpush.bf16.msrb.mxu2 %v1614_v48  ;;  %757 = vmatpush.bf16.msrb.mxu3 %v1608_v49 }
  0x38   : > { %535 = vmatpush.bf16.msrb.mxu0 %v1589_v50  ;;  %600 = vmatpush.bf16.msrb.mxu1 %v1601_v51 }
  0x39   : > { %702 = vmatpush.bf16.msrb.mxu2 %v1613_v52  ;;  %758 = vmatpush.bf16.msrb.mxu3 %v1607_v53 }
  0x3c   : > { %536 = vmatpush.bf16.msrb.mxu0 %v1588_v56  ;;  %601 = vmatpush.bf16.msrb.mxu1 %v1600_v57 }
  0x3d   : > { %703 = vmatpush.bf16.msrb.mxu2 %v1612_v58  ;;  %759 = vmatpush.bf16.msrb.mxu3 %v1606_v60 }
  0x40   : > { %537 = vmatpush.bf16.msrb.mxu0 %v1587_v0  ;;  %602 = vmatpush.bf16.msrb.mxu1 %v1599_v1 }
  0x41   : > { %704 = vmatpush.bf16.msrb.mxu2 %v1611_v4  ;;  %760 = vmatpush.bf16.msrb.mxu3 %v1605_v5 }
  0x43   : > { %1322 = vmatmul.msk.bf16.vlgmr.msrb.gmra.mxu0 %vm243_vm1, %v490_v11  ;;  %1359 = vmatmul.msk.bf16.vlgmr.msrb.gmra.mxu1 %vm243_vm1, %v543_v14 }
  0x44   : > { %827 = vmatpush.bf16.msra.mxu0 %v1623_v7  ;;  %925 = vmatpush.bf16.msra.mxu1 %v1635_v8 }
  0x45   : > { %981 = vmatpush.bf16.msra.mxu2 %v1629_v9  ;;  %1050 = vmatpush.bf16.msra.mxu3 %v1641_v10 }
  0x46   : > { %1397 = vmatmul.msk.bf16.vlgmr.msrb.gmra.mxu2 %vm243_vm1, %v657_v12  ;;  %1422 = vmatmul.msk.bf16.vlgmr.msrb.gmra.mxu3 %vm243_vm1, %v713_v13 }
  0x48   : > { %828 = vmatpush.bf16.msra.mxu0 %v1622_v15  ;;  %926 = vmatpush.bf16.msra.mxu1 %v1634_v16 }
  0x49   : > { %982 = vmatpush.bf16.msra.mxu2 %v1628_v17  ;;  %1051 = vmatpush.bf16.msra.mxu3 %v1640_v18 }
  0x4c   : > { %829 = vmatpush.bf16.msra.mxu0 %v1621_v19  ;;  %927 = vmatpush.bf16.msra.mxu1 %v1633_v20 }
  0x4d   : > { %983 = vmatpush.bf16.msra.mxu2 %v1627_v21  ;;  %1052 = vmatpush.bf16.msra.mxu3 %v1639_v22 }
  0x50   : > { %830 = vmatpush.bf16.msra.mxu0 %v1620_v23  ;;  %928 = vmatpush.bf16.msra.mxu1 %v1632_v24 }
  0x51   : > { %984 = vmatpush.bf16.msra.mxu2 %v1626_v25  ;;  %1053 = vmatpush.bf16.msra.mxu3 %v1638_v26 }
  0x54   : > { %831 = vmatpush.bf16.msra.mxu0 %v1619_v29  ;;  %929 = vmatpush.bf16.msra.mxu1 %v1631_v30 }
  0x55   : > { %985 = vmatpush.bf16.msra.mxu2 %v1625_v35  ;;  %1054 = vmatpush.bf16.msra.mxu3 %v1637_v36 }
  0x58   : > { %832 = vmatpush.bf16.msra.mxu0 %v1618_v38  ;;  %930 = vmatpush.bf16.msra.mxu1 %v1630_v39 }
  0x59   : > { %986 = vmatpush.bf16.msra.mxu2 %v1624_v42  ;;  %1055 = vmatpush.bf16.msra.mxu3 %v1636_v43 }
  0x5b   : > { %1463 = vmatmul.msk.bf16.vlgmr.msra.gmra.mxu0 %vm243_vm1, %v785_v44  ;;  %1501 = vmatmul.msk.bf16.vlgmr.msra.gmra.mxu1 %vm243_vm1, %v871_v45 }
  0x5c   : > { %1526 = vmatmul.msk.bf16.vlgmr.msra.gmra.mxu2 %vm243_vm1, %v939_v46  ;;  %1563 = vmatmul.msk.bf16.vlgmr.msra.gmra.mxu3 %vm243_vm1, %v1008_v47 }
  0xa8   : > { %v256_v48 = vpop.f32.mrf.mxu0  ;;  %v308_v49 = vpop.f32.mrf.mxu1 }
  0xa9   : > { %v309_v50 = vadd.f32 %v308_v49, %v256_v48 }
  0xb0   : > { %v258_v54 = vpop.f32.mrf.mxu0  ;;  %v310_v55 = vpop.f32.mrf.mxu1 }
  0xb1   : > { %v378_v51 = vpop.f32.mrf.mxu2  ;;  %v481_v52 = vpop.f32.mrf.mxu3 }
  0xb2   : > { %v382_v53 = vadd.f32 %v378_v51, %v309_v50 }
  0xb4   : > { %384 = vst.msk [vmem:[%s1692_s19] sm:$0xf] %vm383_vm2, %v382_v53  ;;  %v393_v3 = vmul.f32 %v382_v53, %v382_v53  ;;  %v385_v7 = vsel %vm383_vm2, %v382_v53, 0.0 }
  0xb5   : > { %v386_v11 = vrot.slane %v385_v7, 4 }
  0xb6   : > { %v394_v9 = vsel %vm383_vm2, %v393_v3, 0.0 }
  0xb7   : > { %v395_v14 = vrot.slane %v394_v9, 4  ;;  %v387_v19 = vadd.f32 %v386_v11, %v385_v7 }
  0xb9   : > { %v380_v56 = vpop.f32.mrf.mxu2  ;;  %v483_v57 = vpop.f32.mrf.mxu3  ;;  %v396_v23 = vadd.f32 %v395_v14, %v394_v9  ;;  %v388_v27 = vrot.slane %v387_v19, 2  ;;  %v1081_v14 = vld [vmem:[%s1978_s3] sm:$0x1] }
  0xbb   : > { %v397_v33 = vrot.slane %v396_v23, 2  ;;  %v389_v40 = vadd.f32 %v388_v27, %v387_v19 }
  0xbd   : > { %v398_v45 = vadd.f32 %v397_v33, %v396_v23  ;;  %v390_v51 = vrot.slane %v389_v40, 1 }
  0xc0   : > { %v539_v58 = vpop.f32.mrf.mxu0  ;;  %v604_v60 = vpop.f32.mrf.mxu1 }
  0xc1   : > { %v540_v59 = vadd.f32 %v539_v58, %v481_v52 }
  0xc3   : > { %v608_v61 = vadd.f32 %v604_v60, %v540_v59  ;;  %v399_v59 = vrot.slane %v398_v45, 1 }
  0xc5   : > { %1360 = vst.msk [vmem:[%s1692_s19 + $0x4] sm:$0xf] %vm383_vm2, %v608_v61  ;;  %v619_v2 = vmul.f32 %v608_v61, %v608_v61  ;;  %v611_v5 = vsel %vm383_vm2, %v608_v61, 0.0 }
  0xc6   : > { %v612_v10 = vrot.slane %v611_v5, 4 }
  0xc7   : > { %v620_v8 = vsel %vm383_vm2, %v619_v2, 0.0 }
  0xc8   : > { %v541_v0 = vpop.f32.mrf.mxu0  ;;  %v606_v1 = vpop.f32.mrf.mxu1  ;;  %v621_v12 = vrot.slane %v620_v8, 4  ;;  %v613_v17 = vadd.f32 %v612_v10, %v611_v5  ;;  %v400_v5 = vadd.f32 %v399_v59, %v398_v45 }
  0xc9   : > { %v706_v62 = vpop.f32.mrf.mxu2  ;;  %v762_v63 = vpop.f32.mrf.mxu3  ;;  %v391_v0 = vadd.f32 %v390_v51, %v389_v40 }
  0xca   : > { %v763_v13 = vadd.f32 %v762_v63, %v706_v62  ;;  %v622_v20 = vadd.f32 %v621_v12, %v620_v8  ;;  %v614_v25 = vrot.slane %v613_v17, 2 }
  0xcc   : > { %v623_v30 = vrot.slane %v622_v20, 2  ;;  %v615_v39 = vadd.f32 %v614_v25, %v613_v17 }
  0xce   : > { %v624_v43 = vadd.f32 %v623_v30, %v622_v20  ;;  %v616_v48 = vrot.slane %v615_v39, 1 }
  0xd0   : > { %v625_v53 = vrot.slane %v624_v43, 1  ;;  %v617_v60 = vadd.f32 %v616_v48, %v615_v39 }
  0xd1   : > { %v708_v4 = vpop.f32.mrf.mxu2  ;;  %v764_v6 = vpop.f32.mrf.mxu3 }
  0xd2   : > { %v626_v1 = vadd.f32 %v625_v53, %v624_v43  ;;  %v618_v6 = vadd.f32 %v617_v60, %v391_v0 }
  0xd4   : > { %v627_v10 = vadd.f32 %v626_v1, %v400_v5 }
  0xd8   : > { %v834_v15 = vpop.f32.mrf.mxu0  ;;  %v932_v16 = vpop.f32.mrf.mxu1 }
  0xd9   : > { %v838_v18 = vadd.f32 %v834_v15, %v763_v13 }
  0xdb   : > { %1464 = vst.msk [vmem:[%s1692_s19 + $0x8] sm:$0xf] %vm383_vm2, %v838_v18  ;;  %v841_v21 = vsel %vm383_vm2, %v838_v18, 0.0  ;;  %v849_v22 = vmul.f32 %v838_v18, %v838_v18  ;;  %v1085_v18 = vld [vmem:[%s1978_s3 + $0x1] sm:$0x1] }
  0xdc   : > { %v842_v24 = vrot.slane %v841_v21, 4 }
  0xdd   : > { %v850_v26 = vsel %vm383_vm2, %v849_v22, 0.0 }
  0xde   : > { %v843_v28 = vadd.f32 %v842_v24, %v841_v21  ;;  %v851_v29 = vrot.slane %v850_v26, 4 }
  0xdf   : > { %v988_v31 = vpop.f32.mrf.mxu2  ;;  %v1057_v32 = vpop.f32.mrf.mxu3 }
  0xe0   : > { %v844_v34 = vrot.slane %v843_v28, 2  ;;  %v852_v35 = vadd.f32 %v851_v29, %v850_v26  ;;  %v989_v36 = vadd.f32 %v988_v31, %v932_v16  ;;  %v836_v37 = vpop.f32.mrf.mxu0  ;;  %v934_v38 = vpop.f32.mrf.mxu1 }
  0xe2   : > { %v853_v41 = vrot.slane %v852_v35, 2  ;;  %v1061_v42 = vadd.f32 %v1057_v32, %v989_v36  ;;  %v845_v44 = vadd.f32 %v844_v34, %v843_v28 }
  0xe4   : > { %1564 = vst.msk [vmem:[%s1692_s19 + $0xc] sm:$0xf] %vm383_vm2, %v1061_v42  ;;  %v1064_v46 = vsel %vm383_vm2, %v1061_v42, 0.0  ;;  %v1072_v47 = vmul.f32 %v1061_v42, %v1061_v42  ;;  %v854_v49 = vadd.f32 %v853_v41, %v852_v35  ;;  %v846_v54 = vrot.slane %v845_v44, 1 }
  0xe5   : > { %v1065_v50 = vrot.slane %v1064_v46, 4 }
  0xe6   : > { %v1073_v52 = vsel %vm383_vm2, %v1072_v47, 0.0  ;;  %v855_v61 = vrot.slane %v854_v49, 1  ;;  %v847_v2 = vadd.f32 %v846_v54, %v845_v44 }
  0xe7   : > { %v1066_v55 = vadd.f32 %v1065_v50, %v1064_v46  ;;  %v1074_v56 = vrot.slane %v1073_v52, 4  ;;  %v990_v57 = vpop.f32.mrf.mxu2  ;;  %v1059_v58 = vpop.f32.mrf.mxu3 }
  0xe8   : > { %v856_v7 = vadd.f32 %v855_v61, %v854_v49  ;;  %v848_v11 = vadd.f32 %v847_v2, %v618_v6 }
  0xe9   : > { %v1067_v62 = vrot.slane %v1066_v55, 2  ;;  %v1075_v63 = vadd.f32 %v1074_v56, %v1073_v52 }
  0xea   : > { %v857_v15 = vadd.f32 %v856_v7, %v627_v10 }
  0xeb   : > { %v1068_v3 = vadd.f32 %v1067_v62, %v1066_v55  ;;  %v1076_v4 = vrot.slane %v1075_v63, 2 }
  0xed   : > { %v1069_v8 = vrot.slane %v1068_v3, 1  ;;  %v1077_v9 = vadd.f32 %v1076_v4, %v1075_v63 }
  0xef   : > { %v1070_v12 = vadd.f32 %v1069_v8, %v1068_v3  ;;  %v1078_v13 = vrot.slane %v1077_v9, 1 }
  0xf1   : > { %v1071_v16 = vadd.f32 %v1070_v12, %v848_v11  ;;  %v1079_v17 = vadd.f32 %v1078_v13, %v1077_v9 }
  0xf3   : > { %v1080_v19 = vadd.f32 %v1079_v17, %v857_v15  ;;  %v1082_v20 = vadd.f32 %v1081_v14, %v1071_v16 }
  0xf5   : > { %1084 = vst.msk [vmem:[%s1978_s3] sm:$0x1] %vm1083_vm3, %v1082_v20  ;;  %v1086_v21 = vadd.f32 %v1085_v18, %v1080_v19 }
  0xf7   : > { %1087 = vst.msk [vmem:[%s1978_s3 + $0x1] sm:$0x1] %vm1083_vm3, %v1086_v21 }
  0xf8 PF: > { %s14_s12 = sadd.s32 1, %s1658_s12  }
  0xf9   : > { %p11_p5 = scmp.ge.s32.totalorder %s14_s12, 6  }
  0xfb   :  { %13 = sbr.rel (!%p11_p5) target bundleno = 1 (0x1), region = 75 }

</bundles_post_ra>
